<compile_context>
chip_gen: v7x
topology: tpu7x:2x2x1
jax: 0.10.0
libtpu: 0.0.40
codegen_flags: <defaults>
</compile_context>

<pallas_src>
import functools

import jax
import jax.numpy as jnp
from jax.experimental import pallas as pl
from jax.experimental.pallas import tpu as pltpu


# ----------------------------------------------------------------------------
# Helpers
# ----------------------------------------------------------------------------
def _round_up(x, m):
    return (x + m - 1) // m * m


def _vmem_limit_bytes():
    """Generation-aware scoped-VMEM budget (leave headroom for double buffers)."""
    try:
        cap = int(pltpu.get_tpu_info().vmem_capacity_bytes)
    except Exception:
        cap = 64 * 1024 * 1024  # conservative (v7x physical VMEM per TC)
    return min((cap * 3) // 4, 96 * 1024 * 1024)


_VMEM_LIMIT = _vmem_limit_bytes()


# ----------------------------------------------------------------------------
# Fused DenseLayer kernel (one batch element per grid step)
# ----------------------------------------------------------------------------
def _dense_layer_kernel(x_ref, w1_ref, s1_ref, b1_ref, s2_ref, b2_ref, w2_ref,
                        o_ref, abuf_ref, acc_ref, *, H, W, PAD):
    # x_ref : (1, H*W, Cp)    bf16   flattened NHWC input (channels padded)
    # w1_ref: (Cp, C4p)       bf16   1x1 conv weight
    # s1/b1 : (1, Cp)         f32    folded bn1 scale / bias
    # s2/b2 : (1, C4p)        f32    folded bn2 scale / bias
    # w2_ref: (9, C4p, Gp)    bf16   3x3 conv weight, tap-major (dy*3+dx)
    # o_ref : (1, H*W, Gp)    f32
    # abuf  : (H*W+2*PAD, C4p) bf16  flat zero-padded stage-1 activation
    # acc   : (H*W, Gp)       f32    MXU accumulator
    HW = H * W

    # ---- Stage 1: relu(bn2( relu(bn1(x)) @ W1 )), all in VMEM / vregs -------
    xa = x_ref[0].astype(jnp.float32) * s1_ref[...] + b1_ref[...]
    xa = jnp.maximum(xa, 0.0).astype(jnp.bfloat16)
    a = jnp.dot(xa, w1_ref[...], preferred_element_type=jnp.float32)
    a = jnp.maximum(a * s2_ref[...] + b2_ref[...], 0.0).astype(jnp.bfloat16)

    # Stash into a flat, zero-padded VMEM buffer: the nine 3x3 taps become
    # contiguous shifted row windows.  PAD is a multiple of 16 so this bf16
    # store is fully sublane-aligned.
    abuf_ref[...] = jnp.zeros_like(abuf_ref)
    abuf_ref[PAD:PAD + HW, :] = a

    # Column-wrap masks (flat windows wrap across image rows when dx != 1).
    col = jax.lax.broadcasted_iota(jnp.int32, (HW, 1), 0) % W
    mask_left = (col != 0).astype(jnp.bfloat16)        # kills x == 0     (dx == 0)
    mask_right = (col != W - 1).astype(jnp.bfloat16)   # kills x == W - 1 (dx == 2)

    # ---- Stage 2: 3x3 conv (pad=1, no bias) as 9 in-VMEM tap matmuls --------
    acc_ref[...] = jnp.zeros_like(acc_ref)
    for dy in range(3):
        for dx in range(3):
            start = PAD + (dy - 1) * W + (dx - 1)
            patch = abuf_ref[start:start + HW, :]       # (HW, C4p) bf16
            if dx == 0:
                patch = patch * mask_left
            elif dx == 2:
                patch = patch * mask_right
            acc_ref[...] += jnp.dot(patch, w2_ref[dy * 3 + dx],
                                    preferred_element_type=jnp.float32)

    o_ref[...] = acc_ref[...].astype(o_ref.dtype)[None]


# ----------------------------------------------------------------------------
# DenseLayer forward (NCHW in / NCHW out, matches the PyTorch module)
# ----------------------------------------------------------------------------
def dense_layer_forward(params, x_nchw, eps=1e-5):
    p = params
    N, Cin, H, W = x_nchw.shape
    c4 = p["conv1_w"].shape[0]
    G = p["conv2_w"].shape[0]
    HW = H * W

    Cp = _round_up(Cin, 128)
    C4p = _round_up(c4, 128)
    Gp = _round_up(G, 128)
    PAD = _round_up(W + 1, 16)          # >= W+1 and bf16 sublane-pack aligned

    # NCHW -> (N, H*W, C) with channel zero-pad (padded channels contribute 0:
    # their folded scale/bias and weight rows are zero).
    x_nhwc = jnp.transpose(x_nchw, (0, 2, 3, 1))
    x2 = x_nhwc.reshape(N, HW, Cin).astype(jnp.bfloat16)
    x2 = jnp.pad(x2, ((0, 0), (0, 0), (0, Cp - Cin)))

    # Fold BatchNorms (inference semantics) into per-channel scale / bias (f32).
    s1 = p["bn1"]["gamma"] / jnp.sqrt(p["bn1"]["var"] + eps)
    b1 = p["bn1"]["beta"] - p["bn1"]["mean"] * s1
    s2 = p["bn2"]["gamma"] / jnp.sqrt(p["bn2"]["var"] + eps)
    b2 = p["bn2"]["beta"] - p["bn2"]["mean"] * s2
    s1p = jnp.pad(s1.astype(jnp.float32), (0, Cp - Cin)).reshape(1, Cp)
    b1p = jnp.pad(b1.astype(jnp.float32), (0, Cp - Cin)).reshape(1, Cp)
    s2p = jnp.pad(s2.astype(jnp.float32), (0, C4p - c4)).reshape(1, C4p)
    b2p = jnp.pad(b2.astype(jnp.float32), (0, C4p - c4)).reshape(1, C4p)

    # conv1: (c4, Cin, 1, 1) -> (Cp, C4p)
    w1 = jnp.transpose(p["conv1_w"].reshape(c4, Cin)).astype(jnp.bfloat16)
    w1 = jnp.pad(w1, ((0, Cp - Cin), (0, C4p - c4)))

    # conv2: (G, c4, 3, 3) -> (9, C4p, Gp), tap-major (dy*3+dx)
    w2 = jnp.transpose(p["conv2_w"], (2, 3, 1, 0)).reshape(9, c4, G)
    w2 = jnp.pad(w2.astype(jnp.bfloat16), ((0, 0), (0, C4p - c4), (0, Gp - G)))

    out = pl.pallas_call(
        functools.partial(_dense_layer_kernel, H=H, W=W, PAD=PAD),
        out_shape=jax.ShapeDtypeStruct((N, HW, Gp), jnp.float32),
        grid=(N,),
        in_specs=[
            pl.BlockSpec((1, HW, Cp), lambda n: (n, 0, 0)),
            pl.BlockSpec((Cp, C4p), lambda n: (0, 0)),
            pl.BlockSpec((1, Cp), lambda n: (0, 0)),
            pl.BlockSpec((1, Cp), lambda n: (0, 0)),
            pl.BlockSpec((1, C4p), lambda n: (0, 0)),
            pl.BlockSpec((1, C4p), lambda n: (0, 0)),
            pl.BlockSpec((9, C4p, Gp), lambda n: (0, 0, 0)),
        ],
        out_specs=pl.BlockSpec((1, HW, Gp), lambda n: (n, 0, 0)),
        scratch_shapes=[
            pltpu.VMEM((HW + 2 * PAD, C4p), jnp.bfloat16),
            pltpu.VMEM((HW, Gp), jnp.float32),
        ],
        compiler_params=pltpu.CompilerParams(
            dimension_semantics=("parallel",),
            vmem_limit_bytes=_VMEM_LIMIT,
        ),
    )(x2, w1, s1p, b1p, s2p, b2p, w2)

    new = out.reshape(N, H, W, Gp)[..., :G]
    new_nchw = jnp.transpose(new, (0, 3, 1, 2)).astype(x_nchw.dtype)
    return jnp.concatenate([x_nchw, new_nchw], axis=1)


# ----------------------------------------------------------------------------
# Pure-JAX reference (for numerical validation)
# ----------------------------------------------------------------------------
def dense_layer_reference(params, x, eps=1e-5):
    def bn(v, b):
        sh = (1, -1, 1, 1)
        return ((v - b["mean"].reshape(sh)) / jnp.sqrt(b["var"].reshape(sh) + eps)
                * b["gamma"].reshape(sh) + b["beta"].reshape(sh))

    h = jax.nn.relu(bn(x, params["bn1"]))
    h = jax.lax.conv_general_dilated(
        h, params["conv1_w"], (1, 1), "VALID",
        dimension_numbers=("NCHW", "OIHW", "NCHW"))
    h = jax.nn.relu(bn(h, params["bn2"]))
    h = jax.lax.conv_general_dilated(
        h, params["conv2_w"], (1, 1), ((1, 1), (1, 1)),
        dimension_numbers=("NCHW", "OIHW", "NCHW"))
    return jnp.concatenate([x, h], axis=1)


# ----------------------------------------------------------------------------
# Deterministic parameter initialization (shapes follow the PyTorch module)
# ----------------------------------------------------------------------------
def init_params(key, in_channels, growth_rate):
    c4 = 4 * growth_rate
    ks = iter(jax.random.split(key, 16))

    def bn(c):
        return dict(
            gamma=1.0 + 0.1 * jax.random.normal(next(ks), (c,), jnp.float32),
            beta=0.1 * jax.random.normal(next(ks), (c,), jnp.float32),
            mean=0.1 * jax.random.normal(next(ks), (c,), jnp.float32),
            var=0.9 + 0.2 * jax.random.uniform(next(ks), (c,), jnp.float32),
        )

    return dict(
        bn1=bn(in_channels),
        conv1_w=0.05 * jax.random.normal(next(ks), (c4, in_channels, 1, 1), jnp.float32),
        bn2=bn(c4),
        conv2_w=0.05 * jax.random.normal(next(ks), (growth_rate, c4, 3, 3), jnp.float32),
    )


if __name__ == "__main__":
    in_channels, growth_rate = 64, 32
    N, H, W = 2, 16, 16

    key = jax.random.PRNGKey(0)
    pkey, xkey = jax.random.split(key)
    params = init_params(pkey, in_channels, growth_rate)
    x = jax.random.normal(xkey, (N, in_channels, H, W), jnp.float32)

    fwd = jax.jit(dense_layer_forward)
    out = jax.block_until_ready(fwd(params, x))

    assert out.shape == (N, in_channels + growth_rate, H, W), out.shape
    assert out.dtype == jnp.float32
    assert bool(jnp.all(jnp.isfinite(out)))

    ref = dense_layer_reference(params, x)
    max_err = float(jnp.max(jnp.abs(out - ref)))
    assert max_err < 1e-1, f"max abs error vs reference: {max_err}"

    print("KERNEL_OK")
</pallas_src>

<mosaic_0001>
module attributes {stable_mosaic.version = 11 : i64} {
  func.func @_dense_layer_kernel(%arg0: i32, %arg1: memref<1x256x128xbf16, #tpu.memory_space<vmem>>, %arg2: memref<128x128xbf16, #tpu.memory_space<vmem>>, %arg3: memref<1x128xf32, #tpu.memory_space<vmem>>, %arg4: memref<1x128xf32, #tpu.memory_space<vmem>>, %arg5: memref<1x128xf32, #tpu.memory_space<vmem>>, %arg6: memref<1x128xf32, #tpu.memory_space<vmem>>, %arg7: memref<9x128x128xbf16, #tpu.memory_space<vmem>>, %arg8: memref<1x256x128xf32, #tpu.memory_space<vmem>>, %arg9: memref<320x128xbf16, #tpu.memory_space<vmem>>, %arg10: memref<256x128xf32, #tpu.memory_space<vmem>>) attributes {dimension_semantics = [#tpu.dimension_semantics<parallel>], iteration_bounds = array<i64: 2>, scalar_prefetch = 0 : i64, scratch_operands = 2 : i64, tpu.core_type = #tpu.core_type<tc>, window_params = [{transform_indices = @transform_0, window_bounds = array<i64: 1, 256, 128>}, {pipeline_mode = #tpu.pipeline_mode<synchronous>, transform_indices = @transform_1, window_bounds = array<i64: 128, 128>}, {pipeline_mode = #tpu.pipeline_mode<synchronous>, transform_indices = @transform_2, window_bounds = array<i64: 1, 128>}, {pipeline_mode = #tpu.pipeline_mode<synchronous>, transform_indices = @transform_3, window_bounds = array<i64: 1, 128>}, {pipeline_mode = #tpu.pipeline_mode<synchronous>, transform_indices = @transform_4, window_bounds = array<i64: 1, 128>}, {pipeline_mode = #tpu.pipeline_mode<synchronous>, transform_indices = @transform_5, window_bounds = array<i64: 1, 128>}, {pipeline_mode = #tpu.pipeline_mode<synchronous>, transform_indices = @transform_6, window_bounds = array<i64: 9, 128, 128>}, {transform_indices = @transform_7, window_bounds = array<i64: 1, 256, 128>}]} {
    %c0 = arith.constant 0 : index
    %c0_0 = arith.constant 0 : index
    %c0_1 = arith.constant 0 : index
    %0 = vector.load %arg1[%c0, %c0_0, %c0_1] : memref<1x256x128xbf16, #tpu.memory_space<vmem>>, vector<1x256x128xbf16>
    %1 = vector.shape_cast %0 : vector<1x256x128xbf16> to vector<256x128xbf16>
    %2 = arith.extf %1 : vector<256x128xbf16> to vector<256x128xf32>
    %c0_2 = arith.constant 0 : index
    %c0_3 = arith.constant 0 : index
    %3 = vector.load %arg3[%c0_2, %c0_3] : memref<1x128xf32, #tpu.memory_space<vmem>>, vector<1x128xf32>
    %4 = vector.broadcast %3 : vector<1x128xf32> to vector<256x128xf32>
    %5 = arith.mulf %2, %4 : vector<256x128xf32>
    %c0_4 = arith.constant 0 : index
    %c0_5 = arith.constant 0 : index
    %6 = vector.load %arg4[%c0_4, %c0_5] : memref<1x128xf32, #tpu.memory_space<vmem>>, vector<1x128xf32>
    %7 = vector.broadcast %6 : vector<1x128xf32> to vector<256x128xf32>
    %8 = arith.addf %5, %7 : vector<256x128xf32>
    %cst = arith.constant 0.000000e+00 : f32
    %9 = vector.broadcast %cst : f32 to vector<256x128xf32>
    %10 = arith.maximumf %8, %9 : vector<256x128xf32>
    %11 = arith.truncf %10 : vector<256x128xf32> to vector<256x128xbf16>
    %c0_6 = arith.constant 0 : index
    %c0_7 = arith.constant 0 : index
    %12 = vector.load %arg2[%c0_6, %c0_7] : memref<128x128xbf16, #tpu.memory_space<vmem>>, vector<128x128xbf16>
    %cst_8 = arith.constant dense<0.000000e+00> : vector<256x128xf32>
    %13 = tpu.matmul %11, %12, %cst_8 {dimension_numbers = #tpu.dot_dimension_numbers<[1], [0], [0], [1], [0, 0, 1, 1], [], []>} : vector<256x128xbf16>, vector<128x128xbf16>, vector<256x128xf32> -> vector<256x128xf32>
    %c0_9 = arith.constant 0 : index
    %c0_10 = arith.constant 0 : index
    %14 = vector.load %arg5[%c0_9, %c0_10] : memref<1x128xf32, #tpu.memory_space<vmem>>, vector<1x128xf32>
    %15 = vector.broadcast %14 : vector<1x128xf32> to vector<256x128xf32>
    %16 = arith.mulf %13, %15 : vector<256x128xf32>
    %c0_11 = arith.constant 0 : index
    %c0_12 = arith.constant 0 : index
    %17 = vector.load %arg6[%c0_11, %c0_12] : memref<1x128xf32, #tpu.memory_space<vmem>>, vector<1x128xf32>
    %18 = vector.broadcast %17 : vector<1x128xf32> to vector<256x128xf32>
    %19 = arith.addf %16, %18 : vector<256x128xf32>
    %cst_13 = arith.constant 0.000000e+00 : f32
    %20 = vector.broadcast %cst_13 : f32 to vector<256x128xf32>
    %21 = arith.maximumf %19, %20 : vector<256x128xf32>
    %22 = arith.truncf %21 : vector<256x128xf32> to vector<256x128xbf16>
    %cst_14 = arith.constant 0.000000e+00 : bf16
    %23 = vector.broadcast %cst_14 : bf16 to vector<320x128xbf16>
    %c0_15 = arith.constant 0 : index
    %c0_16 = arith.constant 0 : index
    %24 = vector.load %arg9[%c0_15, %c0_16] : memref<320x128xbf16, #tpu.memory_space<vmem>>, vector<320x128xbf16>
    tpu.vector_store %arg9[%c0_15, %c0_16], %23 {strides = array<i32>} : memref<320x128xbf16, #tpu.memory_space<vmem>>, vector<320x128xbf16>,
    %c32 = arith.constant 32 : index
    %c0_17 = arith.constant 0 : index
    %25 = vector.load %arg9[%c32, %c0_17] : memref<320x128xbf16, #tpu.memory_space<vmem>>, vector<256x128xbf16>
    tpu.vector_store %arg9[%c32, %c0_17], %22 {strides = array<i32>} : memref<320x128xbf16, #tpu.memory_space<vmem>>, vector<256x128xbf16>,
    %26 = tpu.iota {dimensions = array<i32: 0>} : vector<256x1xi32>
    %c16_i32 = arith.constant 16 : i32
    %c0_i32 = arith.constant 0 : i32
    %27 = arith.cmpi eq, %c16_i32, %c0_i32 : i32
    %c1_i32 = arith.constant 1 : i32
    %28 = arith.select %27, %c1_i32, %c16_i32 : i32
    %29 = vector.broadcast %28 : i32 to vector<256x1xi32>
    %30 = arith.remsi %26, %29 : vector<256x1xi32>
    %c0_i32_18 = arith.constant 0 : i32
    %31 = vector.broadcast %c0_i32_18 : i32 to vector<256x1xi32>
    %32 = arith.cmpi ne, %30, %31 : vector<256x1xi32>
    %c0_i32_19 = arith.constant 0 : i32
    %33 = vector.broadcast %c0_i32_19 : i32 to vector<256x1xi32>
    %34 = arith.cmpi slt, %30, %33 : vector<256x1xi32>
    %c0_i32_20 = arith.constant 0 : i32
    %35 = arith.cmpi slt, %28, %c0_i32_20 : i32
    %36 = vector.broadcast %35 : i1 to vector<256x1xi1>
    %37 = vector.broadcast %36 : vector<256x1xi1> to vector<256x1xi1>
    %38 = arith.xori %34, %37 : vector<256x1xi1>
    %39 = arith.andi %38, %32 : vector<256x1xi1>
    %40 = vector.broadcast %28 : i32 to vector<256x1xi32>
    %41 = arith.addi %30, %40 : vector<256x1xi32>
    %42 = arith.select %39, %41, %30 : vector<256x1xi1>, vector<256x1xi32>
    %c0_i32_21 = arith.constant 0 : i32
    %43 = vector.broadcast %c0_i32_21 : i32 to vector<256x1xi32>
    %44 = arith.cmpi ne, %42, %43 : vector<256x1xi32>
    %45 = arith.extui %44 : vector<256x1xi1> to vector<256x1xi32>
    %46 = arith.sitofp %45 : vector<256x1xi32> to vector<256x1xf32>
    %47 = arith.truncf %46 : vector<256x1xf32> to vector<256x1xbf16>
    %c15_i32 = arith.constant 15 : i32
    %48 = vector.broadcast %c15_i32 : i32 to vector<256x1xi32>
    %49 = arith.cmpi ne, %42, %48 : vector<256x1xi32>
    %50 = arith.extui %49 : vector<256x1xi1> to vector<256x1xi32>
    %51 = arith.sitofp %50 : vector<256x1xi32> to vector<256x1xf32>
    %52 = arith.truncf %51 : vector<256x1xf32> to vector<256x1xbf16>
    %cst_22 = arith.constant 0.000000e+00 : f32
    %53 = vector.broadcast %cst_22 : f32 to vector<256x128xf32>
    %c0_23 = arith.constant 0 : index
    %c0_24 = arith.constant 0 : index
    %54 = vector.load %arg10[%c0_23, %c0_24] : memref<256x128xf32, #tpu.memory_space<vmem>>, vector<256x128xf32>
    tpu.vector_store %arg10[%c0_23, %c0_24], %53 {strides = array<i32>} : memref<256x128xf32, #tpu.memory_space<vmem>>, vector<256x128xf32>,
    %c15 = arith.constant 15 : index
    %c0_25 = arith.constant 0 : index
    %55 = vector.load %arg9[%c15, %c0_25] : memref<320x128xbf16, #tpu.memory_space<vmem>>, vector<256x128xbf16>
    %56 = vector.broadcast %47 : vector<256x1xbf16> to vector<256x128xbf16>
    %57 = arith.mulf %55, %56 : vector<256x128xbf16>
    %c0_26 = arith.constant 0 : index
    %c0_27 = arith.constant 0 : index
    %58 = vector.load %arg10[%c0_26, %c0_27] : memref<256x128xf32, #tpu.memory_space<vmem>>, vector<256x128xf32>
    %c0_28 = arith.constant 0 : index
    %c0_29 = arith.constant 0 : index
    %c0_30 = arith.constant 0 : index
    %59 = vector.load %arg7[%c0_28, %c0_29, %c0_30] : memref<9x128x128xbf16, #tpu.memory_space<vmem>>, vector<1x128x128xbf16>
    %60 = vector.shape_cast %59 : vector<1x128x128xbf16> to vector<128x128xbf16>
    %cst_31 = arith.constant dense<0.000000e+00> : vector<256x128xf32>
    %61 = tpu.matmul %57, %60, %cst_31 {dimension_numbers = #tpu.dot_dimension_numbers<[1], [0], [0], [1], [0, 0, 1, 1], [], []>} : vector<256x128xbf16>, vector<128x128xbf16>, vector<256x128xf32> -> vector<256x128xf32>
    %62 = arith.addf %58, %61 : vector<256x128xf32>
    %c0_32 = arith.constant 0 : index
    %c0_33 = arith.constant 0 : index
    %63 = vector.load %arg10[%c0_32, %c0_33] : memref<256x128xf32, #tpu.memory_space<vmem>>, vector<256x128xf32>
    tpu.vector_store %arg10[%c0_32, %c0_33], %62 {strides = array<i32>} : memref<256x128xf32, #tpu.memory_space<vmem>>, vector<256x128xf32>,
    %c16 = arith.constant 16 : index
    %c0_34 = arith.constant 0 : index
    %64 = vector.load %arg9[%c16, %c0_34] : memref<320x128xbf16, #tpu.memory_space<vmem>>, vector<256x128xbf16>
    %c0_35 = arith.constant 0 : index
    %c0_36 = arith.constant 0 : index
    %65 = vector.load %arg10[%c0_35, %c0_36] : memref<256x128xf32, #tpu.memory_space<vmem>>, vector<256x128xf32>
    %c1 = arith.constant 1 : index
    %c0_37 = arith.constant 0 : index
    %c0_38 = arith.constant 0 : index
    %66 = vector.load %arg7[%c1, %c0_37, %c0_38] : memref<9x128x128xbf16, #tpu.memory_space<vmem>>, vector<1x128x128xbf16>
    %67 = vector.shape_cast %66 : vector<1x128x128xbf16> to vector<128x128xbf16>
    %cst_39 = arith.constant dense<0.000000e+00> : vector<256x128xf32>
    %68 = tpu.matmul %64, %67, %cst_39 {dimension_numbers = #tpu.dot_dimension_numbers<[1], [0], [0], [1], [0, 0, 1, 1], [], []>} : vector<256x128xbf16>, vector<128x128xbf16>, vector<256x128xf32> -> vector<256x128xf32>
    %69 = arith.addf %65, %68 : vector<256x128xf32>
    %c0_40 = arith.constant 0 : index
    %c0_41 = arith.constant 0 : index
    %70 = vector.load %arg10[%c0_40, %c0_41] : memref<256x128xf32, #tpu.memory_space<vmem>>, vector<256x128xf32>
    tpu.vector_store %arg10[%c0_40, %c0_41], %69 {strides = array<i32>} : memref<256x128xf32, #tpu.memory_space<vmem>>, vector<256x128xf32>,
    %c17 = arith.constant 17 : index
    %c0_42 = arith.constant 0 : index
    %71 = vector.load %arg9[%c17, %c0_42] : memref<320x128xbf16, #tpu.memory_space<vmem>>, vector<256x128xbf16>
    %72 = vector.broadcast %52 : vector<256x1xbf16> to vector<256x128xbf16>
    %73 = arith.mulf %71, %72 : vector<256x128xbf16>
    %c0_43 = arith.constant 0 : index
    %c0_44 = arith.constant 0 : index
    %74 = vector.load %arg10[%c0_43, %c0_44] : memref<256x128xf32, #tpu.memory_space<vmem>>, vector<256x128xf32>
    %c2 = arith.constant 2 : index
    %c0_45 = arith.constant 0 : index
    %c0_46 = arith.constant 0 : index
    %75 = vector.load %arg7[%c2, %c0_45, %c0_46] : memref<9x128x128xbf16, #tpu.memory_space<vmem>>, vector<1x128x128xbf16>
    %76 = vector.shape_cast %75 : vector<1x128x128xbf16> to vector<128x128xbf16>
    %cst_47 = arith.constant dense<0.000000e+00> : vector<256x128xf32>
    %77 = tpu.matmul %73, %76, %cst_47 {dimension_numbers = #tpu.dot_dimension_numbers<[1], [0], [0], [1], [0, 0, 1, 1], [], []>} : vector<256x128xbf16>, vector<128x128xbf16>, vector<256x128xf32> -> vector<256x128xf32>
    %78 = arith.addf %74, %77 : vector<256x128xf32>
    %c0_48 = arith.constant 0 : index
    %c0_49 = arith.constant 0 : index
    %79 = vector.load %arg10[%c0_48, %c0_49] : memref<256x128xf32, #tpu.memory_space<vmem>>, vector<256x128xf32>
    tpu.vector_store %arg10[%c0_48, %c0_49], %78 {strides = array<i32>} : memref<256x128xf32, #tpu.memory_space<vmem>>, vector<256x128xf32>,
    %c31 = arith.constant 31 : index
    %c0_50 = arith.constant 0 : index
    %80 = vector.load %arg9[%c31, %c0_50] : memref<320x128xbf16, #tpu.memory_space<vmem>>, vector<256x128xbf16>
    %81 = vector.broadcast %47 : vector<256x1xbf16> to vector<256x128xbf16>
    %82 = arith.mulf %80, %81 : vector<256x128xbf16>
    %c0_51 = arith.constant 0 : index
    %c0_52 = arith.constant 0 : index
    %83 = vector.load %arg10[%c0_51, %c0_52] : memref<256x128xf32, #tpu.memory_space<vmem>>, vector<256x128xf32>
    %c3 = arith.constant 3 : index
    %c0_53 = arith.constant 0 : index
    %c0_54 = arith.constant 0 : index
    %84 = vector.load %arg7[%c3, %c0_53, %c0_54] : memref<9x128x128xbf16, #tpu.memory_space<vmem>>, vector<1x128x128xbf16>
    %85 = vector.shape_cast %84 : vector<1x128x128xbf16> to vector<128x128xbf16>
    %cst_55 = arith.constant dense<0.000000e+00> : vector<256x128xf32>
    %86 = tpu.matmul %82, %85, %cst_55 {dimension_numbers = #tpu.dot_dimension_numbers<[1], [0], [0], [1], [0, 0, 1, 1], [], []>} : vector<256x128xbf16>, vector<128x128xbf16>, vector<256x128xf32> -> vector<256x128xf32>
    %87 = arith.addf %83, %86 : vector<256x128xf32>
    %c0_56 = arith.constant 0 : index
    %c0_57 = arith.constant 0 : index
    %88 = vector.load %arg10[%c0_56, %c0_57] : memref<256x128xf32, #tpu.memory_space<vmem>>, vector<256x128xf32>
    tpu.vector_store %arg10[%c0_56, %c0_57], %87 {strides = array<i32>} : memref<256x128xf32, #tpu.memory_space<vmem>>, vector<256x128xf32>,
    %c32_58 = arith.constant 32 : index
    %c0_59 = arith.constant 0 : index
    %89 = vector.load %arg9[%c32_58, %c0_59] : memref<320x128xbf16, #tpu.memory_space<vmem>>, vector<256x128xbf16>
    %c0_60 = arith.constant 0 : index
    %c0_61 = arith.constant 0 : index
    %90 = vector.load %arg10[%c0_60, %c0_61] : memref<256x128xf32, #tpu.memory_space<vmem>>, vector<256x128xf32>
    %c4 = arith.constant 4 : index
    %c0_62 = arith.constant 0 : index
    %c0_63 = arith.constant 0 : index
    %91 = vector.load %arg7[%c4, %c0_62, %c0_63] : memref<9x128x128xbf16, #tpu.memory_space<vmem>>, vector<1x128x128xbf16>
    %92 = vector.shape_cast %91 : vector<1x128x128xbf16> to vector<128x128xbf16>
    %cst_64 = arith.constant dense<0.000000e+00> : vector<256x128xf32>
    %93 = tpu.matmul %89, %92, %cst_64 {dimension_numbers = #tpu.dot_dimension_numbers<[1], [0], [0], [1], [0, 0, 1, 1], [], []>} : vector<256x128xbf16>, vector<128x128xbf16>, vector<256x128xf32> -> vector<256x128xf32>
    %94 = arith.addf %90, %93 : vector<256x128xf32>
    %c0_65 = arith.constant 0 : index
    %c0_66 = arith.constant 0 : index
    %95 = vector.load %arg10[%c0_65, %c0_66] : memref<256x128xf32, #tpu.memory_space<vmem>>, vector<256x128xf32>
    tpu.vector_store %arg10[%c0_65, %c0_66], %94 {strides = array<i32>} : memref<256x128xf32, #tpu.memory_space<vmem>>, vector<256x128xf32>,
    %c33 = arith.constant 33 : index
    %c0_67 = arith.constant 0 : index
    %96 = vector.load %arg9[%c33, %c0_67] : memref<320x128xbf16, #tpu.memory_space<vmem>>, vector<256x128xbf16>
    %97 = vector.broadcast %52 : vector<256x1xbf16> to vector<256x128xbf16>
    %98 = arith.mulf %96, %97 : vector<256x128xbf16>
    %c0_68 = arith.constant 0 : index
    %c0_69 = arith.constant 0 : index
    %99 = vector.load %arg10[%c0_68, %c0_69] : memref<256x128xf32, #tpu.memory_space<vmem>>, vector<256x128xf32>
    %c5 = arith.constant 5 : index
    %c0_70 = arith.constant 0 : index
    %c0_71 = arith.constant 0 : index
    %100 = vector.load %arg7[%c5, %c0_70, %c0_71] : memref<9x128x128xbf16, #tpu.memory_space<vmem>>, vector<1x128x128xbf16>
    %101 = vector.shape_cast %100 : vector<1x128x128xbf16> to vector<128x128xbf16>
    %cst_72 = arith.constant dense<0.000000e+00> : vector<256x128xf32>
    %102 = tpu.matmul %98, %101, %cst_72 {dimension_numbers = #tpu.dot_dimension_numbers<[1], [0], [0], [1], [0, 0, 1, 1], [], []>} : vector<256x128xbf16>, vector<128x128xbf16>, vector<256x128xf32> -> vector<256x128xf32>
    %103 = arith.addf %99, %102 : vector<256x128xf32>
    %c0_73 = arith.constant 0 : index
    %c0_74 = arith.constant 0 : index
    %104 = vector.load %arg10[%c0_73, %c0_74] : memref<256x128xf32, #tpu.memory_space<vmem>>, vector<256x128xf32>
    tpu.vector_store %arg10[%c0_73, %c0_74], %103 {strides = array<i32>} : memref<256x128xf32, #tpu.memory_space<vmem>>, vector<256x128xf32>,
    %c47 = arith.constant 47 : index
    %c0_75 = arith.constant 0 : index
    %105 = vector.load %arg9[%c47, %c0_75] : memref<320x128xbf16, #tpu.memory_space<vmem>>, vector<256x128xbf16>
    %106 = vector.broadcast %47 : vector<256x1xbf16> to vector<256x128xbf16>
    %107 = arith.mulf %105, %106 : vector<256x128xbf16>
    %c0_76 = arith.constant 0 : index
    %c0_77 = arith.constant 0 : index
    %108 = vector.load %arg10[%c0_76, %c0_77] : memref<256x128xf32, #tpu.memory_space<vmem>>, vector<256x128xf32>
    %c6 = arith.constant 6 : index
    %c0_78 = arith.constant 0 : index
    %c0_79 = arith.constant 0 : index
    %109 = vector.load %arg7[%c6, %c0_78, %c0_79] : memref<9x128x128xbf16, #tpu.memory_space<vmem>>, vector<1x128x128xbf16>
    %110 = vector.shape_cast %109 : vector<1x128x128xbf16> to vector<128x128xbf16>
    %cst_80 = arith.constant dense<0.000000e+00> : vector<256x128xf32>
    %111 = tpu.matmul %107, %110, %cst_80 {dimension_numbers = #tpu.dot_dimension_numbers<[1], [0], [0], [1], [0, 0, 1, 1], [], []>} : vector<256x128xbf16>, vector<128x128xbf16>, vector<256x128xf32> -> vector<256x128xf32>
    %112 = arith.addf %108, %111 : vector<256x128xf32>
    %c0_81 = arith.constant 0 : index
    %c0_82 = arith.constant 0 : index
    %113 = vector.load %arg10[%c0_81, %c0_82] : memref<256x128xf32, #tpu.memory_space<vmem>>, vector<256x128xf32>
    tpu.vector_store %arg10[%c0_81, %c0_82], %112 {strides = array<i32>} : memref<256x128xf32, #tpu.memory_space<vmem>>, vector<256x128xf32>,
    %c48 = arith.constant 48 : index
    %c0_83 = arith.constant 0 : index
    %114 = vector.load %arg9[%c48, %c0_83] : memref<320x128xbf16, #tpu.memory_space<vmem>>, vector<256x128xbf16>
    %c0_84 = arith.constant 0 : index
    %c0_85 = arith.constant 0 : index
    %115 = vector.load %arg10[%c0_84, %c0_85] : memref<256x128xf32, #tpu.memory_space<vmem>>, vector<256x128xf32>
    %c7 = arith.constant 7 : index
    %c0_86 = arith.constant 0 : index
    %c0_87 = arith.constant 0 : index
    %116 = vector.load %arg7[%c7, %c0_86, %c0_87] : memref<9x128x128xbf16, #tpu.memory_space<vmem>>, vector<1x128x128xbf16>
    %117 = vector.shape_cast %116 : vector<1x128x128xbf16> to vector<128x128xbf16>
    %cst_88 = arith.constant dense<0.000000e+00> : vector<256x128xf32>
    %118 = tpu.matmul %114, %117, %cst_88 {dimension_numbers = #tpu.dot_dimension_numbers<[1], [0], [0], [1], [0, 0, 1, 1], [], []>} : vector<256x128xbf16>, vector<128x128xbf16>, vector<256x128xf32> -> vector<256x128xf32>
    %119 = arith.addf %115, %118 : vector<256x128xf32>
    %c0_89 = arith.constant 0 : index
    %c0_90 = arith.constant 0 : index
    %120 = vector.load %arg10[%c0_89, %c0_90] : memref<256x128xf32, #tpu.memory_space<vmem>>, vector<256x128xf32>
    tpu.vector_store %arg10[%c0_89, %c0_90], %119 {strides = array<i32>} : memref<256x128xf32, #tpu.memory_space<vmem>>, vector<256x128xf32>,
    %c49 = arith.constant 49 : index
    %c0_91 = arith.constant 0 : index
    %121 = vector.load %arg9[%c49, %c0_91] : memref<320x128xbf16, #tpu.memory_space<vmem>>, vector<256x128xbf16>
    %122 = vector.broadcast %52 : vector<256x1xbf16> to vector<256x128xbf16>
    %123 = arith.mulf %121, %122 : vector<256x128xbf16>
    %c0_92 = arith.constant 0 : index
    %c0_93 = arith.constant 0 : index
    %124 = vector.load %arg10[%c0_92, %c0_93] : memref<256x128xf32, #tpu.memory_space<vmem>>, vector<256x128xf32>
    %c8 = arith.constant 8 : index
    %c0_94 = arith.constant 0 : index
    %c0_95 = arith.constant 0 : index
    %125 = vector.load %arg7[%c8, %c0_94, %c0_95] : memref<9x128x128xbf16, #tpu.memory_space<vmem>>, vector<1x128x128xbf16>
    %126 = vector.shape_cast %125 : vector<1x128x128xbf16> to vector<128x128xbf16>
    %cst_96 = arith.constant dense<0.000000e+00> : vector<256x128xf32>
    %127 = tpu.matmul %123, %126, %cst_96 {dimension_numbers = #tpu.dot_dimension_numbers<[1], [0], [0], [1], [0, 0, 1, 1], [], []>} : vector<256x128xbf16>, vector<128x128xbf16>, vector<256x128xf32> -> vector<256x128xf32>
    %128 = arith.addf %124, %127 : vector<256x128xf32>
    %c0_97 = arith.constant 0 : index
    %c0_98 = arith.constant 0 : index
    %129 = vector.load %arg10[%c0_97, %c0_98] : memref<256x128xf32, #tpu.memory_space<vmem>>, vector<256x128xf32>
    tpu.vector_store %arg10[%c0_97, %c0_98], %128 {strides = array<i32>} : memref<256x128xf32, #tpu.memory_space<vmem>>, vector<256x128xf32>,
    %c0_99 = arith.constant 0 : index
    %c0_100 = arith.constant 0 : index
    %130 = vector.load %arg10[%c0_99, %c0_100] : memref<256x128xf32, #tpu.memory_space<vmem>>, vector<256x128xf32>
    %131 = vector.shape_cast %130 : vector<256x128xf32> to vector<1x256x128xf32>
    %c0_101 = arith.constant 0 : index
    %c0_102 = arith.constant 0 : index
    %c0_103 = arith.constant 0 : index
    %132 = vector.load %arg8[%c0_101, %c0_102, %c0_103] : memref<1x256x128xf32, #tpu.memory_space<vmem>>, vector<1x256x128xf32>
    tpu.vector_store %arg8[%c0_101, %c0_102, %c0_103], %131 {strides = array<i32>} : memref<1x256x128xf32, #tpu.memory_space<vmem>>, vector<1x256x128xf32>,
    return
  }
  func.func @transform_0(%arg0: i32) -> (i32, i32, i32) {
    %c0_i32 = arith.constant 0 : i32
    %c0_i32_0 = arith.constant 0 : i32
    %c0_i32_1 = arith.constant 0 : i32
    return %arg0, %c0_i32, %c0_i32_0 : i32, i32, i32
  }
  func.func @transform_1(%arg0: i32) -> (i32, i32) {
    %c0_i32 = arith.constant 0 : i32
    %c0_i32_0 = arith.constant 0 : i32
    %c0_i32_1 = arith.constant 0 : i32
    return %c0_i32, %c0_i32_0 : i32, i32
  }
  func.func @transform_2(%arg0: i32) -> (i32, i32) {
    %c0_i32 = arith.constant 0 : i32
    %c0_i32_0 = arith.constant 0 : i32
    %c0_i32_1 = arith.constant 0 : i32
    return %c0_i32, %c0_i32_0 : i32, i32
  }
  func.func @transform_3(%arg0: i32) -> (i32, i32) {
    %c0_i32 = arith.constant 0 : i32
    %c0_i32_0 = arith.constant 0 : i32
    %c0_i32_1 = arith.constant 0 : i32
    return %c0_i32, %c0_i32_0 : i32, i32
  }
  func.func @transform_4(%arg0: i32) -> (i32, i32) {
    %c0_i32 = arith.constant 0 : i32
    %c0_i32_0 = arith.constant 0 : i32
    %c0_i32_1 = arith.constant 0 : i32
    return %c0_i32, %c0_i32_0 : i32, i32
  }
  func.func @transform_5(%arg0: i32) -> (i32, i32) {
    %c0_i32 = arith.constant 0 : i32
    %c0_i32_0 = arith.constant 0 : i32
    %c0_i32_1 = arith.constant 0 : i32
    return %c0_i32, %c0_i32_0 : i32, i32
  }
  func.func @transform_6(%arg0: i32) -> (i32, i32, i32) {
    %c0_i32 = arith.constant 0 : i32
    %c0_i32_0 = arith.constant 0 : i32
    %c0_i32_1 = arith.constant 0 : i32
    %c0_i32_2 = arith.constant 0 : i32
    return %c0_i32, %c0_i32_0, %c0_i32_1 : i32, i32, i32
  }
  func.func @transform_7(%arg0: i32) -> (i32, i32, i32) {
    %c0_i32 = arith.constant 0 : i32
    %c0_i32_0 = arith.constant 0 : i32
    %c0_i32_1 = arith.constant 0 : i32
    return %arg0, %c0_i32, %c0_i32_0 : i32, i32, i32
  }
}

</mosaic_0001>

<bundles_post_ra>
// kernel: dense_layer_forward.1
= control target key start
LH: loop header
LB: loop body
LE: loop exit
PB: predicated region body
PF: predicated region fallthrough
CT: control target
= control target key end

     0   :  { %s7432_s24 = smov 0   ;;  %s8917_s0 = inlined_call_operand.vmem [shape: bf16[2,256,128], index: 0, kind: input, shape index: {}]   ;;  %s8918_s1 = inlined_call_operand.vmem [shape: bf16[128,128], index: 1, kind: input, shape index: {}]   ;;  %s8919_s2 = inlined_call_operand.vmem [shape: f32[1,128], index: 2, kind: input, shape index: {}]   ;;  %s8920_s3 = inlined_call_operand.vmem [shape: f32[1,128], index: 3, kind: input, shape index: {}]   ;;  %s8921_s4 = inlined_call_operand.vmem [shape: f32[1,128], index: 4, kind: input, shape index: {}]   ;;  %s8922_s5 = inlined_call_operand.vmem [shape: f32[1,128], index: 5, kind: input, shape index: {}]   ;;  %s8923_s6 = inlined_call_operand.vmem [shape: bf16[9,128,128], index: 6, kind: input, shape index: {}]   ;;  %s8924_s7 = inlined_call_operand.vmem [shape: f32[2,256,128], index: 7, kind: output, shape index: {}]  }
   0x1 LB: > { %s5976_s25 = sadd.s32 4294967295, %s7387_s24   ;;  %p5980_p0 = scmp.ge.s32.totalorder %s7387_s24, 1  ;;  %s7387_s24 = sphi %s7432_s24, %s17_s24  }
   0x2   : > { %p237_p1 = scmp.lt.s32.totalorder %s7387_s24, 3 }
   0x4   : > { %p238_p2 = pnand %p5980_p0, %p237_p1 }
   0x6   : > { %241 = sbr.rel (%p238_p2) target bundleno = 802 (0x322), region = 48 }
   0xd   : > { %v7299_v0 = vld [vmem:[%s8918_s1] sm:$0xff]   ;;  %p269_p3 = scmp.lt.s32.totalorder %s5976_s25, 1  ;;  %v7300_v1 = vld [vmem:[%s8918_s1 + $0x8] sm:$0xff]   ;;  %v7301_v2 = vld [vmem:[%s8918_s1 + $0x10] sm:$0xff]   ;;  %vm1547_vm2 = vsmask.f32 7424 }
   0xe   : > { %6552 = vmatprep.subr.bf16.mxu0 %v7299_v0  ;;  %v7302_v3 = vld [vmem:[%s8918_s1 + $0x18] sm:$0xff]   ;;  %v7464_v5 = vld [vmem:[%s8919_s2] ss:$0 sm:$0xff]  ;;  %v7304_v31 = vld [vmem:[%s8918_s1 + $0x28] sm:$0xff]   ;;  %vm1757_vm3 = vsmask.f32 256 }
   0xf   : > { %s9042_s25 = smov (!%p269_p3, %s5976_s25), 1  ;;  %6553 = vmatpush3.bf16.msra.mxu0 %v7299_v0  ;;  %v7471_v10 = vld [vmem:[%s8920_s3] ss:$0 sm:$0xff]  ;;  %v7308_v35 = vld [vmem:[%s8923_s6 + $0x108] sm:$0xff]   ;;  %v7305_v41 = vld [vmem:[%s8918_s1 + $0x30] sm:$0xff]  }
  0x10   : > { %6554 = vmatprep.subr.bf16.mxu0 %v7300_v1  ;;  %s6231_s9 = sshll.u32 %s9042_s25, 7  ;;  %v7303_v16 = vld [vmem:[%s8918_s1 + $0x20] sm:$0xff]   ;;  %v7309_v45 = vld [vmem:[%s8923_s6 + $0x110] sm:$0xff]   ;;  %v7306_v56 = vld [vmem:[%s8918_s1 + $0x38] sm:$0xff]   ;;  %s6232_s30 = sshll.u32 %s9042_s25, 8 }
  0x11   : > { %s7455_s12 = scalar_lea.vmem %s8917_s0, %s6231_s9  ;;  %v7307_v27 = vld [vmem:[%s8923_s6 + $0x100] sm:$0xff]   ;;  %s8855_s10 = scalar_lea.vmem %s8924_s7, %s6232_s30 }
  0x12   : > { %v6234_v4 = vld [vmem:[%s7455_s12] sm:$0xff]   ;;  %v6297_v8 = vld [vmem:[%s7455_s12 + $0x8] sm:$0xff]   ;;  %v6298_v9 = vld [vmem:[%s7455_s12 + $0x10] sm:$0xff]   ;;  %6792 = vmatprep.subr.bf16.mxu1 %v7307_v27 }
  0x13   : > { %6555 = vmatpush3.bf16.msra.mxu0 %v7300_v1  ;;  %v6235_v6 = vunpack.c.l.bf16 %v6234_v4  ;;  %v6236_v7 = vunpack.c.h.bf16 %v6234_v4  ;;  %v6239_v11 = vunpack.c.l.bf16 %v6297_v8  ;;  %v6299_v12 = vld [vmem:[%s7455_s12 + $0x18] sm:$0xff]   ;;  %v6240_v15 = vunpack.c.h.bf16 %v6297_v8  ;;  %v6300_v24 = vld [vmem:[%s7455_s12 + $0x20] sm:$0xff]   ;;  %v6301_v25 = vld [vmem:[%s7455_s12 + $0x28] sm:$0xff]   ;;  %6793 = vmatpush3.bf16.msra.mxu1 %v7307_v27 }
  0x14   : > { %6556 = vmatprep.subr.bf16.mxu0 %v7301_v2  ;;  %v6243_v18 = vunpack.c.l.bf16 %v6298_v9  ;;  %v6244_v19 = vunpack.c.h.bf16 %v6298_v9  ;;  %v6247_v22 = vunpack.c.l.bf16 %v6299_v12  ;;  %v6248_v23 = vunpack.c.h.bf16 %v6299_v12  ;;  %v6302_v34 = vld [vmem:[%s7455_s12 + $0x30] sm:$0xff]   ;;  %v6303_v40 = vld [vmem:[%s7455_s12 + $0x38] sm:$0xff]   ;;  %6794 = vmatprep.subr.bf16.mxu1 %v7308_v35  ;;  %v6304_v52 = vld [vmem:[%s7455_s12 + $0x40] sm:$0xff]  }
  0x15   : > { %v351_v13 = vmul.f32 %v6235_v6, %v7464_v5  ;;  %v352_v14 = vmul.f32 %v6236_v7, %v7464_v5  ;;  %v353_v17 = vmul.f32 %v6239_v11, %v7464_v5  ;;  %v354_v30 = vmul.f32 %v6240_v15, %v7464_v5  ;;  %v6305_v60 = vld [vmem:[%s7455_s12 + $0x48] sm:$0xff]   ;;  %v6306_v1 = vld [vmem:[%s7455_s12 + $0x50] sm:$0xff]   ;;  %v6307_v11 = vld [vmem:[%s7455_s12 + $0x58] sm:$0xff]  }
  0x16   : > { %v355_v32 = vmul.f32 %v6243_v18, %v7464_v5  ;;  %v356_v33 = vmul.f32 %v6244_v19, %v7464_v5  ;;  %v357_v37 = vmul.f32 %v6247_v22, %v7464_v5  ;;  %v358_v38 = vmul.f32 %v6248_v23, %v7464_v5 }
  0x17   : > { %6557 = vmatpush3.bf16.msra.mxu0 %v7301_v2  ;;  %v390_v20 = vadd.f32 %v7471_v10, %v351_v13  ;;  %v391_v21 = vadd.f32 %v7471_v10, %v352_v14  ;;  %v7485_v26 = vadd.f32 %v7471_v10, %v353_v17  ;;  %v6251_v39 = vunpack.c.l.bf16 %v6300_v24  ;;  %6795 = vmatpush3.bf16.msra.mxu1 %v7308_v35 }
  0x18   : > { %6558 = vmatprep.subr.bf16.mxu0 %v7302_v3  ;;  %v6252_v43 = vunpack.c.h.bf16 %v6300_v24  ;;  %v6255_v44 = vunpack.c.l.bf16 %v6301_v25  ;;  %v393_v46 = vadd.f32 %v7471_v10, %v354_v30  ;;  %v6256_v48 = vunpack.c.h.bf16 %v6301_v25  ;;  %6796 = vmatprep.subr.bf16.mxu1 %v7309_v45  ;;  %v6308_v25 = vld [vmem:[%s7455_s12 + $0x60] sm:$0xff]  }
  0x19   : > { %v422_v28 = vmax.f32 %v390_v20, 0.0  ;;  %v423_v29 = vmax.f32 %v391_v21, 0.0  ;;  %v424_v42 = vmax.f32 %v7485_v26, 0.0  ;;  %v359_v47 = vmul.f32 %v6251_v39, %v7464_v5 }
  0x1a   : > { %v394_v49 = vadd.f32 %v7471_v10, %v355_v32  ;;  %v395_v50 = vadd.f32 %v7471_v10, %v356_v33  ;;  %v360_v51 = vmul.f32 %v6252_v43, %v7464_v5  ;;  %v7517_v53 = vadd.f32 %v7471_v10, %v357_v37 }
  0x1b   : > { %6559 = vmatpush3.bf16.msra.mxu0 %v7302_v3  ;;  %v454_v36 = vpack.c.bf16 %v423_v29, %v422_v28  ;;  %v7520_v54 = vadd.f32 %v7471_v10, %v358_v38  ;;  %v6259_v55 = vunpack.c.l.bf16 %v6302_v34  ;;  %v361_v57 = vmul.f32 %v6255_v44, %v7464_v5  ;;  %6797 = vmatpush3.bf16.msra.mxu1 %v7309_v45 }
  0x1c   : > { %6560 = vmatprep.subr.bf16.mxu0 %v7303_v16  ;;  %v6260_v58 = vunpack.c.h.bf16 %v6302_v34  ;;  %v6263_v59 = vunpack.c.l.bf16 %v6303_v40  ;;  %v425_v61 = vmax.f32 %v393_v46, 0.0  ;;  %v7528_v62 = vadd.f32 %v7471_v10, %v359_v47  ;;  %v6310_v46 = vld [vmem:[%s7455_s12 + $0x70] sm:$0xff]  }
  0x1d   : > { %6568 = vmatprep.mubr.bf16.mxu0 %v454_v36  ;;  %v7531_v63 = vadd.f32 %v7471_v10, %v360_v51  ;;  %v362_v0 = vmul.f32 %v6256_v48, %v7464_v5  ;;  %v426_v2 = vmax.f32 %v394_v49, 0.0  ;;  %v427_v3 = vmax.f32 %v395_v50, 0.0 }
  0x1e   : > { %v6264_v4 = vunpack.c.h.bf16 %v6303_v40  ;;  %v428_v6 = vmax.f32 %v7517_v53, 0.0  ;;  %v429_v7 = vmax.f32 %v7520_v54, 0.0  ;;  %v363_v8 = vmul.f32 %v6259_v55, %v7464_v5  ;;  %v6311_v55 = vld [vmem:[%s7455_s12 + $0x78] sm:$0xff]  }
  0x1f   : > { %6561 = vmatpush3.bf16.msra.mxu0 %v7303_v16  ;;  %v6267_v9 = vunpack.c.l.bf16 %v6304_v52  ;;  %v7540_v12 = vadd.f32 %v7471_v10, %v361_v57  ;;  %v364_v13 = vmul.f32 %v6260_v58, %v7464_v5  ;;  %v365_v14 = vmul.f32 %v6263_v59, %v7464_v5  ;;  %v7310_v16 = vld [vmem:[%s8923_s6] sm:$0xff]  }
  0x20   : > { %6562 = vmatprep.subr.bf16.mxu0 %v7304_v31  ;;  %v6268_v15 = vunpack.c.h.bf16 %v6304_v52  ;;  %v430_v17 = vmax.f32 %v7528_v62, 0.0  ;;  %v431_v18 = vmax.f32 %v7531_v63, 0.0  ;;  %v7550_v19 = vadd.f32 %v7471_v10, %v362_v0 }
  0x21   : > { %v6271_v20 = vunpack.c.l.bf16 %v6305_v60  ;;  %v366_v21 = vmul.f32 %v6264_v4, %v7464_v5  ;;  %v367_v22 = vmul.f32 %v6267_v9, %v7464_v5  ;;  %v6272_v23 = vunpack.c.h.bf16 %v6305_v60 }
  0x22   : > { %v6275_v24 = vunpack.c.l.bf16 %v6306_v1  ;;  %v455_v26 = vpack.c.bf16 %v425_v61, %v424_v42  ;;  %v368_v27 = vmul.f32 %v6268_v15, %v7464_v5  ;;  %v6276_v29 = vunpack.c.h.bf16 %v6306_v1 }
  0x23   : > { %6563 = vmatpush3.bf16.msra.mxu0 %v7304_v31  ;;  %v369_v28 = vmul.f32 %v6271_v20, %v7464_v5  ;;  %v456_v30 = vpack.c.bf16 %v427_v3, %v426_v2  ;;  %v7558_v31 = vadd.f32 %v7471_v10, %v363_v8  ;;  %v7561_v32 = vadd.f32 %v7471_v10, %v364_v13 }
  0x24   : > { %6564 = vmatprep.subr.bf16.mxu0 %v7305_v41  ;;  %v6279_v33 = vunpack.c.l.bf16 %v6307_v11  ;;  %v7564_v34 = vadd.f32 %v7471_v10, %v365_v14  ;;  %v370_v35 = vmul.f32 %v6272_v23, %v7464_v5  ;;  %v371_v36 = vmul.f32 %v6275_v24, %v7464_v5 }
  0x25   : > { %v6280_v37 = vunpack.c.h.bf16 %v6307_v11  ;;  %v432_v38 = vmax.f32 %v7540_v12, 0.0  ;;  %v433_v39 = vmax.f32 %v7550_v19, 0.0  ;;  %v7571_v40 = vadd.f32 %v7471_v10, %v366_v21 }
  0x26   : > { %v7577_v42 = vadd.f32 %v7471_v10, %v368_v27  ;;  %v7580_v43 = vadd.f32 %v7471_v10, %v369_v28  ;;  %v372_v44 = vmul.f32 %v6276_v29, %v7464_v5  ;;  %v6283_v45 = vunpack.c.l.bf16 %v6308_v25 }
  0x27   : > { %6565 = vmatpush3.bf16.msra.mxu0 %v7305_v41  ;;  %v7574_v41 = vadd.f32 %v7471_v10, %v367_v22  ;;  %v434_v47 = vmax.f32 %v7558_v31, 0.0  ;;  %v435_v48 = vmax.f32 %v7561_v32, 0.0  ;;  %v373_v49 = vmul.f32 %v6279_v33, %v7464_v5 }
  0x28   : > { %6566 = vmatprep.subr.bf16.mxu0 %v7306_v56  ;;  %v374_v50 = vmul.f32 %v6280_v37, %v7464_v5  ;;  %v436_v51 = vmax.f32 %v7564_v34, 0.0  ;;  %v409_v52 = vadd.f32 %v7471_v10, %v370_v35  ;;  %v410_v53 = vadd.f32 %v7471_v10, %v371_v36  ;;  %v6309_v36 = vld [vmem:[%s7455_s12 + $0x68] sm:$0xff]  }
  0x29   : > { %v6284_v54 = vunpack.c.h.bf16 %v6308_v25  ;;  %v458_v57 = vpack.c.bf16 %v431_v18, %v430_v17  ;;  %v437_v58 = vmax.f32 %v7571_v40, 0.0  ;;  %v438_v59 = vmax.f32 %v7574_v41, 0.0 }
  0x2a   : > { %v439_v60 = vmax.f32 %v7577_v42, 0.0  ;;  %v440_v61 = vmax.f32 %v7580_v43, 0.0  ;;  %v411_v62 = vadd.f32 %v7471_v10, %v372_v44  ;;  %v375_v63 = vmul.f32 %v6283_v45, %v7464_v5 }
  0x2b   : > { %6567 = vmatpush3.bf16.msra.mxu0 %v7306_v56  ;;  %v457_v56 = vpack.c.bf16 %v429_v7, %v428_v6  ;;  %v412_v0 = vadd.f32 %v7471_v10, %v373_v49  ;;  %v413_v1 = vadd.f32 %v7471_v10, %v374_v50  ;;  %v6291_v2 = vunpack.c.l.bf16 %v6310_v46  ;;  %v7311_v50 = vld [vmem:[%s8923_s6 + $0x118] sm:$0xff]  }
  0x2c   : > { %6600 = vmatprep.subr.bf16.mxu0 %v7310_v16  ;;  %v6292_v3 = vunpack.c.h.bf16 %v6310_v46  ;;  %v441_v4 = vmax.f32 %v409_v52, 0.0  ;;  %v442_v6 = vmax.f32 %v410_v53, 0.0  ;;  %v376_v7 = vmul.f32 %v6284_v54, %v7464_v5  ;;  %6798 = vmatprep.subr.bf16.mxu1 %v7311_v50  ;;  %v7313_v52 = vld [vmem:[%s8923_s6 + $0x120] sm:$0xff]   ;;  %v7314_v53 = vld [vmem:[%s8923_s6 + $0x10] sm:$0xff]  }
  0x2d   : > { %v6295_v8 = vunpack.c.l.bf16 %v6311_v55  ;;  %v379_v9 = vmul.f32 %v6291_v2, %v7464_v5  ;;  %v443_v12 = vmax.f32 %v411_v62, 0.0  ;;  %v414_v13 = vadd.f32 %v7471_v10, %v375_v63  ;;  %6799 = vmatpush3.bf16.msra.mxu1 %v7311_v50 }
  0x2e   : > { %6569 = vmatmul.mubr.bf16.vlgmr.msra.gmra.mrb[0].mxu0 %v455_v26  ;;  %v380_v11 = vmul.f32 %v6292_v3, %v7464_v5  ;;  %v6296_v14 = vunpack.c.h.bf16 %v6311_v55  ;;  %v445_v17 = vmax.f32 %v413_v1, 0.0  ;;  %v415_v20 = vadd.f32 %v7471_v10, %v376_v7  ;;  %6800 = vmatprep.subr.bf16.mxu1 %v7313_v52  ;;  %v7318_v1 = vld [vmem:[%s8923_s6 + $0x20] sm:$0xff]  }
  0x2f   : > { %6572 = vmatprep.mubr.bf16.mxu0 %v456_v30  ;;  %6601 = vmatpush3.bf16.msra.mxu0 %v7310_v16  ;;  %v381_v15 = vmul.f32 %v6295_v8, %v7464_v5  ;;  %v444_v16 = vmax.f32 %v412_v0, 0.0  ;;  %v418_v18 = vadd.f32 %v7471_v10, %v379_v9  ;;  %v446_v25 = vmax.f32 %v414_v13, 0.0  ;;  %v7317_v0 = vld [vmem:[%s8923_s6 + $0x130] sm:$0xff]   ;;  %v7319_v9 = vld [vmem:[%s8923_s6 + $0x138] sm:$0xff]  }
  0x30   : > { %v419_v19 = vadd.f32 %v7471_v10, %v380_v11  ;;  %v382_v21 = vmul.f32 %v6296_v14, %v7464_v5  ;;  %v459_v28 = vpack.c.bf16 %v433_v39, %v432_v38  ;;  %v460_v30 = vpack.c.bf16 %v435_v48, %v434_v47  ;;  %v7320_v11 = vld [vmem:[%s8923_s6 + $0x28] sm:$0xff]  }
  0x31   : > { %v420_v22 = vadd.f32 %v7471_v10, %v381_v15  ;;  %v450_v23 = vmax.f32 %v418_v18, 0.0  ;;  %v447_v31 = vmax.f32 %v415_v20, 0.0  ;;  %v461_v34 = vpack.c.bf16 %v437_v58, %v436_v51  ;;  %6801 = vmatpush3.bf16.msra.mxu1 %v7313_v52 }
  0x32   : > { %v451_v24 = vmax.f32 %v419_v19, 0.0  ;;  %v421_v26 = vadd.f32 %v7471_v10, %v382_v21  ;;  %v462_v35 = vpack.c.bf16 %v439_v60, %v438_v59  ;;  %v463_v37 = vpack.c.bf16 %v441_v4, %v440_v61 }
  0x33   : > { %v452_v27 = vmax.f32 %v420_v22, 0.0  ;;  %v6287_v40 = vunpack.c.l.bf16 %v6309_v36  ;;  %v6288_v41 = vunpack.c.h.bf16 %v6309_v36  ;;  %v464_v42 = vpack.c.bf16 %v443_v12, %v442_v6  ;;  %v7323_v22 = vld [vmem:[%s8923_s6 + $0x38] sm:$0xff]  }
  0x34   : > { %v468_v29 = vpack.c.bf16 %v451_v24, %v450_v23  ;;  %v453_v32 = vmax.f32 %v421_v26, 0.0  ;;  %v465_v39 = vpack.c.bf16 %v445_v17, %v444_v16  ;;  %v466_v46 = vpack.c.bf16 %v447_v31, %v446_v25  ;;  %v7322_v17 = vld [vmem:[%s8923_s6 + $0x30] sm:$0xff]  }
  0x35   : > { %v377_v43 = vmul.f32 %v6287_v40, %v7464_v5  ;;  %v378_v38 = vmul.f32 %v6288_v41, %v7464_v5  ;;  %v7312_v5 = vld [vmem:[%s8923_s6 + $0x8] sm:$0xff]   ;;  %v857_v51 = vlaneseq  ;;  %v8927_v59 = vmov 0.0  }
  0x36   : > { %6573 = vmatmul.mubr.bf16.gmra.mrb[4].mxu0 %v457_v56  ;;  %v469_v33 = vpack.c.bf16 %v453_v32, %v452_v27  ;;  %6602 = vmatprep.subr.bf16.mxu0 %v7312_v5  ;;  %v7315_v56 = vld [vmem:[%s8923_s6 + $0x128] sm:$0xff]   ;;  %v8925_v62 = vmov 1.0   ;;  %v7391_v4 = vmov 0  }
  0x37   : > { %6576 = vmatprep.mubr.bf16.mxu0 %v458_v57  ;;  %v416_v44 = vadd.f32 %v7471_v10, %v377_v43  ;;  %v417_v45 = vadd.f32 %v7471_v10, %v378_v38  ;;  %6603 = vmatpush3.bf16.msra.mxu0 %v7312_v5  ;;  %v7622_v10 = vshrl.u32 %v857_v51, 7  ;;  %v7316_v57 = vld [vmem:[%s8923_s6 + $0x18] sm:$0xff]   ;;  %821 = vst [vmem:[#allocation2] sm:$0xff] %v7391_v4  ;;  %822 = vst [vmem:[#allocation2 + $0x8] sm:$0xff] %v7391_v4 }
  0x38   : > { %6604 = vmatprep.subr.bf16.mxu0 %v7314_v53  ;;  %6802 = vmatprep.subr.bf16.mxu1 %v7315_v56  ;;  %839 = vst [vmem:[#allocation2 + $0x90] sm:$0xff] %v7391_v4  ;;  %840 = vst [vmem:[#allocation2 + $0x98] sm:$0xff] %v7391_v4 }
  0x39   : > { %v448_v47 = vmax.f32 %v416_v44, 0.0  ;;  %v449_v48 = vmax.f32 %v417_v45, 0.0  ;;  %v860_v54 = vadd.s32 16, %v7622_v10  ;;  %v894_v55 = vand.u32 15, %v7622_v10  ;;  %6803 = vmatpush3.bf16.msra.mxu1 %v7315_v56 }
  0x3a   : > { %6804 = vmatprep.subr.bf16.mxu1 %v7317_v0  ;;  %v862_v31 = vadd.s32 32, %v7622_v10  ;;  %v868_v40 = vadd.s32 80, %v7622_v10  ;;  %v861_v51 = vadd.s32 24, %v7622_v10  ;;  %v874_v56 = vadd.s32 128, %v7622_v10 }
  0x3b   : > { %v467_v49 = vpack.c.bf16 %v449_v48, %v448_v47  ;;  %6605 = vmatpush3.bf16.msra.mxu0 %v7314_v53  ;;  %v908_v58 = vand.u32 15, %v860_v54  ;;  %vm1274_vm0 = vcmp.ne.s32.totalorder %v894_v55, 0  ;;  %v859_v47 = vadd.s32 8, %v7622_v10 }
  0x3c   : > { %6606 = vmatprep.subr.bf16.mxu0 %v7316_v57  ;;  %v5997_v60 = vsel %vm1274_vm0, 1.0, %v8927_v59  ;;  %v922_v32 = vand.u32 15, %v862_v31  ;;  %v964_v43 = vand.u32 15, %v868_v40 }
  0x3d   : > { %vm1276_vm1 = vcmp.ne.s32.totalorder %v908_v58, 0  ;;  %v1370_v63 = vpack.c.bf16 %v8925_v62, %v5997_v60  ;;  %6805 = vmatpush3.bf16.msra.mxu1 %v7317_v0  ;;  %v901_v54 = vand.u32 15, %v859_v47 }
  0x3e   : > { %6577 = vmatmul.mubr.bf16.gmra.mrb[8].mxu0 %v459_v28  ;;  %v5998_v61 = vsel %vm1276_vm1, 1.0, %v8927_v59  ;;  %6806 = vmatprep.subr.bf16.mxu1 %v7319_v9  ;;  %v1530_v19 = vld [vmem:[#allocation2] sm:$0x80]  ;;  %vm1278_vm4 = vcmp.ne.s32.totalorder %v922_v32, 0  ;;  %vm1284_vm7 = vcmp.ne.s32.totalorder %v964_v43, 0 }
  0x3f   : > { %6580 = vmatprep.mubr.bf16.mxu0 %v460_v30  ;;  %6607 = vmatpush3.bf16.msra.mxu0 %v7316_v57  ;;  %v1371_v2 = vpack.c.bf16 %v8925_v62, %v5998_v61  ;;  %v1549_v3 = vshll.u32 %v1370_v63, 16  ;;  %v1552_v8 = vshrl.u32 %v1370_v63, 16  ;;  %v7685_v30 = vld [vmem:[%s8923_s6 + $0x40] sm:$0xff]   ;;  %v5999_v36 = vsel %vm1278_vm4, 1.0, %v8927_v59 }
  0x40   : > { %6608 = vmatprep.subr.bf16.mxu0 %v7318_v1  ;;  %v1372_v41 = vpack.c.bf16 %v8925_v62, %v5999_v36  ;;  %v6002_v53 = vsel %vm1284_vm7, 1.0, %v8927_v59  ;;  %v915_v63 = vand.u32 15, %v861_v51  ;;  %vm1387_vm10 = vcmp.ne.s32.totalorder %v901_v54, 15 }
  0x41   : > { %v1556_v6 = vshll.u32 %v1371_v2, 16  ;;  %v7648_v7 = vrot.slane %v1549_v3, 1  ;;  %v1560_v13 = vshrl.u32 %v1371_v2, 16  ;;  %6807 = vmatpush3.bf16.msra.mxu1 %v7319_v9  ;;  %v1375_v58 = vpack.c.bf16 %v8925_v62, %v6002_v53 }
  0x42   : > { %v1564_v44 = vshll.u32 %v1372_v41, 16  ;;  %v1568_v52 = vshrl.u32 %v1372_v41, 16  ;;  %v1006_v3 = vand.u32 15, %v874_v56  ;;  %v878_v9 = vadd.s32 160, %v7622_v10 }
  0x43   : > { %6609 = vmatpush3.bf16.msra.mxu0 %v7318_v1  ;;  %8965 = vst [vmem:[#allocation4_spill] sm:$0xff] %v7648_v7  ;;  %v1558_v12 = vrot.slane %v1556_v6, 1  ;;  %v1554_v14 = vor.u32 %v1552_v8, %v7648_v7  ;;  %v1692_v20 = vmul.bf16 %v7648_v7, %v1530_v19  ;;  %vm1389_vm11 = vcmp.ne.s32.totalorder %v915_v63, 15 }
  0x44   : > { %6610 = vmatprep.subr.bf16.mxu0 %v7320_v11  ;;  %v1566_v5 = vrot.slane %v1564_v44, 1  ;;  %vm1290_vm12 = vcmp.ne.s32.totalorder %v1006_v3, 0  ;;  %v6014_v31 = vsel %vm1389_vm11, 1.0, %v8927_v59  ;;  %v884_v51 = vadd.s32 208, %v7622_v10 }
  0x45   : > { %v7657_v15 = vor.u32 %v1560_v13, %v1558_v12  ;;  %v7660_v16 = vsel %vm1547_vm2, %v1554_v14, %v1558_v12  ;;  %v1759_v23 = vshrl.u32 %v1692_v20, 16  ;;  %v876_v12 = vadd.s32 144, %v7622_v10 }
  0x46   : > { %6581 = vmatmul.mubr.bf16.gmra.mrb[12].mxu0 %v461_v34  ;;  %8966 = vst [vmem:[#allocation5_spill] sm:$0xff] %v7660_v16  ;;  %v1693_v18 = vmul.bf16 0, %v7660_v16  ;;  %v866_v34 = vadd.s32 64, %v7622_v10  ;;  %v1570_v61 = vor.u32 %v1568_v52, %v1566_v5  ;;  %v6013_v13 = vsel %vm1387_vm10, 1.0, %v8927_v59 }
  0x47   : > { %6584 = vmatprep.mubr.bf16.mxu0 %v462_v35  ;;  %6611 = vmatpush3.bf16.msra.mxu0 %v7320_v11  ;;  %v1761_v26 = vrot.slane %v1759_v23, 7  ;;  %v1588_v11 = vshll.u32 %v1375_v58, 16  ;;  %v7713_v14 = vsel %vm1547_vm2, %v7657_v15, %v1566_v5  ;;  %v863_v20 = vadd.s32 40, %v7622_v10 }
  0x48   : > { %6612 = vmatprep.subr.bf16.mxu0 %v7322_v17  ;;  %v7667_v21 = vshrl.u32 %v1693_v18, 16  ;;  %v1766_v25 = vshll.u32 %v1693_v18, 16  ;;  %v880_v15 = vadd.s32 176, %v7622_v10  ;;  %v1483_v43 = vpack.c.bf16 %v6014_v31, %v8925_v62 }
  0x49   : > { %v929_v41 = vand.u32 15, %v863_v20  ;;  %v886_v54 = vadd.s32 224, %v7622_v10 }
  0x4a   : > { %v1765_v24 = vrot.slane %v7667_v21, 7  ;;  %v1048_v44 = vand.u32 15, %v880_v15 }
  0x4b   : > { %6613 = vmatpush3.bf16.msra.mxu0 %v7322_v17  ;;  %vm1391_vm15 = vcmp.ne.s32.totalorder %v929_v41, 15 }
  0x4c   : > { %6614 = vmatprep.subr.bf16.mxu0 %v7323_v22  ;;  %v1768_v27 = vor.u32 %v1766_v25, %v1765_v24  ;;  %v1034_v25 = vand.u32 15, %v878_v9  ;;  %vm1296_vm0 = vcmp.ne.s32.totalorder %v1048_v44, 0 }
  0x4e   : > { %6585 = vmatmul.mubr.bf16.gmra.mrb[16].mxu0 %v463_v37  ;;  %v1769_v28 = vsel %vm1757_vm3, %v1761_v26, %v1768_v27  ;;  %v950_v37 = vand.u32 15, %v866_v34  ;;  %v1482_v26 = vpack.c.bf16 %v6013_v13, %v8925_v62  ;;  %v1590_v27 = vrot.slane %v1588_v11, 1 }
  0x4f   : > { %6588 = vmatprep.mubr.bf16.mxu0 %v464_v42  ;;  %6615 = vmatpush3.bf16.msra.mxu0 %v7323_v22  ;;  %v870_v42 = vadd.s32 96, %v7622_v10  ;;  %v882_v34 = vadd.s32 192, %v7622_v10  ;;  %vm1294_vm13 = vcmp.ne.s32.totalorder %v1034_v25, 0 }
  0x50   : > { %6648 = vmatprep.subr.bf16.mxu0 %v7685_v30  ;;  %vm1282_vm6 = vcmp.ne.s32.totalorder %v950_v37, 0  ;;  %v1592_v37 = vshrl.u32 %v1375_v58, 16  ;;  %v6007_v5 = vsel %vm1294_vm13, 1.0, %v8927_v59 }
  0x51   : > { %v6001_v45 = vsel %vm1282_vm6, 1.0, %v8927_v59  ;;  %v1062_v47 = vand.u32 15, %v882_v34 }
  0x53   : > { %vm1298_vm1 = vcmp.ne.s32.totalorder %v1062_v47, 0 }
  0x54   : > { %v6009_v9 = vsel %vm1298_vm1, 1.0, %v8927_v59 }
  0x56   : > { %6589 = vmatmul.mubr.bf16.gmra.mrb[20].mxu0 %v465_v39  ;;  %v872_v39 = vadd.s32 112, %v7622_v10 }
  0x57   : > { %6592 = vmatprep.mubr.bf16.mxu0 %v466_v46  ;;  %v978_v46 = vand.u32 15, %v870_v42 }
  0x58   : > { %v992_v50 = vand.u32 15, %v872_v39 }
  0x59   : > { %vm1286_vm8 = vcmp.ne.s32.totalorder %v978_v46, 0 }
  0x5a   : > { %vm1288_vm9 = vcmp.ne.s32.totalorder %v992_v50, 0  ;;  %v6003_v60 = vsel %vm1286_vm8, 1.0, %v8927_v59  ;;  %v1594_v50 = vor.u32 %v1592_v37, %v1590_v27 }
  0x5b   : > { %v6004_v2 = vsel %vm1288_vm9, 1.0, %v8927_v59  ;;  %v1376_v8 = vpack.c.bf16 %v8925_v62, %v6003_v60  ;;  %v1380_v60 = vpack.c.bf16 %v8925_v62, %v6007_v5 }
  0x5c   : > { %v7716_v17 = vpack.c.bf16 %v8925_v62, %v6004_v2  ;;  %v2545_v2 = vshll.u32 %v1483_v43, 16 }
  0x5d   : > { %v1596_v23 = vshll.u32 %v1376_v8, 16  ;;  %v1600_v40 = vshrl.u32 %v1376_v8, 16  ;;  %v1628_v20 = vshll.u32 %v1380_v60, 16 }
  0x5e   : > { %6593 = vmatmul.mubr.bf16.gmra.mrb[24].mxu0 %v467_v49  ;;  %v1374_v49 = vpack.c.bf16 %v8925_v62, %v6001_v45  ;;  %v1604_v32 = vshll.u32 %v7716_v17, 16  ;;  %v867_v45 = vadd.s32 72, %v7622_v10  ;;  %v1608_v31 = vshrl.u32 %v7716_v17, 16 }
  0x5f   : > { %6596 = vmatprep.mubr.bf16.mxu0 %v468_v29  ;;  %v7679_v29 = vld [vmem:[%s8923_s6 + $0x140] sm:$0xff]   ;;  %v1598_v42 = vrot.slane %v1596_v23, 1  ;;  %v1630_v37 = vrot.slane %v1628_v20, 1 }
  0x60   : > { %6840 = vmatprep.subr.bf16.mxu1 %v7679_v29  ;;  %v1580_v57 = vshll.u32 %v1374_v49, 16  ;;  %v1584_v6 = vshrl.u32 %v1374_v49, 16  ;;  %v1606_v46 = vrot.slane %v1604_v32, 1  ;;  %v957_v58 = vand.u32 15, %v867_v45 }
  0x61   : > { %v1602_v52 = vor.u32 %v1600_v40, %v1598_v42  ;;  %v7751_v3 = vsel %vm1547_vm2, %v1594_v50, %v1598_v42  ;;  %v1632_v40 = vshrl.u32 %v1380_v60, 16 }
  0x62   : > { %v1582_v4 = vrot.slane %v1580_v57, 1 }
  0x63   : > { %v7760_v13 = vsel %vm1547_vm2, %v1602_v52, %v1606_v46  ;;  %v1634_v52 = vor.u32 %v1632_v40, %v1630_v37 }
  0x64   : > { %v1586_v22 = vor.u32 %v1584_v6, %v1582_v4  ;;  %v1090_v6 = vand.u32 15, %v886_v54  ;;  %8967 = vst [vmem:[#allocation6_spill] sm:$0xff] %v7760_v13 }
  0x66   : > { %6597 = vmatmul.mubr.bf16.gmra.mrb[28].mxu0 %v469_v33  ;;  %v864_v33 = vadd.s32 48, %v7622_v10  ;;  %v7747_v63 = vsel %vm1547_vm2, %v1586_v22, %v1590_v27  ;;  %v1382_v27 = vpack.c.bf16 %v8925_v62, %v6009_v9  ;;  %vm1302_vm7 = vcmp.ne.s32.totalorder %v1090_v6, 0  ;;  %v7796_v9 = vld [vmem:[%s8921_s4] ss:$0 sm:$0xff] }
  0x67   : > { %6616 = vmatprep.mubr.bf16.mxu0 %v1769_v28  ;;  %v1020_v28 = vand.u32 15, %v876_v12  ;;  %v871_v6 = vadd.s32 104, %v7622_v10 }
  0x68   : > { %v936_v35 = vand.u32 15, %v864_v33  ;;  %v6005_v33 = vsel %vm1290_vm12, 1.0, %v8927_v59  ;;  %v1644_v47 = vshll.u32 %v1382_v27, 16 }
  0x69   : > { %v7734_v39 = vpack.c.bf16 %v8925_v62, %v6005_v33  ;;  %vm1292_vm14 = vcmp.ne.s32.totalorder %v1020_v28, 0  ;;  %v985_v40 = vand.u32 15, %v871_v6 }
  0x6a   : > { %vm1280_vm5 = vcmp.ne.s32.totalorder %v936_v35, 0  ;;  %v865_v35 = vadd.s32 56, %v7622_v10  ;;  %v6006_v53 = vsel %vm1292_vm14, 1.0, %v8927_v59  ;;  %v1646_v60 = vrot.slane %v1644_v47, 1 }
  0x6b   : > { %v6000_v38 = vsel %vm1280_vm5, 1.0, %v8927_v59  ;;  %v1612_v56 = vshll.u32 %v7734_v39, 16  ;;  %vm1395_vm5 = vcmp.ne.s32.totalorder %v957_v58, 15  ;;  %v1616_v32 = vshrl.u32 %v7734_v39, 16 }
  0x6c   : > { %v1373_v48 = vpack.c.bf16 %v8925_v62, %v6000_v38  ;;  %v2535_v38 = vshrl.u32 %v1482_v26, 16  ;;  %v943_v49 = vand.u32 15, %v865_v35  ;;  %v6017_v15 = vsel %vm1395_vm5, 1.0, %v8927_v59 }
  0x6d   : > { %v1486_v44 = vpack.c.bf16 %v6017_v15, %v8925_v62  ;;  %v869_v39 = vadd.s32 88, %v7622_v10  ;;  %vm1399_vm10 = vcmp.ne.s32.totalorder %v985_v40, 15 }
  0x6e   : > { %v1572_v55 = vshll.u32 %v1373_v48, 16  ;;  %v1576_v1 = vshrl.u32 %v1373_v48, 16  ;;  %v2538_v48 = vshll.u32 %v1482_v26, 16  ;;  %v7742_v57 = vrot.slane %v2535_v38, 7 }
  0x6f   : > { %vm1393_vm4 = vcmp.ne.s32.totalorder %v943_v49, 15  ;;  %v888_v26 = vadd.s32 240, %v7622_v10  ;;  %v2566_v58 = vshrl.u32 %v1486_v44, 16 }
  0x70   : > { %v1574_v0 = vrot.slane %v1572_v55, 1  ;;  %v2542_v55 = vshrl.u32 %v1483_v43, 16  ;;  %v6016_v12 = vsel %vm1393_vm4, 1.0, %v8927_v59  ;;  %v7763_v22 = vor.u32 %v2538_v48, %v7742_v57 }
  0x71   : > { %v1485_v28 = vpack.c.bf16 %v6016_v12, %v8925_v62  ;;  %v6011_v43 = vsel %vm1302_vm7, 1.0, %v8927_v59  ;;  %v1104_v38 = vand.u32 15, %v888_v26  ;;  %v1610_v48 = vor.u32 %v1608_v31, %v1606_v46  ;;  %v7811_v31 = vld [vmem:[%s8922_s5] ss:$0 sm:$0xff] }
  0x72   : > { %v7719_v18 = vsel %vm1547_vm2, %v1570_v61, %v1574_v0  ;;  %v1578_v19 = vor.u32 %v1576_v1, %v1574_v0  ;;  %v6015_v61 = vsel %vm1391_vm15, 1.0, %v8927_v59  ;;  %v1379_v0 = vpack.c.bf16 %v8925_v62, %v6006_v53 }
  0x73   : > { %v1076_v1 = vand.u32 15, %v884_v51  ;;  %v7754_v8 = vrot.slane %v2542_v55, 7  ;;  %v1484_v11 = vpack.c.bf16 %v6015_v61, %v8925_v62  ;;  %v2558_v17 = vshrl.u32 %v1485_v28, 16 }
  0x74   : > { %v7730_v36 = vsel %vm1547_vm2, %v1578_v19, %v1582_v4  ;;  %v6008_v4 = vsel %vm1296_vm0, 1.0, %v8927_v59  ;;  %v1614_v19 = vrot.slane %v1612_v56, 1  ;;  %v1620_v23 = vshll.u32 %v1379_v0, 16 }
  0x75   : > { %v7766_v25 = vpack.c.bf16 %v8925_v62, %v6008_v4  ;;  %vm1300_vm6 = vcmp.ne.s32.totalorder %v1076_v1, 0  ;;  %v2547_v33 = vor.u32 %v2545_v2, %v7754_v8  ;;  %v2550_v34 = vshrl.u32 %v1484_v11, 16 }
  0x76   : > { %v1624_v35 = vshrl.u32 %v1379_v0, 16  ;;  %v6010_v41 = vsel %vm1300_vm6, 1.0, %v8927_v59  ;;  %v1622_v45 = vrot.slane %v1620_v23, 1  ;;  %v1618_v49 = vor.u32 %v1616_v32, %v1614_v19 }
  0x77   : > { %v1636_v42 = vshll.u32 %v7766_v25, 16  ;;  %v7781_v50 = vpack.c.bf16 %v8925_v62, %v6010_v41  ;;  %v2553_v5 = vshll.u32 %v1484_v11, 16  ;;  %v1384_v53 = vpack.c.bf16 %v8925_v62, %v6011_v43 }
  0x78   : > { %v1626_v51 = vor.u32 %v1624_v35, %v1622_v45  ;;  %v2552_v54 = vrot.slane %v2550_v34, 7  ;;  %vm1304_vm8 = vcmp.ne.s32.totalorder %v1104_v38, 0  ;;  %v2561_v56 = vshll.u32 %v1485_v28, 16 }
  0x79   : > { %v1638_v55 = vrot.slane %v1636_v42, 1  ;;  %v1648_v61 = vshrl.u32 %v1382_v27, 16  ;;  %v2560_v0 = vrot.slane %v2558_v17, 7  ;;  %v971_v1 = vand.u32 15, %v869_v39 }
  0x7a   : > { %v7785_v46 = vsel %vm1547_vm2, %v1618_v49, %v1622_v45  ;;  %v1652_v2 = vshll.u32 %v7781_v50, 16  ;;  %v7790_v4 = vsel %vm1757_vm3, %v7742_v57, %v2547_v33  ;;  %v7799_v11 = vsel %vm1547_vm2, %v1610_v48, %v1614_v19 }
  0x7b   : > { %8968 = vst [vmem:[#allocation7_spill] sm:$0xff] %v7785_v46  ;;  %8969 = vst [vmem:[#allocation8_spill] sm:$0xff] %v7799_v11  ;;  %v1640_v12 = vshrl.u32 %v7766_v25, 16  ;;  %v1660_v20 = vshll.u32 %v1384_v53, 16  ;;  %v6012_v23 = vsel %vm1304_vm8, 1.0, %v8927_v59  ;;  %v7804_v26 = vsel %vm1547_vm2, %v1626_v51, %v1630_v37 }
  0x7c   : > { %8970 = vst [vmem:[#allocation9_spill] sm:$0xff] %v7804_v26  ;;  %v2555_v57 = vor.u32 %v2553_v5, %v2552_v54  ;;  %v7806_v27 = vrot.slane %v2566_v58, 7  ;;  %v2569_v28 = vshll.u32 %v1486_v44, 16  ;;  %v7814_v19 = vsel %vm1547_vm2, %v1634_v52, %v1638_v55 }
  0x7d   : > { %8971 = vst [vmem:[#allocation10_spill] sm:$0xff] %v7814_v19  ;;  %v1650_v25 = vor.u32 %v1648_v61, %v1646_v60  ;;  %v2563_v32 = vor.u32 %v2561_v56, %v2560_v0  ;;  %vm1397_vm9 = vcmp.ne.s32.totalorder %v971_v1, 15  ;;  %v1654_v35 = vrot.slane %v1652_v2, 1 }
  0x7e   : > { %v7818_v37 = vpack.c.bf16 %v8925_v62, %v6012_v23  ;;  %v1642_v43 = vor.u32 %v1640_v12, %v1638_v55  ;;  %v1662_v38 = vrot.slane %v1660_v20, 1  ;;  %v1664_v44 = vshrl.u32 %v1384_v53, 16 }
  0x7f   : > { %v2571_v39 = vor.u32 %v2569_v28, %v7806_v27  ;;  %v6018_v48 = vsel %vm1397_vm9, 1.0, %v8927_v59  ;;  %v7829_v51 = vsel %vm1757_vm3, %v7754_v8, %v2555_v57  ;;  %v7832_v52 = vsel %vm1757_vm3, %v2552_v54, %v2563_v32 }
  0x80   : > { %8972 = vst [vmem:[#allocation11_spill] sm:$0xff] %v7832_v52  ;;  %v1656_v55 = vshrl.u32 %v7781_v50, 16  ;;  %v1668_v56 = vshll.u32 %v7818_v37, 16  ;;  %v7839_v61 = vsel %vm1547_vm2, %v1642_v43, %v1646_v60  ;;  %v7842_v1 = vsel %vm1547_vm2, %v1650_v25, %v1654_v35 }
  0x81   : > { %8973 = vst [vmem:[#allocation12_spill] sm:$0xff] %v7839_v61  ;;  %8974 = vst [vmem:[#allocation13_spill] sm:$0xff] %v7842_v1  ;;  %v7845_v8 = vpack.c.bf16 %v6018_v48, %v8925_v62  ;;  %v1666_v6 = vor.u32 %v1664_v44, %v1662_v38  ;;  %v7848_v12 = vsel %vm1757_vm3, %v2560_v0, %v2571_v39  ;;  %v6019_v57 = vsel %vm1399_vm10, 1.0, %v8927_v59 }
  0x82   : > { %8975 = vst [vmem:[#allocation14_spill] sm:$0xff] %v7848_v12  ;;  %v873_v60 = vadd.s32 120, %v7622_v10  ;;  %v1658_v32 = vor.u32 %v1656_v55, %v1654_v35  ;;  %v7324_v35 = vld [vmem:[%s8923_s6 + $0x148] sm:$0xff]  }
  0x83   : > { %v2574_v0 = vshrl.u32 %v7845_v8, 16 }
 0x101   : > { %v6570_v15 = vpop.f32.mrb[0].mxu0 }
 0x102   : > { %v704_v33 = vmul.f32 %v6570_v15, %v7796_v9  ;;  %v568_v34 = vpop.f32.mrb[1].mxu0 }
 0x103   : > { %v702_v41 = vmul.f32 %v7796_v9, %v568_v34  ;;  %v6571_v42 = vpop.f32.mrb[2].mxu0 }
 0x104   : > { %v743_v45 = vadd.f32 %v7811_v31, %v704_v33  ;;  %v705_v47 = vmul.f32 %v6571_v42, %v7796_v9  ;;  %v571_v17 = vpop.f32.mrb[3].mxu0  ;;  %v7853_v33 = vrot.slane %v1668_v56, 1  ;;  %v2577_v42 = vshll.u32 %v7845_v8, 16 }
 0x105   : > { %v741_v49 = vadd.f32 %v7811_v31, %v702_v41  ;;  %v703_v5 = vmul.f32 %v7796_v9, %v571_v17  ;;  %v7865_v17 = vpack.c.bf16 %v6019_v57, %v8925_v62  ;;  %v7872_v56 = vsel %vm1547_vm2, %v1658_v32, %v1662_v38 }
 0x106   : > { %v744_v53 = vadd.f32 %v7811_v31, %v705_v47  ;;  %v775_v54 = vmax.f32 %v743_v45, 0.0  ;;  %8976 = vst [vmem:[#allocation15_spill] sm:$0xff] %v7872_v56 }
 0x107   : > { %v742_v58 = vadd.f32 %v7811_v31, %v703_v5  ;;  %v773_v50 = vmax.f32 %v741_v49, 0.0  ;;  %v999_v5 = vand.u32 15, %v873_v60 }
 0x108   : > { %v776_v2 = vmax.f32 %v744_v53, 0.0 }
 0x109   : > { %v774_v20 = vmax.f32 %v742_v58, 0.0  ;;  %v6574_v23 = vpop.f32.mrb[4].mxu0  ;;  %v7875_v58 = vadd.s32 136, %v7622_v10  ;;  %vm7894_vm11 = vcmp.ne.s32.totalorder %v999_v5, 15 }
 0x10a   : > { %v806_v28 = vpack.c.bf16 %v776_v2, %v775_v54  ;;  %v708_v15 = vmul.f32 %v6574_v23, %v7796_v9  ;;  %v584_v25 = vpop.f32.mrb[5].mxu0 }
 0x10b   : > { %v805_v34 = vpack.c.bf16 %v774_v20, %v773_v50  ;;  %v706_v40 = vmul.f32 %v7796_v9, %v584_v25  ;;  %v6575_v41 = vpop.f32.mrb[6].mxu0  ;;  %v7881_v50 = vsel %vm1547_vm2, %v1666_v6, %v7853_v33  ;;  %v7883_v20 = vrot.slane %v2574_v0, 7 }
 0x10c   : > { %842 = vst [vmem:[#allocation2 + $0x18] sm:$0xff] %v806_v28  ;;  %v747_v43 = vadd.f32 %v7811_v31, %v708_v15  ;;  %v709_v44 = vmul.f32 %v6575_v41, %v7796_v9  ;;  %v587_v45 = vpop.f32.mrb[7].mxu0  ;;  %v1695_v47 = vmul.bf16 %v7719_v18, %v806_v28  ;;  %8977 = vst [vmem:[#allocation16_spill] sm:$0xff] %v7881_v50 }
 0x10d   : > { %841 = vst [vmem:[#allocation2 + $0x10] sm:$0xff] %v805_v34  ;;  %v745_v39 = vadd.f32 %v7811_v31, %v706_v40  ;;  %v707_v48 = vmul.f32 %v7796_v9, %v587_v45  ;;  %6808 = vmatprep.mubr.bf16.mxu1 %v805_v34  ;;  %v1694_v49 = vmul.bf16 %v7713_v14, %v805_v34 }
 0x10e   : > { %v748_v53 = vadd.f32 %v7811_v31, %v709_v44  ;;  %6809 = vmatmul.mubr.bf16.vlgmr.msra.gmra.mrb[0].mxu1 %v806_v28  ;;  %v1779_v55 = vshrl.u32 %v1695_v47, 16  ;;  %v779_v23 = vmax.f32 %v747_v43, 0.0  ;;  %v1782_v38 = vshll.u32 %v1695_v47, 16  ;;  %v7325_v28 = vld [vmem:[%s8923_s6 + $0x150] sm:$0xff]  }
 0x10f   : > { %v746_v54 = vadd.f32 %v7811_v31, %v707_v48  ;;  %6841 = vmatpush3.bf16.msra.mxu1 %v7679_v29  ;;  %v1771_v2 = vshrl.u32 %v1694_v49, 16  ;;  %v777_v15 = vmax.f32 %v745_v39, 0.0  ;;  %v1774_v34 = vshll.u32 %v1694_v49, 16 }
 0x110   : > { %v780_v57 = vmax.f32 %v748_v53, 0.0  ;;  %6842 = vmatprep.subr.bf16.mxu1 %v7324_v35  ;;  %v7885_v60 = vrot.slane %v1779_v55, 7  ;;  %v2582_v43 = vshrl.u32 %v7865_v17, 16 }
 0x111   : > { %v778_v25 = vmax.f32 %v746_v54, 0.0  ;;  %v6578_v29 = vpop.f32.mrb[8].mxu0  ;;  %v1773_v32 = vrot.slane %v1771_v2, 7 }
 0x112   : > { %v808_v40 = vpack.c.bf16 %v780_v57, %v779_v23  ;;  %v712_v6 = vmul.f32 %v6578_v29, %v7796_v9  ;;  %v600_v41 = vpop.f32.mrb[9].mxu0  ;;  %v1784_v0 = vor.u32 %v1782_v38, %v7885_v60  ;;  %v7326_v23 = vld [vmem:[%s8923_s6 + $0x158] sm:$0xff]  }
 0x113   : > { %v807_v44 = vpack.c.bf16 %v778_v25, %v777_v15  ;;  %v710_v45 = vmul.f32 %v7796_v9, %v600_v41  ;;  %v6579_v47 = vpop.f32.mrb[10].mxu0  ;;  %v1776_v48 = vor.u32 %v1774_v34, %v1773_v32  ;;  %6843 = vmatpush3.bf16.msra.mxu1 %v7324_v35  ;;  %v7914_v15 = vld [vmem:[%s8923_s6 + $0x48] sm:$0xff]   ;;  %v1013_v34 = vand.u32 15, %v7875_v58  ;;  %v7327_v58 = vld [vmem:[%s8923_s6 + $0x160] sm:$0xff]  }
 0x114   : > { %844 = vst [vmem:[#allocation2 + $0x28] sm:$0xff] %v808_v40  ;;  %v751_v49 = vadd.f32 %v7811_v31, %v712_v6  ;;  %v713_v53 = vmul.f32 %v6579_v47, %v7796_v9  ;;  %v603_v55 = vpop.f32.mrb[11].mxu0  ;;  %v1785_v54 = vsel %vm1757_vm3, %v1773_v32, %v1784_v0  ;;  %6844 = vmatprep.subr.bf16.mxu1 %v7325_v28  ;;  %v2585_v32 = vshll.u32 %v7865_v17, 16 }
 0x115   : > { %v1697_v2 = vmul.bf16 %v7747_v63, %v808_v40  ;;  %843 = vst [vmem:[#allocation2 + $0x20] sm:$0xff] %v807_v44  ;;  %v749_v35 = vadd.f32 %v7811_v31, %v710_v45  ;;  %v711_v5 = vmul.f32 %v7796_v9, %v603_v55  ;;  %6812 = vmatprep.mubr.bf16.mxu1 %v807_v44  ;;  %v6020_v41 = vsel %vm7894_vm11, 1.0, %v8927_v59 }
 0x116   : > { %v1777_v57 = vsel %vm1757_vm3, %v1765_v24, %v1776_v48  ;;  %v1696_v38 = vmul.bf16 %v7730_v36, %v807_v44  ;;  %v752_v25 = vadd.f32 %v7811_v31, %v713_v53  ;;  %6813 = vmatmul.mubr.bf16.gmra.mrb[4].mxu1 %v808_v40  ;;  %v2579_v6 = vor.u32 %v2577_v42, %v7883_v20 }
 0x117   : > { %6617 = vmatmul.mubr.bf16.vlgmr.msra.gmra.mrb[32].mxu0 %v1777_v57  ;;  %v1795_v29 = vshrl.u32 %v1697_v2, 16  ;;  %v750_v21 = vadd.f32 %v7811_v31, %v711_v5  ;;  %6845 = vmatpush3.bf16.msra.mxu1 %v7325_v28  ;;  %v783_v0 = vmax.f32 %v751_v49, 0.0  ;;  %v1798_v17 = vshll.u32 %v1697_v2, 16 }
 0x118   : > { %6620 = vmatprep.mubr.bf16.mxu0 %v1785_v54  ;;  %v1787_v24 = vshrl.u32 %v1696_v38, 16  ;;  %v784_v40 = vmax.f32 %v752_v25, 0.0  ;;  %6846 = vmatprep.subr.bf16.mxu1 %v7326_v23  ;;  %v781_v28 = vmax.f32 %v749_v35, 0.0  ;;  %v1790_v47 = vshll.u32 %v1696_v38, 16 }
 0x119   : > { %v7926_v44 = vrot.slane %v1795_v29, 7  ;;  %6649 = vmatpush3.bf16.msra.mxu0 %v7685_v30  ;;  %v782_v45 = vmax.f32 %v750_v21, 0.0  ;;  %v6582_v8 = vpop.f32.mrb[12].mxu0  ;;  %v7935_v55 = vrot.slane %v2582_v43, 7  ;;  %vm7938_vm12 = vcmp.ne.s32.totalorder %v1013_v34, 15  ;;  %v7328_v21 = vld [vmem:[%s8923_s6 + $0x168] sm:$0xff]  }
 0x11a   : > { %v1789_v42 = vrot.slane %v1787_v24, 7  ;;  %6650 = vmatprep.subr.bf16.mxu0 %v7914_v15  ;;  %v810_v48 = vpack.c.bf16 %v784_v40, %v783_v0  ;;  %v716_v39 = vmul.f32 %v6582_v8, %v7796_v9  ;;  %v616_v49 = vpop.f32.mrb[13].mxu0  ;;  %v7957_v40 = vld [vmem:[%s8923_s6 + $0x50] sm:$0xff]   ;;  %v7965_v8 = vpack.c.bf16 %v6020_v41, %v8925_v62 }
 0x11b   : > { %v1800_v53 = vor.u32 %v1798_v17, %v7926_v44  ;;  %v809_v54 = vpack.c.bf16 %v782_v45, %v781_v28  ;;  %v714_v2 = vmul.f32 %v7796_v9, %v616_v49  ;;  %v6583_v5 = vpop.f32.mrb[14].mxu0  ;;  %6847 = vmatpush3.bf16.msra.mxu1 %v7326_v23  ;;  %v7962_v45 = vsel %vm1757_vm3, %v7806_v27, %v2579_v6  ;;  %v7331_v6 = vld [vmem:[%s8923_s6 + $0x170] sm:$0xff]  }
 0x11c   : > { %v1792_v30 = vor.u32 %v1790_v47, %v1789_v42  ;;  %846 = vst [vmem:[#allocation2 + $0x38] sm:$0xff] %v810_v48  ;;  %v755_v57 = vadd.f32 %v7811_v31, %v716_v39  ;;  %v717_v38 = vmul.f32 %v6583_v5, %v7796_v9  ;;  %v619_v25 = vpop.f32.mrb[15].mxu0  ;;  %v1699_v43 = vmul.bf16 %v7760_v13, %v810_v48 }
 0x11d   : > { %v1801_v29 = vsel %vm1757_vm3, %v1789_v42, %v1800_v53  ;;  %6848 = vmatprep.subr.bf16.mxu1 %v7327_v58  ;;  %845 = vst [vmem:[#allocation2 + $0x30] sm:$0xff] %v809_v54  ;;  %v753_v23 = vadd.f32 %v7811_v31, %v714_v2  ;;  %v715_v34 = vmul.f32 %v7796_v9, %v619_v25  ;;  %8982 = vst [vmem:[#allocation17_spill] sm:$0xff] %v7962_v45 }
 0x11e   : > { %6816 = vmatprep.mubr.bf16.mxu1 %v809_v54  ;;  %v1793_v24 = vsel %vm1757_vm3, %v7885_v60, %v1792_v30  ;;  %v1698_v0 = vmul.bf16 %v7751_v3, %v809_v54  ;;  %v756_v17 = vadd.f32 %v7811_v31, %v717_v38  ;;  %v1811_v28 = vshrl.u32 %v1699_v43, 16  ;;  %6651 = vmatpush3.bf16.msra.mxu0 %v7914_v15 }
 0x11f   : > { %6621 = vmatmul.mubr.bf16.gmra.mrb[36].mxu0 %v1793_v24  ;;  %6817 = vmatmul.mubr.bf16.gmra.mrb[8].mxu1 %v810_v48  ;;  %v754_v60 = vadd.f32 %v7811_v31, %v715_v34  ;;  %v2587_v47 = vor.u32 %v2585_v32, %v7935_v55  ;;  %v6021_v39 = vsel %vm7938_vm12, 1.0, %v8927_v59  ;;  %v787_v48 = vmax.f32 %v755_v57, 0.0 }
 0x120   : > { %6624 = vmatprep.mubr.bf16.mxu0 %v1801_v29  ;;  %v1803_v42 = vshrl.u32 %v1698_v0, 16  ;;  %6849 = vmatpush3.bf16.msra.mxu1 %v7327_v58  ;;  %v788_v49 = vmax.f32 %v756_v17, 0.0  ;;  %v7972_v53 = vrot.slane %v1811_v28, 7  ;;  %v1814_v27 = vshll.u32 %v1699_v43, 16 }
 0x121   : > { %6850 = vmatprep.subr.bf16.mxu1 %v7328_v21  ;;  %v785_v41 = vmax.f32 %v753_v23, 0.0  ;;  %v786_v58 = vmax.f32 %v754_v60, 0.0  ;;  %v6586_v54 = vpop.f32.mrb[16].mxu0  ;;  %v1806_v2 = vshll.u32 %v1698_v0, 16  ;;  %6652 = vmatprep.subr.bf16.mxu0 %v7957_v40  ;;  %v2590_v38 = vshrl.u32 %v7965_v8, 16  ;;  %v7334_v60 = vld [vmem:[%s8923_s6 + $0x178] sm:$0xff]  }
 0x122   : > { %v1805_v32 = vrot.slane %v1803_v42, 7  ;;  %v812_v5 = vpack.c.bf16 %v788_v49, %v787_v48  ;;  %v720_v30 = vmul.f32 %v6586_v54, %v7796_v9  ;;  %v632_v35 = vpop.f32.mrb[17].mxu0  ;;  %v1816_v57 = vor.u32 %v1814_v27, %v7972_v53  ;;  %v7333_v49 = vld [vmem:[%s8923_s6 + $0x58] sm:$0xff]   ;;  %6653 = vmatpush3.bf16.msra.mxu0 %v7957_v40 }
 0x123   : > { %v811_v15 = vpack.c.bf16 %v786_v58, %v785_v41  ;;  %v718_v25 = vmul.f32 %v7796_v9, %v632_v35  ;;  %v6587_v29 = vpop.f32.mrb[18].mxu0  ;;  %v7984_v23 = vpack.c.bf16 %v6021_v39, %v8925_v62  ;;  %v8003_v58 = vadd.s32 152, %v7622_v10  ;;  %6654 = vmatprep.subr.bf16.mxu0 %v7333_v49  ;;  %v8056_v62 = vld [vmem:[#allocation2 + $0x10] sm:$0xff] }
 0x124   : > { %v1808_v43 = vor.u32 %v1806_v2, %v1805_v32  ;;  %6851 = vmatpush3.bf16.msra.mxu1 %v7328_v21  ;;  %848 = vst [vmem:[#allocation2 + $0x48] sm:$0xff] %v812_v5  ;;  %v759_v34 = vadd.f32 %v7811_v31, %v720_v30  ;;  %v721_v24 = vmul.f32 %v6587_v29, %v7796_v9  ;;  %v635_v0 = vpop.f32.mrb[19].mxu0  ;;  %v8006_v54 = vadd.s32 168, %v7622_v10 }
 0x125   : > { %v1817_v17 = vsel %vm1757_vm3, %v1805_v32, %v1816_v57  ;;  %v1701_v28 = vmul.bf16 %v7785_v46, %v812_v5  ;;  %6852 = vmatprep.subr.bf16.mxu1 %v7331_v6  ;;  %847 = vst [vmem:[#allocation2 + $0x40] sm:$0xff] %v811_v15  ;;  %v757_v21 = vadd.f32 %v7811_v31, %v718_v25  ;;  %v8013_v30 = vrot.slane %v2590_v38, 7 }
 0x126   : > { %v719_v42 = vmul.f32 %v7796_v9, %v635_v0  ;;  %6820 = vmatprep.mubr.bf16.mxu1 %v811_v15  ;;  %v1809_v39 = vsel %vm1757_vm3, %v7926_v44, %v1808_v43  ;;  %v1700_v48 = vmul.bf16 %v7799_v11, %v811_v15  ;;  %v760_v27 = vadd.f32 %v7811_v31, %v721_v24 }
 0x127   : > { %6625 = vmatmul.mubr.bf16.gmra.mrb[40].mxu0 %v1809_v39  ;;  %6821 = vmatmul.mubr.bf16.gmra.mrb[12].mxu1 %v812_v5  ;;  %v1827_v41 = vshrl.u32 %v1701_v28, 16  ;;  %v8011_v2 = vsel %vm1757_vm3, %v7883_v20, %v2587_v47  ;;  %v791_v35 = vmax.f32 %v759_v34, 0.0  ;;  %v1830_v15 = vshll.u32 %v1701_v28, 16 }
 0x128   : > { %v758_v32 = vadd.f32 %v7811_v31, %v719_v42  ;;  %6628 = vmatprep.mubr.bf16.mxu0 %v1817_v17  ;;  %v1819_v44 = vshrl.u32 %v1700_v48, 16  ;;  %6853 = vmatpush3.bf16.msra.mxu1 %v7331_v6  ;;  %8983 = vst [vmem:[#allocation18_spill] sm:$0xff] %v8011_v2  ;;  %v792_v5 = vmax.f32 %v760_v27, 0.0  ;;  %v789_v25 = vmax.f32 %v757_v21, 0.0  ;;  %v7335_v21 = vld [vmem:[%s8923_s6 + $0x60] sm:$0xff]  }
 0x129   : > { %v8015_v57 = vrot.slane %v1827_v41, 7  ;;  %6854 = vmatprep.subr.bf16.mxu1 %v7334_v60  ;;  %v6590_v43 = vpop.f32.mrb[20].mxu0  ;;  %v1822_v0 = vshll.u32 %v1700_v48, 16  ;;  %6655 = vmatpush3.bf16.msra.mxu0 %v7333_v49  ;;  %v7336_v49 = vld [vmem:[%s8923_s6 + $0x68] sm:$0xff]  }
 0x12a   : > { %v790_v29 = vmax.f32 %v758_v32, 0.0  ;;  %v1821_v24 = vrot.slane %v1819_v44, 7  ;;  %v814_v6 = vpack.c.bf16 %v792_v5, %v791_v35  ;;  %v724_v20 = vmul.f32 %v6590_v43, %v7796_v9  ;;  %v648_v47 = vpop.f32.mrb[21].mxu0  ;;  %v8033_v35 = vld [vmem:[%s8923_s6 + $0x180] sm:$0xff]   ;;  %6656 = vmatprep.subr.bf16.mxu0 %v7335_v21 }
 0x12b   : > { %v1832_v38 = vor.u32 %v1830_v15, %v8015_v57  ;;  %v722_v28 = vmul.f32 %v7796_v9, %v648_v47  ;;  %v6591_v42 = vpop.f32.mrb[22].mxu0 }
 0x12c   : > { %v813_v17 = vpack.c.bf16 %v790_v29, %v789_v25  ;;  %v1824_v40 = vor.u32 %v1822_v0, %v1821_v24  ;;  %6855 = vmatpush3.bf16.msra.mxu1 %v7334_v60  ;;  %850 = vst [vmem:[#allocation2 + $0x58] sm:$0xff] %v814_v6  ;;  %v763_v48 = vadd.f32 %v7811_v31, %v724_v20  ;;  %v651_v41 = vpop.f32.mrb[23].mxu0  ;;  %v1027_v0 = vand.u32 15, %v8003_v58 }
 0x12d   : > { %v725_v27 = vmul.f32 %v6591_v42, %v7796_v9  ;;  %v1833_v32 = vsel %vm1757_vm3, %v1821_v24, %v1832_v38  ;;  %v1703_v44 = vmul.bf16 %v7814_v19, %v814_v6  ;;  %v761_v60 = vadd.f32 %v7811_v31, %v722_v28  ;;  %6657 = vmatpush3.bf16.msra.mxu0 %v7335_v21 }
 0x12e   : > { %849 = vst [vmem:[#allocation2 + $0x50] sm:$0xff] %v813_v17  ;;  %v723_v5 = vmul.f32 %v7796_v9, %v651_v41  ;;  %6824 = vmatprep.mubr.bf16.mxu1 %v813_v17  ;;  %v1825_v15 = vsel %vm1757_vm3, %v7972_v53, %v1824_v40  ;;  %v1702_v25 = vmul.bf16 %v7804_v26, %v813_v17  ;;  %v1672_v53 = vshrl.u32 %v7818_v37, 16 }
 0x12f   : > { %v764_v29 = vadd.f32 %v7811_v31, %v725_v27  ;;  %6629 = vmatmul.mubr.bf16.gmra.mrb[44].mxu0 %v1825_v15  ;;  %6825 = vmatmul.mubr.bf16.gmra.mrb[16].mxu1 %v814_v6  ;;  %v1843_v43 = vshrl.u32 %v1703_v44, 16  ;;  %v1041_v38 = vand.u32 15, %v8006_v54  ;;  %v795_v17 = vmax.f32 %v763_v48, 0.0 }
 0x130   : > { %v762_v20 = vadd.f32 %v7811_v31, %v723_v5  ;;  %6632 = vmatprep.mubr.bf16.mxu0 %v1833_v32  ;;  %v1835_v47 = vshrl.u32 %v1702_v25, 16  ;;  %v1846_v40 = vshll.u32 %v1703_v44, 16  ;;  %6888 = vmatprep.subr.bf16.mxu1 %v8033_v35  ;;  %v793_v6 = vmax.f32 %v761_v60, 0.0  ;;  %v7338_v60 = vld [vmem:[%s8923_s6 + $0x70] sm:$0xff]  }
 0x131   : > { %v796_v28 = vmax.f32 %v764_v29, 0.0  ;;  %v8049_v42 = vrot.slane %v1843_v43, 7  ;;  %v6594_v58 = vpop.f32.mrb[24].mxu0  ;;  %v1838_v5 = vshll.u32 %v1702_v25, 16  ;;  %6658 = vmatprep.subr.bf16.mxu0 %v7336_v49  ;;  %v881_v48 = vadd.s32 184, %v7622_v10 }
 0x132   : > { %v794_v27 = vmax.f32 %v762_v20, 0.0  ;;  %v1837_v41 = vrot.slane %v1835_v47, 7  ;;  %v728_v15 = vmul.f32 %v6594_v58, %v7796_v9  ;;  %v664_v37 = vpop.f32.mrb[25].mxu0  ;;  %v8062_v25 = vadd.s32 200, %v7622_v10  ;;  %6659 = vmatpush3.bf16.msra.mxu0 %v7336_v49 }
 0x133   : > { %v816_v32 = vpack.c.bf16 %v796_v28, %v795_v17  ;;  %v1848_v24 = vor.u32 %v1846_v40, %v8049_v42  ;;  %v726_v44 = vmul.f32 %v7796_v9, %v664_v37  ;;  %v6595_v21 = vpop.f32.mrb[26].mxu0  ;;  %v1055_v37 = vand.u32 15, %v881_v48  ;;  %6660 = vmatprep.subr.bf16.mxu0 %v7338_v60 }
 0x134   : > { %v815_v29 = vpack.c.bf16 %v794_v27, %v793_v6  ;;  %v1840_v43 = vor.u32 %v1838_v5, %v1837_v41  ;;  %v767_v20 = vadd.f32 %v7811_v31, %v728_v15  ;;  %v729_v47 = vmul.f32 %v6595_v21, %v7796_v9  ;;  %v667_v17 = vpop.f32.mrb[27].mxu0  ;;  %v7339_v15 = vld [vmem:[%s8923_s6 + $0x78] sm:$0xff]  }
 0x135   : > { %852 = vst [vmem:[#allocation2 + $0x68] sm:$0xff] %v816_v32  ;;  %v1849_v28 = vsel %vm1757_vm3, %v1837_v41, %v1848_v24  ;;  %v1705_v40 = vmul.bf16 %v7842_v1, %v816_v32  ;;  %v765_v6 = vadd.f32 %v7811_v31, %v726_v44  ;;  %v727_v27 = vmul.f32 %v7796_v9, %v667_v17 }
 0x136   : > { %851 = vst [vmem:[#allocation2 + $0x60] sm:$0xff] %v815_v29  ;;  %6828 = vmatprep.mubr.bf16.mxu1 %v815_v29  ;;  %v1841_v58 = vsel %vm1757_vm3, %v8015_v57, %v1840_v43  ;;  %v1704_v5 = vmul.bf16 %v7839_v61, %v815_v29  ;;  %v768_v24 = vadd.f32 %v7811_v31, %v729_v47  ;;  %v799_v43 = vmax.f32 %v767_v20, 0.0  ;;  %v8140_v61 = vld [vmem:[#allocation2 + $0x30] sm:$0xff] }
 0x137   : > { %6633 = vmatmul.mubr.bf16.gmra.mrb[48].mxu0 %v1841_v58  ;;  %6829 = vmatmul.mubr.bf16.gmra.mrb[20].mxu1 %v816_v32  ;;  %v1859_v49 = vshrl.u32 %v1705_v40, 16  ;;  %v8079_v41 = vmul.bf16 %v8056_v62, %v7763_v22  ;;  %v766_v44 = vadd.f32 %v7811_v31, %v727_v27  ;;  %v8083_v29 = vor.u32 %v1672_v53, %v7853_v33  ;;  %v8088_v58 = vld [vmem:[#allocation2 + $0x18] sm:$0xff] }
 0x138   : > { %6636 = vmatprep.mubr.bf16.mxu0 %v1849_v28  ;;  %v1851_v57 = vshrl.u32 %v1704_v5, 16  ;;  %v800_v47 = vmax.f32 %v768_v24, 0.0  ;;  %v1862_v32 = vshll.u32 %v1705_v40, 16  ;;  %6661 = vmatpush3.bf16.msra.mxu0 %v7338_v60  ;;  %vm8090_vm13 = vcmp.ne.s32.totalorder %v1027_v0, 15 }
 0x139   : > { %8984 = vst [vmem:[#allocation19_spill] sm:$0xff] %v8083_v29  ;;  %v8086_v17 = vrot.slane %v1859_v49, 7  ;;  %v797_v28 = vmax.f32 %v765_v6, 0.0  ;;  %v798_v27 = vmax.f32 %v766_v44, 0.0  ;;  %v6598_v39 = vpop.f32.mrb[28].mxu0  ;;  %v1854_v53 = vshll.u32 %v1704_v5, 16  ;;  %6662 = vmatprep.subr.bf16.mxu0 %v7339_v15 }
 0x13a   : > { %v1853_v33 = vrot.slane %v1851_v57, 7  ;;  %vm8096_vm14 = vcmp.ne.s32.totalorder %v1041_v38, 15  ;;  %v818_v40 = vpack.c.bf16 %v800_v47, %v799_v43  ;;  %v732_v24 = vmul.f32 %v6598_v39, %v7796_v9  ;;  %v680_v60 = vpop.f32.mrb[29].mxu0  ;;  %v8112_v43 = vld [vmem:[#allocation2 + $0x20] sm:$0xff] }
 0x13b   : > { %v1864_v0 = vor.u32 %v1862_v32, %v8086_v17  ;;  %v4093_v49 = vshll.u32 %v8079_v41, 16  ;;  %vm8103_vm15 = vcmp.ne.s32.totalorder %v1055_v37, 15  ;;  %v817_v5 = vpack.c.bf16 %v798_v27, %v797_v28  ;;  %v6599_v54 = vpop.f32.mrb[30].mxu0  ;;  %v8117_v39 = vld [vmem:[%s8923_s6 + $0x80] sm:$0xff]  }
 0x13c   : > { %v730_v44 = vmul.f32 %v7796_v9, %v680_v60  ;;  %v1856_v38 = vor.u32 %v1854_v53, %v1853_v33  ;;  %v8110_v57 = vmul.bf16 %v8088_v58, %v7790_v4  ;;  %854 = vst [vmem:[#allocation2 + $0x78] sm:$0xff] %v818_v40  ;;  %v771_v37 = vadd.f32 %v7811_v31, %v732_v24  ;;  %v683_v32 = vpop.f32.mrb[31].mxu0 }
 0x13d   : > { %v733_v47 = vmul.f32 %v6599_v54, %v7796_v9  ;;  %v1865_v28 = vsel %vm1757_vm3, %v1853_v33, %v1864_v0  ;;  %v1707_v27 = vmul.bf16 %v7881_v50, %v818_v40  ;;  %6663 = vmatpush3.bf16.msra.mxu0 %v7339_v15  ;;  %853 = vst [vmem:[#allocation2 + $0x70] sm:$0xff] %v817_v5  ;;  %v4095_v33 = vrot.slane %v4093_v49, 1  ;;  %v8137_v50 = vld [vmem:[#allocation2 + $0x28] sm:$0xff] }
 0x13e   : > { %v769_v53 = vadd.f32 %v7811_v31, %v730_v44  ;;  %v731_v60 = vmul.f32 %v7796_v9, %v683_v32  ;;  %6832 = vmatprep.mubr.bf16.mxu1 %v817_v5  ;;  %v1857_v21 = vsel %vm1757_vm3, %v8049_v42, %v1856_v38  ;;  %v1706_v59 = vmul.bf16 %v7872_v56, %v817_v5 }
 0x13f   : > { %v772_v24 = vadd.f32 %v7811_v31, %v733_v47  ;;  %6637 = vmatmul.mubr.bf16.gmra.mrb[52].mxu0 %v1857_v21  ;;  %6833 = vmatmul.mubr.bf16.gmra.mrb[24].mxu1 %v818_v40  ;;  %v1875_v54 = vshrl.u32 %v1707_v27, 16  ;;  %v4026_v15 = vmul.bf16 %v8112_v43, %v7829_v51  ;;  %v4091_v9 = vshrl.u32 %v8079_v41, 16 }
 0x140   : > { %v770_v0 = vadd.f32 %v7811_v31, %v731_v60  ;;  %6640 = vmatprep.mubr.bf16.mxu0 %v1865_v28  ;;  %v1867_v44 = vshrl.u32 %v1706_v59, 16  ;;  %v4098_v32 = vshll.u32 %v8110_v57, 16  ;;  %6696 = vmatprep.subr.bf16.mxu0 %v8117_v39  ;;  %v803_v42 = vmax.f32 %v771_v37, 0.0 }
 0x141   : > { %v804_v5 = vmax.f32 %v772_v24, 0.0  ;;  %v8135_v38 = vrot.slane %v1875_v54, 7  ;;  %v1878_v21 = vshll.u32 %v1707_v27, 16  ;;  %v801_v40 = vmax.f32 %v769_v53, 0.0 }
 0x142   : > { %v802_v49 = vmax.f32 %v770_v0, 0.0  ;;  %v1869_v47 = vrot.slane %v1867_v44, 7  ;;  %v1870_v34 = vshll.u32 %v1706_v59, 16  ;;  %v4096_v60 = vor.u32 %v4095_v33, %v4091_v9 }
 0x143   : > { %v820_v31 = vpack.c.bf16 %v804_v5, %v803_v42  ;;  %v1880_v28 = vor.u32 %v1878_v21, %v8135_v38  ;;  %v4106_v41 = vshll.u32 %v4026_v15, 16  ;;  %v8991_v37 = vshll.u32 %v7965_v8, 16 }
 0x144   : > { %v819_v56 = vpack.c.bf16 %v802_v49, %v801_v40  ;;  %v1872_v1 = vor.u32 %v1870_v34, %v1869_v47  ;;  %v8992_v27 = vmov 0.0   ;;  %v4100_v54 = vrot.slane %v4098_v32, 1 }
 0x145   : > { %v2595_v24 = vor.u32 %v8991_v37, %v8013_v30  ;;  %v6022_v53 = vsel %vm8090_vm13, 1.0, %v8992_v27  ;;  %856 = vst [vmem:[#allocation2 + $0x88] sm:$0xff] %v820_v31  ;;  %v1881_v59 = vsel %vm1757_vm3, %v1869_v47, %v1880_v28  ;;  %v8151_v33 = vmul.bf16 %v8137_v50, %v7832_v52  ;;  %v8190_v37 = vld [vmem:[#allocation2 + $0x38] sm:$0xff] }
 0x146   : > { %v6023_v34 = vsel %vm8096_vm14, 1.0, %v8992_v27  ;;  %855 = vst [vmem:[#allocation2 + $0x80] sm:$0xff] %v819_v56  ;;  %6836 = vmatprep.mubr.bf16.mxu1 %v819_v56  ;;  %v1873_v8 = vsel %vm1757_vm3, %v8086_v17, %v1872_v1  ;;  %v1708_v48 = vmul.bf16 %v8083_v29, %v819_v56  ;;  %v6024_v0 = vsel %vm8103_vm15, 1.0, %v8992_v27 }
 0x147   : > { %v8993_v44 = vand.u32 15, %v8062_v25  ;;  %6641 = vmatmul.mubr.bf16.gmra.mrb[56].mxu0 %v1873_v8  ;;  %6837 = vmatmul.mubr.bf16.gmra.mrb[28].mxu1 %v820_v31  ;;  %v4101_v20 = vsel %vm1547_vm2, %v4096_v60, %v4100_v54  ;;  %v4108_v32 = vrot.slane %v4106_v41, 1  ;;  %v4028_v1 = vmul.bf16 %v8140_v61, %v7848_v12 }
 0x148   : > { %v885_v56 = vadd.s32 216, %v7622_v10  ;;  %6644 = vmatprep.mubr.bf16.mxu0 %v1881_v59  ;;  %6856 = vmatprep.mubr.bf16.mxu1 %v4101_v20  ;;  %v1883_v17 = vshrl.u32 %v1708_v48, 16  ;;  %v8996_v6 = vshrl.u32 %v7984_v23, 16  ;;  %v8997_v42 = vmov 1.0   ;;  %v8197_v20 = vld [vmem:[#allocation2 + $0x40] sm:$0xff] }
 0x149   : > { %vm8164_vm0 = vcmp.ne.s32.totalorder %v8993_v44, 15  ;;  %v8177_v5 = vpack.c.bf16 %v6022_v53, %v8997_v42  ;;  %v8180_v21 = vpack.c.bf16 %v6023_v34, %v8997_v42  ;;  %v4110_v40 = vshrl.u32 %v4026_v15, 16 }
 0x14a   : > { %v8174_v25 = vrot.slane %v8996_v6, 7  ;;  %v4114_v49 = vshll.u32 %v8151_v33, 16  ;;  %v8184_v47 = vpack.c.bf16 %v6024_v0, %v8997_v42  ;;  %v6025_v31 = vsel %vm8164_vm0, 1.0, %v8992_v27 }
 0x14b   : > { %v4102_v28 = vshrl.u32 %v8110_v57, 16  ;;  %v1885_v60 = vrot.slane %v1883_v17, 7  ;;  %v1886_v41 = vshll.u32 %v1708_v48, 16  ;;  %v887_v53 = vadd.s32 232, %v7622_v10  ;;  %v7340_v17 = vld [vmem:[%s8923_s6 + $0x188] sm:$0xff]  }
 0x14c   : > { %v4112_v59 = vor.u32 %v4110_v40, %v4108_v32  ;;  %v4122_v34 = vshll.u32 %v4028_v1, 16  ;;  %v8195_v15 = vsel %vm1757_vm3, %v7935_v55, %v2595_v24  ;;  %v1083_v8 = vand.u32 15, %v885_v56 }
 0x14d   : > { %8998 = vst [vmem:[#allocation20_spill] sm:$0xff] %v8195_v15  ;;  %v4104_v0 = vor.u32 %v4102_v28, %v4100_v54  ;;  %v1888_v44 = vor.u32 %v1886_v41, %v1885_v60  ;;  %v8200_v9 = vpack.c.bf16 %v6025_v31, %v8997_v42  ;;  %v889_v57 = vadd.s32 248, %v7622_v10 }
 0x14e   : > { %v4116_v48 = vrot.slane %v4114_v49, 1  ;;  %v8208_v6 = vmul.bf16 %v8190_v37, %v7962_v45  ;;  %v2606_v55 = vshrl.u32 %v8177_v5, 16  ;;  %v2614_v24 = vshrl.u32 %v8180_v21, 16 }
 0x14f   : > { %v1889_v54 = vsel %vm1757_vm3, %v8135_v38, %v1888_v44  ;;  %v4109_v56 = vsel %vm1547_vm2, %v4104_v0, %v4108_v32  ;;  %v2622_v10 = vshrl.u32 %v8184_v47, 16  ;;  %v1097_v40 = vand.u32 15, %v887_v53 }
 0x150   : > { %6645 = vmatmul.mubr.bf16.gmra.mrb[60].mxu0 %v1889_v54  ;;  %6857 = vmatmul.mubr.bf16.vlgmr.msra.gmra.mrb[0].mxu1 %v4109_v56  ;;  %v4117_v49 = vsel %vm1547_vm2, %v4112_v59, %v4116_v48  ;;  %v4124_v31 = vrot.slane %v4122_v34, 1  ;;  %v8219_v28 = vmul.bf16 %v8197_v20, %v8011_v2  ;;  %vm8221_vm1 = vcmp.ne.s32.totalorder %v1083_v8, 15  ;;  %v8231_v34 = vld [vmem:[#allocation2] sm:$0xff]  ;;  %v8240_v54 = vld [vmem:[#allocation2 + $0x48] sm:$0xff] }
 0x151   : > { %6889 = vmatpush3.bf16.msra.mxu1 %v8033_v35  ;;  %6860 = vmatprep.mubr.bf16.mxu1 %v4117_v49  ;;  %v9001_v38 = vshll.u32 %v7984_v23, 16  ;;  %v2609_v41 = vshll.u32 %v8177_v5, 16  ;;  %v2630_v53 = vshrl.u32 %v8200_v9, 16  ;;  %v1111_v59 = vand.u32 15, %v889_v57  ;;  %v7341_v35 = vld [vmem:[%s8923_s6 + $0x190] sm:$0xff]  }
 0x152   : > { %6664 = vmatprep.mubr.bf16.mxu0 %v8231_v34  ;;  %6890 = vmatprep.subr.bf16.mxu1 %v7340_v17  ;;  %v4126_v8 = vshrl.u32 %v4028_v1, 16  ;;  %v4130_v0 = vshll.u32 %v8208_v6, 16  ;;  %v2608_v44 = vrot.slane %v2606_v55, 7  ;;  %v2617_v23 = vshll.u32 %v8180_v21, 16  ;;  %v8247_v55 = vld [vmem:[#allocation2 + $0x50] sm:$0xff] }
 0x153   : > { %v2603_v32 = vor.u32 %v9001_v38, %v8174_v25  ;;  %v4118_v5 = vshrl.u32 %v8151_v33, 16  ;;  %v2616_v57 = vrot.slane %v2614_v24, 7  ;;  %v6026_v56 = vsel %vm8221_vm1, 1.0, %v8992_v27 }
 0x154   : > { %vm1415_vm4 = vcmp.ne.s32.totalorder %v1097_v40, 15  ;;  %v4128_v1 = vor.u32 %v4126_v8, %v4124_v31  ;;  %v4138_v49 = vshll.u32 %v8219_v28, 16  ;;  %v2624_v38 = vrot.slane %v2622_v10, 7  ;;  %v7346_v8 = vld [vmem:[%s8923_s6 + $0x88] sm:$0xff]  }
 0x155   : > { %v2625_v29 = vshll.u32 %v8184_v47, 16  ;;  %v4120_v19 = vor.u32 %v4118_v5, %v4116_v48  ;;  %6891 = vmatpush3.bf16.msra.mxu1 %v7340_v17  ;;  %v8249_v21 = vrot.slane %v2630_v53, 7  ;;  %v2633_v33 = vshll.u32 %v8200_v9, 16  ;;  %v7342_v9 = vld [vmem:[%s8923_s6 + $0x198] sm:$0xff]  }
 0x156   : > { %vm8252_vm5 = vcmp.ne.s32.totalorder %v1111_v59, 15  ;;  %v4132_v60 = vrot.slane %v4130_v0, 1  ;;  %6892 = vmatprep.subr.bf16.mxu1 %v7341_v35  ;;  %v8258_v40 = vmul.bf16 %v8240_v54, %v8195_v15  ;;  %v8261_v47 = vpack.c.bf16 %v6026_v56, %v8997_v42 }
 0x157   : > { %v6027_v48 = vsel %vm1415_vm4, 1.0, %v8992_v27  ;;  %v4125_v17 = vsel %vm1547_vm2, %v4120_v19, %v4124_v31  ;;  %v8270_v10 = vsel %vm1757_vm3, %v8013_v30, %v2603_v32  ;;  %v2611_v53 = vor.u32 %v2609_v41, %v2608_v44 }
 0x158   : > { %9004 = vst [vmem:[#allocation21_spill] sm:$0xff] %v8270_v10  ;;  %v2619_v59 = vor.u32 %v2617_v23, %v2616_v57  ;;  %6665 = vmatmul.mubr.bf16.vlgmr.msra.gmra.mrb[32].mxu0 %v8056_v62  ;;  %6861 = vmatmul.mubr.bf16.gmra.mrb[4].mxu1 %v4125_v17  ;;  %v4133_v0 = vsel %vm1547_vm2, %v4128_v1, %v4132_v60  ;;  %v4140_v19 = vrot.slane %v4138_v49, 1  ;;  %v6028_v30 = vsel %vm8252_vm5, 1.0, %v8992_v27  ;;  %v8298_v49 = vld [vmem:[#allocation2 + $0x58] sm:$0xff]  ;;  %v8315_v17 = vld [vmem:[#allocation2 + $0x60] sm:$0xff] }
 0x159   : > { %v8279_v31 = vmul.bf16 %v8247_v55, %v8270_v10  ;;  %6668 = vmatprep.mubr.bf16.mxu0 %v8088_v58  ;;  %6864 = vmatprep.mubr.bf16.mxu1 %v4133_v0  ;;  %v2627_v32 = vor.u32 %v2625_v29, %v2624_v38  ;;  %v2635_v41 = vor.u32 %v2633_v33, %v8249_v21  ;;  %v4142_v5 = vshrl.u32 %v8219_v28, 16 }
 0x15a   : > { %v8287_v23 = vpack.c.bf16 %v6027_v48, %v8997_v42  ;;  %6893 = vmatpush3.bf16.msra.mxu1 %v7341_v35  ;;  %v4146_v56 = vshll.u32 %v8258_v40, 16  ;;  %6697 = vmatpush3.bf16.msra.mxu0 %v8117_v39  ;;  %v2638_v1 = vshrl.u32 %v8261_v47, 16  ;;  %v4134_v27 = vshrl.u32 %v8208_v6, 16  ;;  %v7343_v35 = vld [vmem:[%s8923_s6 + $0x1a0] sm:$0xff]   ;;  %v7348_v39 = vld [vmem:[%s8923_s6 + $0x90] sm:$0xff]  }
 0x15b   : > { %6894 = vmatprep.subr.bf16.mxu1 %v7342_v9  ;;  %v8296_v29 = vsel %vm1757_vm3, %v8174_v25, %v2611_v53  ;;  %6698 = vmatprep.subr.bf16.mxu0 %v7346_v8  ;;  %v8307_v28 = vpack.c.bf16 %v6028_v30, %v8997_v42  ;;  %v4144_v6 = vor.u32 %v4142_v5, %v4140_v19  ;;  %v4154_v33 = vshll.u32 %v8279_v31, 16 }
 0x15c   : > { %9005 = vst [vmem:[#allocation22_spill] sm:$0xff] %v8296_v29  ;;  %v8311_v25 = vsel %vm1757_vm3, %v2608_v44, %v2619_v59  ;;  %v2681_v24 = vmul.bf16 %v8112_v43, %v7832_v52  ;;  %v4136_v48 = vor.u32 %v4134_v27, %v4132_v60  ;;  %v8318_v53 = vsel %vm1757_vm3, %v2616_v57, %v2627_v32  ;;  %v7344_v57 = vld [vmem:[%s8923_s6 + $0x1a8] sm:$0xff]   ;;  %v7349_v32 = vld [vmem:[%s8923_s6 + $0x98] sm:$0xff]  }
 0x15d   : > { %9006 = vst [vmem:[#allocation23_spill] sm:$0xff] %v8311_v25  ;;  %9007 = vst [vmem:[#allocation24_spill] sm:$0xff] %v8318_v53  ;;  %v8321_v0 = vsel %vm1757_vm3, %v2624_v38, %v2635_v41  ;;  %v2646_v42 = vshrl.u32 %v8287_v23, 16  ;;  %v4148_v30 = vrot.slane %v4146_v56, 1  ;;  %v8326_v44 = vmul.bf16 %v8298_v49, %v8296_v29 }
 0x15e   : > { %9008 = vst [vmem:[#allocation25_spill] sm:$0xff] %v8321_v0  ;;  %6895 = vmatpush3.bf16.msra.mxu1 %v7342_v9  ;;  %v8328_v59 = vrot.slane %v2638_v1, 7  ;;  %v2641_v60 = vshll.u32 %v8261_v47, 16  ;;  %6699 = vmatpush3.bf16.msra.mxu0 %v7346_v8  ;;  %v4141_v5 = vsel %vm1547_vm2, %v4136_v48, %v4140_v19  ;;  %v2649_v38 = vshll.u32 %v8287_v23, 16 }
 0x15f   : > { %6896 = vmatprep.subr.bf16.mxu1 %v7343_v35  ;;  %6700 = vmatprep.subr.bf16.mxu0 %v7348_v39  ;;  %v2654_v9 = vshrl.u32 %v8307_v28, 16  ;;  %v2768_v41 = vshll.u32 %v2681_v24, 16  ;;  %v4149_v47 = vsel %vm1547_vm2, %v4144_v6, %v4148_v30  ;;  %v4156_v8 = vrot.slane %v4154_v33, 1 }
 0x160   : > { %6669 = vmatmul.mubr.bf16.gmra.mrb[36].mxu0 %v8112_v43  ;;  %6865 = vmatmul.mubr.bf16.gmra.mrb[8].mxu1 %v4141_v5  ;;  %v8344_v19 = vmul.bf16 %v8315_v17, %v8311_v25  ;;  %v2682_v23 = vmul.bf16 %v8137_v50, %v7848_v12  ;;  %v4150_v56 = vshrl.u32 %v8258_v40, 16  ;;  %v8350_v1 = vrot.slane %v2646_v42, 7  ;;  %v7347_v5 = vld [vmem:[%s8923_s6 + $0x1b0] sm:$0xff]   ;;  %v8361_v42 = vld [vmem:[#allocation2 + $0x68] sm:$0xff] }
 0x161   : > { %6672 = vmatprep.mubr.bf16.mxu0 %v8137_v50  ;;  %6868 = vmatprep.mubr.bf16.mxu1 %v4149_v47  ;;  %v8352_v27 = vrot.slane %v2768_v41, 1  ;;  %v2772_v48 = vshrl.u32 %v2681_v24, 16  ;;  %v4158_v6 = vshrl.u32 %v8279_v31, 16  ;;  %v4162_v33 = vshll.u32 %v8326_v44, 16  ;;  %v8363_v41 = vld [vmem:[#allocation2 + $0x70] sm:$0xff] }
 0x162   : > { %6897 = vmatpush3.bf16.msra.mxu1 %v7343_v35  ;;  %6701 = vmatpush3.bf16.msra.mxu0 %v7348_v39  ;;  %v2776_v12 = vshll.u32 %v2682_v23, 16  ;;  %v2683_v47 = vmul.bf16 %v8140_v61, %v7962_v45  ;;  %v4152_v40 = vor.u32 %v4150_v56, %v4148_v30  ;;  %v2643_v31 = vor.u32 %v2641_v60, %v8328_v59  ;;  %v7351_v35 = vld [vmem:[%s8923_s6 + $0xa0] sm:$0xff]  }
 0x163   : > { %9009 = vst [vmem:[#allocation26_spill] sm:$0xff] %v8352_v27  ;;  %6898 = vmatprep.subr.bf16.mxu1 %v7344_v57  ;;  %v8366_v24 = vrot.slane %v2654_v9, 7  ;;  %6702 = vmatprep.subr.bf16.mxu0 %v7349_v32  ;;  %v2774_v39 = vor.u32 %v2772_v48, %v8352_v27  ;;  %v4160_v52 = vor.u32 %v4158_v6, %v4156_v8  ;;  %v4170_v45 = vshll.u32 %v8344_v19, 16 }
 0x164   : > { %v2657_v30 = vshll.u32 %v8307_v28, 16  ;;  %v2778_v56 = vrot.slane %v2776_v12, 1  ;;  %v4157_v26 = vsel %vm1547_vm2, %v4152_v40, %v4156_v8  ;;  %v2780_v46 = vshrl.u32 %v2682_v23, 16  ;;  %v7350_v28 = vld [vmem:[%s8923_s6 + $0x1b8] sm:$0xff]   ;;  %v7352_v8 = vld [vmem:[%s8923_s6 + $0xa8] sm:$0xff]  }
 0x165   : > { %9010 = vst [vmem:[#allocation27_spill] sm:$0xff] %v8366_v24  ;;  %v2784_v11 = vshll.u32 %v2683_v47, 16  ;;  %v2684_v60 = vmul.bf16 %v8190_v37, %v8011_v2  ;;  %v4164_v9 = vrot.slane %v4162_v33, 1  ;;  %v8379_v13 = vmul.bf16 %v8361_v42, %v8318_v53 }
 0x166   : > { %v8383_v48 = vmul.bf16 %v8363_v41, %v8321_v0  ;;  %6899 = vmatpush3.bf16.msra.mxu1 %v7344_v57  ;;  %6703 = vmatpush3.bf16.msra.mxu0 %v7349_v32  ;;  %v8386_v12 = vsel %vm1547_vm2, %v2774_v39, %v2778_v56  ;;  %v2782_v23 = vor.u32 %v2780_v46, %v2778_v56  ;;  %v2788_v33 = vshrl.u32 %v2683_v47, 16 }
 0x167   : > { %9011 = vst [vmem:[#allocation28_spill] sm:$0xff] %v8386_v12  ;;  %6900 = vmatprep.subr.bf16.mxu1 %v7347_v5  ;;  %6704 = vmatprep.subr.bf16.mxu0 %v7351_v35  ;;  %v2786_v6 = vrot.slane %v2784_v11, 1  ;;  %v2792_v40 = vshll.u32 %v2684_v60, 16  ;;  %v4165_v57 = vsel %vm1547_vm2, %v4160_v52, %v4164_v9  ;;  %v4172_v32 = vrot.slane %v4170_v45, 1  ;;  %v8411_v12 = vld [vmem:[#allocation2 + $0x78] sm:$0xff] }
 0x168   : > { %6673 = vmatmul.mubr.bf16.gmra.mrb[40].mxu0 %v8140_v61  ;;  %6869 = vmatmul.mubr.bf16.gmra.mrb[12].mxu1 %v4157_v26  ;;  %v2651_v39 = vor.u32 %v2649_v38, %v8350_v1  ;;  %v2685_v2 = vmul.bf16 %v8197_v20, %v8195_v15  ;;  %v8402_v46 = vsel %vm1757_vm3, %v8249_v21, %v2643_v31  ;;  %v4174_v52 = vshrl.u32 %v8344_v19, 16  ;;  %v8417_v19 = vld [vmem:[%s8923_s6 + $0x1c0] sm:$0xff]  }
 0x169   : > { %6676 = vmatprep.mubr.bf16.mxu0 %v8190_v37  ;;  %6872 = vmatprep.mubr.bf16.mxu1 %v4165_v57  ;;  %9012 = vst [vmem:[#allocation29_spill] sm:$0xff] %v8402_v46  ;;  %v8405_v11 = vsel %vm1547_vm2, %v2782_v23, %v2786_v6  ;;  %v2790_v47 = vor.u32 %v2788_v33, %v2786_v6  ;;  %v2794_v26 = vrot.slane %v2792_v40, 1  ;;  %v4178_v45 = vshll.u32 %v8379_v13, 16  ;;  %v8427_v6 = vld [vmem:[#allocation2 + $0x80] sm:$0xff] }
 0x16a   : > { %9013 = vst [vmem:[#allocation30_spill] sm:$0xff] %v8405_v11  ;;  %6901 = vmatpush3.bf16.msra.mxu1 %v7347_v5  ;;  %6705 = vmatpush3.bf16.msra.mxu0 %v7351_v35  ;;  %v2796_v38 = vshrl.u32 %v2684_v60, 16  ;;  %v2800_v56 = vshll.u32 %v2685_v2, 16  ;;  %v4166_v15 = vshrl.u32 %v8326_v44, 16  ;;  %v4186_v57 = vshll.u32 %v8383_v48, 16  ;;  %v7354_v5 = vld [vmem:[%s8923_s6 + $0xb0] sm:$0xff]  }
 0x16b   : > { %v2659_v21 = vor.u32 %v2657_v30, %v8366_v24  ;;  %6902 = vmatprep.subr.bf16.mxu1 %v7350_v28  ;;  %6706 = vmatprep.subr.bf16.mxu0 %v7352_v8  ;;  %v8423_v31 = vsel %vm1547_vm2, %v2790_v47, %v2794_v26  ;;  %v4176_v44 = vor.u32 %v4174_v52, %v4172_v32  ;;  %v2804_v33 = vshrl.u32 %v2685_v2, 16 }
 0x16c   : > { %v2798_v35 = vor.u32 %v2796_v38, %v2794_v26  ;;  %v2802_v60 = vrot.slane %v2800_v56, 1  ;;  %v2686_v30 = vmul.bf16 %v8240_v54, %v8270_v10  ;;  %v4168_v23 = vor.u32 %v4166_v15, %v4164_v9  ;;  %v7355_v9 = vld [vmem:[%s8923_s6 + $0xb8] sm:$0xff]  }
 0x16d   : > { %v2687_v40 = vmul.bf16 %v8247_v55, %v8296_v29  ;;  %v4180_v11 = vrot.slane %v4178_v45, 1  ;;  %v8433_v27 = vmul.bf16 %v8411_v12, %v8402_v46  ;;  %v8437_v47 = vsel %vm1757_vm3, %v8328_v59, %v2651_v39 }
 0x16e   : > { %6903 = vmatpush3.bf16.msra.mxu1 %v7350_v28  ;;  %6707 = vmatpush3.bf16.msra.mxu0 %v7352_v8  ;;  %v8440_v26 = vsel %vm1547_vm2, %v2798_v35, %v2802_v60  ;;  %v4173_v15 = vsel %vm1547_vm2, %v4168_v23, %v4172_v32  ;;  %v8445_v2 = vsel %vm1757_vm3, %v8350_v1, %v2659_v21  ;;  %v2808_v39 = vshll.u32 %v2686_v30, 16  ;;  %v8455_v1 = vld [vmem:[#allocation2 + $0x88] sm:$0xff] }
 0x16f   : > { %6936 = vmatprep.subr.bf16.mxu1 %v8417_v19  ;;  %6708 = vmatprep.subr.bf16.mxu0 %v7354_v5  ;;  %v2806_v59 = vor.u32 %v2804_v33, %v2802_v60  ;;  %v4181_v28 = vsel %vm1547_vm2, %v4176_v44, %v4180_v11  ;;  %v4188_v8 = vrot.slane %v4186_v57, 1  ;;  %v4038_v32 = vmul.bf16 %v8427_v6, %v8437_v47  ;;  %v4023_v33 = vld [vmem:[#allocation2 + $0x90] sm:$0x1] }
 0x170   : > { %6677 = vmatmul.mubr.bf16.gmra.mrb[44].mxu0 %v8197_v20  ;;  %6873 = vmatmul.mubr.bf16.gmra.mrb[16].mxu1 %v4173_v15  ;;  %v2816_v52 = vshll.u32 %v2687_v40, 16  ;;  %v4190_v45 = vshrl.u32 %v8383_v48, 16  ;;  %v2810_v38 = vrot.slane %v2808_v39, 1  ;;  %v2812_v56 = vshrl.u32 %v2686_v30, 16 }
 0x171   : > { %6680 = vmatprep.mubr.bf16.mxu0 %v8240_v54  ;;  %6876 = vmatprep.mubr.bf16.mxu1 %v4181_v28  ;;  %v4194_v21 = vshll.u32 %v8433_v27, 16  ;;  %v2688_v57 = vmul.bf16 %v8298_v49, %v8311_v25  ;;  %v2820_v44 = vshrl.u32 %v2687_v40, 16  ;;  %v4182_v60 = vshrl.u32 %v8379_v13, 16 }
 0x172   : > { %6709 = vmatpush3.bf16.msra.mxu0 %v7354_v5  ;;  %v2818_v35 = vrot.slane %v2816_v52, 1  ;;  %v8465_v23 = vmul.bf16 %v8455_v1, %v8445_v2  ;;  %v8468_v48 = vsel %vm1547_vm2, %v2806_v59, %v2810_v38  ;;  %v2814_v30 = vor.u32 %v2812_v56, %v2810_v38  ;;  %v8473_v5 = vld [vmem:[%s8923_s6 + $0xc0] sm:$0xff]  }
 0x173   : > { %6710 = vmatprep.subr.bf16.mxu0 %v7355_v9  ;;  %v4192_v15 = vor.u32 %v4190_v45, %v4188_v8  ;;  %v4202_v39 = vshll.u32 %v4038_v32, 16  ;;  %v2824_v28 = vshll.u32 %v2688_v57, 16  ;;  %v4184_v13 = vor.u32 %v4182_v60, %v4180_v11 }
 0x174   : > { %v2822_v40 = vor.u32 %v2820_v44, %v2818_v35  ;;  %v8476_v52 = vsel %vm1547_vm2, %v2814_v30, %v2818_v35  ;;  %v2689_v25 = vmul.bf16 %v8315_v17, %v8318_v53  ;;  %v4196_v29 = vrot.slane %v4194_v21, 1  ;;  %v4511_v44 = vld [vmem:[#allocation2 + $0x10] sm:$0x80] }
 0x175   : > { %v4040_v59 = vmul.bf16 %v4023_v33, %v8366_v24  ;;  %v8483_v38 = vmul.bf16 %v8088_v58, %v7660_v16  ;;  %v2826_v56 = vrot.slane %v2824_v28, 1  ;;  %v4189_v45 = vsel %vm1547_vm2, %v4184_v13, %v4188_v8 }
 0x176   : > { %6711 = vmatpush3.bf16.msra.mxu0 %v7355_v9  ;;  %v2828_v11 = vshrl.u32 %v2688_v57, 16  ;;  %v2832_v35 = vshll.u32 %v2689_v25, 16  ;;  %v2690_v60 = vmul.bf16 %v8361_v42, %v8321_v0  ;;  %v4197_v21 = vsel %vm1547_vm2, %v4192_v15, %v4196_v29 }
 0x177   : > { %6744 = vmatprep.subr.bf16.mxu0 %v8473_v5  ;;  %v4204_v33 = vrot.slane %v4202_v39, 1  ;;  %v4210_v30 = vshll.u32 %v8465_v23, 16  ;;  %v8493_v9 = vsel %vm1547_vm2, %v2822_v40, %v2826_v56  ;;  %v2836_v28 = vshrl.u32 %v2689_v25, 16 }
 0x178   : > { %6681 = vmatmul.mubr.bf16.gmra.mrb[48].mxu0 %v8247_v55  ;;  %6877 = vmatmul.mubr.bf16.gmra.mrb[20].mxu1 %v4189_v45  ;;  %v2830_v8 = vor.u32 %v2828_v11, %v2826_v56  ;;  %v2834_v57 = vrot.slane %v2832_v35, 1  ;;  %v2840_v13 = vshll.u32 %v2690_v60, 16  ;;  %v4198_v0 = vshrl.u32 %v8433_v27, 16 }
 0x179   : > { %6684 = vmatprep.mubr.bf16.mxu0 %v8298_v49  ;;  %6880 = vmatprep.mubr.bf16.mxu1 %v4197_v21  ;;  %v4206_v53 = vshrl.u32 %v4038_v32, 16  ;;  %v4528_v45 = vmul.bf16 %v4511_v44, %v7648_v7  ;;  %v2691_v15 = vmul.bf16 %v8363_v41, %v8402_v46  ;;  %v4599_v39 = vshrl.u32 %v8483_v38, 16 }
 0x17a   : > { %v8502_v40 = vsel %vm1547_vm2, %v2830_v8, %v2834_v57  ;;  %v2838_v10 = vor.u32 %v2836_v28, %v2834_v57  ;;  %v2842_v24 = vrot.slane %v2840_v13, 1  ;;  %v2678_v25 = vmul.bf16 %v8231_v34, %v7763_v22 }
 0x17b   : > { %v4208_v21 = vor.u32 %v4206_v53, %v4204_v33  ;;  %v2844_v56 = vshrl.u32 %v2690_v60, 16  ;;  %v2848_v11 = vshll.u32 %v2691_v15, 16  ;;  %v4200_v27 = vor.u32 %v4198_v0, %v4196_v29 }
 0x17c   : > { %v4212_v32 = vrot.slane %v4210_v30, 1  ;;  %v4218_v35 = vshll.u32 %v4040_v59, 16  ;;  %v8507_v44 = vsel %vm1547_vm2, %v2838_v10, %v2842_v24  ;;  %v2692_v8 = vmul.bf16 %v8411_v12, %v8437_v47 }
 0x17d   : > { %v2846_v46 = vor.u32 %v2844_v56, %v2842_v24  ;;  %v2850_v7 = vrot.slane %v2848_v11, 1  ;;  %v2852_v16 = vshrl.u32 %v2691_v15, 16  ;;  %v4205_v57 = vsel %vm1547_vm2, %v4200_v27, %v4204_v33 }
 0x17e   : > { %v4595_v53 = vshrl.u32 %v4528_v45, 16  ;;  %v4601_v28 = vrot.slane %v4599_v39, 7  ;;  %v4530_v60 = vmul.bf16 %v8112_v43, %v7713_v14  ;;  %v4213_v29 = vsel %vm1547_vm2, %v4208_v21, %v4212_v32 }
 0x17f   : > { %v8517_v10 = vsel %vm1547_vm2, %v2846_v46, %v2850_v7  ;;  %v2854_v0 = vor.u32 %v2852_v16, %v2850_v7  ;;  %v2856_v24 = vshll.u32 %v2692_v8, 16  ;;  %v4214_v59 = vshrl.u32 %v8465_v23, 16 }
 0x180   : > { %6685 = vmatmul.mubr.bf16.gmra.mrb[52].mxu0 %v8315_v17  ;;  %6881 = vmatmul.mubr.bf16.gmra.mrb[24].mxu1 %v4205_v57  ;;  %v4531_v33 = vmul.bf16 %v8137_v50, %v7719_v18  ;;  %v8525_v43 = vmul.bf16 %v8427_v6, %v8445_v2  ;;  %v4220_v30 = vrot.slane %v4218_v35, 1  ;;  %v4602_v13 = vshll.u32 %v8483_v38, 16 }
 0x181   : > { %6688 = vmatprep.mubr.bf16.mxu0 %v8361_v42  ;;  %6884 = vmatprep.mubr.bf16.mxu1 %v4213_v29  ;;  %v2747_v45 = vshll.u32 %v2678_v25, 16  ;;  %v2858_v46 = vrot.slane %v2856_v24, 1  ;;  %v4216_v15 = vor.u32 %v4214_v59, %v4212_v32  ;;  %v4607_v7 = vshrl.u32 %v4530_v60, 16 }
 0x182   : > { %v2860_v16 = vshrl.u32 %v2692_v8, 16  ;;  %v2864_v39 = vshll.u32 %v8525_v43, 16  ;;  %v4597_v21 = vrot.slane %v4595_v53, 7  ;;  %v4604_v56 = vor.u32 %v4602_v13, %v4601_v28 }
 0x183   : > { %v2679_v23 = vmul.bf16 %v8056_v62, %v7790_v4  ;;  %v8532_v50 = vsel %vm1547_vm2, %v2854_v0, %v2858_v46  ;;  %v4615_v11 = vshrl.u32 %v4531_v33, 16  ;;  %v2745_v38 = vshrl.u32 %v2678_v25, 16 }
 0x184   : > { %v2862_v27 = vor.u32 %v2860_v16, %v2858_v46  ;;  %v8534_v35 = vrot.slane %v2864_v39, 1  ;;  %v4221_v57 = vsel %vm1547_vm2, %v4216_v15, %v4220_v30  ;;  %v4609_v32 = vrot.slane %v4607_v7, 7 }
 0x185   : > { %v4532_v8 = vmul.bf16 %v8140_v61, %v7730_v36  ;;  %v4605_v62 = vsel %vm1757_vm3, %v4597_v21, %v4604_v56  ;;  %v2749_v29 = vrot.slane %v2747_v45, 1  ;;  %v2752_v0 = vshll.u32 %v2679_v23, 16  ;;  %v7356_v45 = vld [vmem:[%s8923_s6 + $0x1c8] sm:$0xff]  }
 0x186   : > { %v8541_v53 = vsel %vm1547_vm2, %v2862_v27, %v8534_v35  ;;  %v4533_v25 = vmul.bf16 %v8190_v37, %v7747_v63  ;;  %v4610_v24 = vshll.u32 %v4530_v60, 16  ;;  %v4617_v59 = vrot.slane %v4615_v11, 7  ;;  %v9014_v11 = vld [vmem:[#allocation6_spill] sm:$0xff] }
 0x187   : > { %v2680_v61 = vmul.bf16 %v8088_v58, %v7829_v51  ;;  %v4618_v13 = vshll.u32 %v4531_v33, 16  ;;  %v4623_v46 = vshrl.u32 %v4532_v8, 16  ;;  %v2750_v15 = vor.u32 %v2749_v29, %v2745_v38  ;;  %v7357_v29 = vld [vmem:[%s8923_s6 + $0x1d0] sm:$0xff]  }
 0x188   : > { %6689 = vmatmul.mubr.bf16.gmra.mrb[56].mxu0 %v8363_v41  ;;  %6885 = vmatmul.mubr.bf16.gmra.mrb[28].mxu1 %v4221_v57  ;;  %v4612_v30 = vor.u32 %v4610_v24, %v4609_v32  ;;  %v2754_v7 = vrot.slane %v2752_v0, 1  ;;  %v4631_v16 = vshrl.u32 %v4533_v25, 16  ;;  %v4534_v60 = vmul.bf16 %v8197_v20, %v7751_v3 }
 0x189   : > { %6692 = vmatprep.mubr.bf16.mxu0 %v8411_v12  ;;  %6904 = vmatprep.mubr.bf16.mxu1 %v4605_v62  ;;  %v4620_v39 = vor.u32 %v4618_v13, %v4617_v59  ;;  %v2760_v37 = vshll.u32 %v2680_v61, 16  ;;  %v4625_v56 = vrot.slane %v4623_v46, 7  ;;  %v4535_v27 = vmul.bf16 %v8240_v54, %v9014_v11 }
 0x18a   : > { %v4613_v21 = vsel %vm1757_vm3, %v4601_v28, %v4612_v30  ;;  %v2755_v58 = vsel %vm1547_vm2, %v2750_v15, %v2754_v7  ;;  %v4633_v33 = vrot.slane %v4631_v16, 7  ;;  %v2756_v38 = vshrl.u32 %v2679_v23, 16  ;;  %v9015_v15 = vld [vmem:[#allocation8_spill] sm:$0xff]  ;;  %v9016_v16 = vld [vmem:[#allocation26_spill] sm:$0xff] }
 0x18b   : > { %v4621_v57 = vsel %vm1757_vm3, %v4609_v32, %v4620_v39  ;;  %v4626_v28 = vshll.u32 %v4532_v8, 16  ;;  %v2762_v62 = vrot.slane %v2760_v37, 1  ;;  %v4634_v20 = vshll.u32 %v4533_v25, 16  ;;  %v7358_v25 = vld [vmem:[%s8923_s6 + $0x1d8] sm:$0xff]  }
 0x18c   : > { %v2758_v0 = vor.u32 %v2756_v38, %v2754_v7  ;;  %v4639_v30 = vshrl.u32 %v4534_v60, 16  ;;  %v2764_v13 = vshrl.u32 %v2680_v61, 16  ;;  %v4647_v46 = vshrl.u32 %v4535_v27, 16  ;;  %v7362_v61 = vld [vmem:[%s8923_s6 + $0xc8] sm:$0xff]   ;;  %v9017_v37 = vld [vmem:[#allocation7_spill] sm:$0xff] }
 0x18d   : > { %v4628_v24 = vor.u32 %v4626_v28, %v4625_v56  ;;  %v4636_v54 = vor.u32 %v4634_v20, %v4633_v33  ;;  %v4536_v7 = vmul.bf16 %v8247_v55, %v9015_v15  ;;  %v4650_v55 = vshll.u32 %v4535_v27, 16  ;;  %v7359_v28 = vld [vmem:[%s8923_s6 + $0x1e0] sm:$0xff]  }
 0x18e   : > { %v2763_v23 = vsel %vm1547_vm2, %v2758_v0, %v2762_v62  ;;  %v4641_v8 = vrot.slane %v4639_v30, 7  ;;  %v7365_v0 = vld [vmem:[%s8923_s6 + $0xd8] sm:$0xff]  }
 0x18f   : > { %v4629_v32 = vsel %vm1757_vm3, %v4617_v59, %v4628_v24  ;;  %v4649_v59 = vrot.slane %v4647_v46, 7  ;;  %v9019_v24 = vld [vmem:[#allocation28_spill] sm:$0xff]  ;;  %v9021_v46 = vld [vmem:[#allocation30_spill] sm:$0xff] }
 0x190   : > { %6693 = vmatmul.mubr.bf16.gmra.mrb[60].mxu0 %v8427_v6  ;;  %6905 = vmatmul.mubr.bf16.vlgmr.msra.gmra.mrb[0].mxu1 %v4613_v21  ;;  %v4537_v21 = vmul.bf16 %v8298_v49, %v9017_v37 }
 0x191   : > { %6937 = vmatpush3.bf16.msra.mxu1 %v8417_v19  ;;  %6712 = vmatprep.mubr.bf16.mxu0 %v2755_v58  ;;  %v2766_v19 = vor.u32 %v2764_v13, %v2762_v62  ;;  %v4642_v58 = vshll.u32 %v4534_v60, 16  ;;  %v4652_v49 = vor.u32 %v4650_v55, %v4649_v59  ;;  %v9020_v13 = vld [vmem:[#allocation10_spill] sm:$0xff] }
 0x192   : > { %6908 = vmatprep.mubr.bf16.mxu1 %v4621_v57  ;;  %6938 = vmatprep.subr.bf16.mxu1 %v7356_v45  ;;  %v4655_v57 = vshrl.u32 %v4536_v7, 16  ;;  %v4663_v62 = vshrl.u32 %v4537_v21, 16 }
 0x193   : > { %v2771_v39 = vsel %vm1547_vm2, %v2766_v19, %v9016_v16  ;;  %v4644_v38 = vor.u32 %v4642_v58, %v4641_v8  ;;  %v4653_v30 = vsel %vm1757_vm3, %v4641_v8, %v4652_v49  ;;  %v4666_v19 = vshll.u32 %v4537_v21, 16  ;;  %v7367_v8 = vld [vmem:[%s8923_s6 + $0xe0] sm:$0xff]   ;;  %v7366_v21 = vld [vmem:[%s8923_s6 + $0x1f8] sm:$0xff]   ;;  %v7368_v58 = vld [vmem:[%s8923_s6 + $0xe8] sm:$0xff]  }
 0x194   : > { %v4657_v27 = vrot.slane %v4655_v57, 7 }
 0x195   : > { %6939 = vmatpush3.bf16.msra.mxu1 %v7356_v45  ;;  %v4637_v45 = vsel %vm1757_vm3, %v4625_v56, %v4636_v54  ;;  %v7364_v56 = vld [vmem:[%s8923_s6 + $0xd0] sm:$0xff]   ;;  %v4645_v60 = vsel %vm1757_vm3, %v4633_v33, %v4644_v38  ;;  %v4665_v33 = vrot.slane %v4663_v62, 7  ;;  %v4539_v54 = vmul.bf16 %v8361_v42, %v9020_v13  ;;  %v9023_v38 = vld [vmem:[#allocation13_spill] sm:$0xff] }
 0x196   : > { %6940 = vmatprep.subr.bf16.mxu1 %v7357_v29  ;;  %v4541_v57 = vmul.bf16 %v8411_v12, %v9023_v38  ;;  %v7370_v12 = vld [vmem:[%s8923_s6 + $0xf0] sm:$0xff]  }
 0x197   : > { %v4668_v42 = vor.u32 %v4666_v19, %v4665_v33 }
 0x198   : > { %6713 = vmatmul.mubr.bf16.vlgmr.msra.gmra.mrb[32].mxu0 %v2763_v23  ;;  %6909 = vmatmul.mubr.bf16.gmra.mrb[4].mxu1 %v4629_v32 }
 0x199   : > { %6716 = vmatprep.mubr.bf16.mxu0 %v2771_v39  ;;  %6912 = vmatprep.mubr.bf16.mxu1 %v4637_v45  ;;  %v9022_v39 = vld [vmem:[#allocation12_spill] sm:$0xff]  ;;  %v4669_v55 = vsel %vm1757_vm3, %v4657_v27, %v4668_v42 }
 0x19a   : > { %6941 = vmatpush3.bf16.msra.mxu1 %v7357_v29  ;;  %6745 = vmatpush3.bf16.msra.mxu0 %v8473_v5  ;;  %v9018_v5 = vld [vmem:[#allocation9_spill] sm:$0xff]  ;;  %v4540_v45 = vmul.bf16 %v8363_v41, %v9022_v39 }
 0x19b   : > { %6942 = vmatprep.subr.bf16.mxu1 %v7358_v25  ;;  %6746 = vmatprep.subr.bf16.mxu0 %v7362_v61  ;;  %v4538_v20 = vmul.bf16 %v8315_v17, %v9018_v5  ;;  %v7360_v29 = vld [vmem:[%s8923_s6 + $0x1e8] sm:$0xff]   ;;  %v4658_v17 = vshll.u32 %v4536_v7, 16 }
 0x19c   : > { %v4687_v49 = vshrl.u32 %v4540_v45, 16 }
 0x19d   : > { %v4660_v23 = vor.u32 %v4658_v17, %v4657_v27  ;;  %v4671_v32 = vshrl.u32 %v4538_v20, 16  ;;  %v4674_v41 = vshll.u32 %v4538_v20, 16  ;;  %v9024_v20 = vld [vmem:[#allocation15_spill] sm:$0xff] }
 0x19e   : > { %6943 = vmatpush3.bf16.msra.mxu1 %v7358_v25  ;;  %6747 = vmatpush3.bf16.msra.mxu0 %v7362_v61  ;;  %v7363_v25 = vld [vmem:[%s8923_s6 + $0x1f0] sm:$0xff]   ;;  %v4679_v61 = vshrl.u32 %v4539_v54, 16  ;;  %v4689_v27 = vrot.slane %v4687_v49, 7  ;;  %v8652_v49 = vld [vmem:[#allocation2 + $0x18] sm:$0xff] }
 0x19f   : > { %6944 = vmatprep.subr.bf16.mxu1 %v7359_v28  ;;  %6748 = vmatprep.subr.bf16.mxu0 %v7364_v56  ;;  %v4661_v7 = vsel %vm1757_vm3, %v4649_v59, %v4660_v23  ;;  %v4673_v16 = vrot.slane %v4671_v32, 7 }
 0x1a0   : > { %6717 = vmatmul.mubr.bf16.gmra.mrb[36].mxu0 %v9019_v24  ;;  %6913 = vmatmul.mubr.bf16.gmra.mrb[8].mxu1 %v4645_v60  ;;  %v4681_v59 = vrot.slane %v4679_v61, 7 }
 0x1a1   : > { %6720 = vmatprep.mubr.bf16.mxu0 %v9021_v46  ;;  %6916 = vmatprep.mubr.bf16.mxu1 %v4653_v30  ;;  %v4698_v46 = vshll.u32 %v4541_v57, 16 }
 0x1a2   : > { %6945 = vmatpush3.bf16.msra.mxu1 %v7359_v28  ;;  %6749 = vmatpush3.bf16.msra.mxu0 %v7364_v56  ;;  %v4682_v28 = vshll.u32 %v4539_v54, 16  ;;  %v4676_v56 = vor.u32 %v4674_v41, %v4673_v16  ;;  %v9025_v54 = vld [vmem:[#allocation16_spill] sm:$0xff] }
 0x1a3   : > { %6946 = vmatprep.subr.bf16.mxu1 %v7360_v29  ;;  %6750 = vmatprep.subr.bf16.mxu0 %v7365_v0 }
 0x1a4   : > { %v4684_v62 = vor.u32 %v4682_v28, %v4681_v59  ;;  %v4677_v60 = vsel %vm1757_vm3, %v4665_v33, %v4676_v56  ;;  %v4543_v33 = vmul.bf16 %v8455_v1, %v9025_v54  ;;  %v2533_v28 = vld [vmem:[#allocation2 + $0x88] sm:$0x1] }
 0x1a6   : > { %6947 = vmatpush3.bf16.msra.mxu1 %v7360_v29  ;;  %6751 = vmatpush3.bf16.msra.mxu0 %v7365_v0  ;;  %v4542_v29 = vmul.bf16 %v8427_v6, %v9024_v20  ;;  %v7371_v0 = vld [vmem:[%s8923_s6 + $0xf8] sm:$0xff]   ;;  %v4685_v24 = vsel %vm1757_vm3, %v4673_v16, %v4684_v62  ;;  %v4690_v6 = vshll.u32 %v4540_v45, 16  ;;  %v4711_v32 = vshrl.u32 %v4543_v33, 16 }
 0x1a7   : > { %6948 = vmatprep.subr.bf16.mxu1 %v7363_v25  ;;  %6752 = vmatprep.subr.bf16.mxu0 %v7367_v8 }
 0x1a8   : > { %6721 = vmatmul.mubr.bf16.gmra.mrb[40].mxu0 %v8423_v31  ;;  %6917 = vmatmul.mubr.bf16.gmra.mrb[12].mxu1 %v4661_v7  ;;  %v8624_v31 = vld [vmem:[%s8923_s6 + $0x200] sm:$0xff]   ;;  %v4692_v17 = vor.u32 %v4690_v6, %v4689_v27  ;;  %v4703_v19 = vshrl.u32 %v4542_v29, 16  ;;  %v4706_v61 = vshll.u32 %v4542_v29, 16  ;;  %v4714_v7 = vshll.u32 %v4543_v33, 16 }
 0x1a9   : > { %6724 = vmatprep.mubr.bf16.mxu0 %v8440_v26  ;;  %6920 = vmatprep.mubr.bf16.mxu1 %v4669_v55  ;;  %v4695_v26 = vshrl.u32 %v4541_v57, 16  ;;  %v8656_v29 = vld [vmem:[#allocation2 + $0x20] sm:$0xff]  ;;  %v2868_v33 = vshrl.u32 %v8525_v43, 16 }
 0x1aa   : > { %6949 = vmatpush3.bf16.msra.mxu1 %v7363_v25  ;;  %6753 = vmatpush3.bf16.msra.mxu0 %v7367_v8  ;;  %v4705_v25 = vrot.slane %v4703_v19, 7  ;;  %v9026_v8 = vld [vmem:[#allocation19_spill] sm:$0xff] }
 0x1ab   : > { %6950 = vmatprep.subr.bf16.mxu1 %v7366_v21  ;;  %6754 = vmatprep.subr.bf16.mxu0 %v7368_v58  ;;  %v4697_v30 = vrot.slane %v4695_v26, 7  ;;  %v4544_v42 = vmul.bf16 %v8231_v34, %v9026_v8 }
 0x1ac   : > { %v4708_v16 = vor.u32 %v4706_v61, %v4705_v25 }
 0x1ad   : > { %v4700_v23 = vor.u32 %v4698_v46, %v4697_v30  ;;  %v4719_v45 = vshrl.u32 %v4544_v42, 16  ;;  %v4722_v57 = vshll.u32 %v4544_v42, 16 }
 0x1ae   : > { %6951 = vmatpush3.bf16.msra.mxu1 %v7366_v21  ;;  %6755 = vmatpush3.bf16.msra.mxu0 %v7368_v58  ;;  %v3166_v58 = vld [vmem:[#allocation2 + $0x10] sm:$0xff]  ;;  %v4709_v55 = vsel %vm1757_vm3, %v4697_v30, %v4708_v16  ;;  %v3185_v30 = vmul.bf16 %v8656_v29, %v7719_v18  ;;  %v7372_v18 = vld [vmem:[%s8923_s6 + $0x208] sm:$0xff]  }
 0x1af   : > { %6984 = vmatprep.subr.bf16.mxu1 %v8624_v31  ;;  %6756 = vmatprep.subr.bf16.mxu0 %v7370_v12  ;;  %v4701_v1 = vsel %vm1757_vm3, %v4689_v27, %v4700_v23 }
 0x1b0   : > { %6725 = vmatmul.mubr.bf16.gmra.mrb[44].mxu0 %v8468_v48  ;;  %6921 = vmatmul.mubr.bf16.gmra.mrb[16].mxu1 %v4677_v60  ;;  %v4693_v48 = vsel %vm1757_vm3, %v4681_v59, %v4692_v17  ;;  %v4721_v59 = vrot.slane %v4719_v45, 7  ;;  %v9029_v60 = vld [vmem:[#allocation27_spill] sm:$0xff]  ;;  %v2870_v17 = vor.u32 %v2868_v33, %v8534_v35 }
 0x1b1   : > { %6728 = vmatprep.mubr.bf16.mxu0 %v8476_v52  ;;  %6924 = vmatprep.mubr.bf16.mxu1 %v4685_v24  ;;  %v4713_v52 = vrot.slane %v4711_v32, 7  ;;  %v2694_v27 = vmul.bf16 %v9029_v60, %v2533_v28  ;;  %v3269_v32 = vshrl.u32 %v3185_v30, 16 }
 0x1b2   : > { %6757 = vmatpush3.bf16.msra.mxu0 %v7370_v12  ;;  %v4724_v56 = vor.u32 %v4722_v57, %v4721_v59  ;;  %v9028_v12 = vld [vmem:[#allocation4_spill] sm:$0xff]  ;;  %v7374_v57 = vld [vmem:[%s8923_s6 + $0x218] sm:$0xff]  }
 0x1b3   : > { %6758 = vmatprep.subr.bf16.mxu0 %v7371_v0  ;;  %v4716_v21 = vor.u32 %v4714_v7, %v4713_v52  ;;  %v2872_v6 = vshll.u32 %v2694_v27, 16  ;;  %v3272_v7 = vshll.u32 %v3185_v30, 16  ;;  %v8705_v27 = vld [vmem:[#allocation2 + $0x48] sm:$0xff] }
 0x1b4   : > { %v7376_v30 = vld [vmem:[%s8923_s6 + $0x228] sm:$0xff]  }
 0x1b5   : > { %v4717_v34 = vsel %vm1757_vm3, %v4705_v25, %v4716_v21  ;;  %v8670_v25 = vld [vmem:[#allocation2 + $0x30] sm:$0xff] }
 0x1b6   : > { %6759 = vmatpush3.bf16.msra.mxu0 %v7371_v0  ;;  %v3184_v0 = vmul.bf16 %v8652_v49, %v7713_v14 }
 0x1b8   : > { %6729 = vmatmul.mubr.bf16.gmra.mrb[48].mxu0 %v8493_v9  ;;  %6925 = vmatmul.mubr.bf16.gmra.mrb[20].mxu1 %v4693_v48  ;;  %v9027_v9 = vld [vmem:[#allocation5_spill] sm:$0xff]  ;;  %v3261_v19 = vshrl.u32 %v3184_v0, 16  ;;  %v2874_v48 = vrot.slane %v2872_v6, 1  ;;  %v3264_v61 = vshll.u32 %v3184_v0, 16  ;;  %v8707_v0 = vld [vmem:[#allocation2 + $0x50] sm:$0xff] }
 0x1b9   : > { %6732 = vmatprep.mubr.bf16.mxu0 %v8502_v40  ;;  %6928 = vmatprep.mubr.bf16.mxu1 %v4701_v1  ;;  %v3183_v41 = vmul.bf16 %v3166_v58, %v9027_v9  ;;  %v3165_v40 = vld [vmem:[#allocation2 + $0x8] sm:$0x80]  ;;  %v3271_v1 = vrot.slane %v3269_v32, 7  ;;  %v8687_v58 = vld [vmem:[#allocation2 + $0x38] sm:$0xff] }
 0x1ba   : > { %v3182_v62 = vmul.bf16 %v3165_v40, %v9028_v12  ;;  %v3263_v43 = vrot.slane %v3261_v19, 7 }
 0x1bb   : > { %v3253_v26 = vshrl.u32 %v3183_v41, 16  ;;  %v3256_v46 = vshll.u32 %v3183_v41, 16  ;;  %v3274_v21 = vor.u32 %v3272_v7, %v3271_v1 }
 0x1bc   : > { %v3266_v16 = vor.u32 %v3264_v61, %v3263_v43 }
 0x1bd   : > { %v3255_v24 = vrot.slane %v3253_v26, 7  ;;  %v3275_v9 = vsel %vm1757_vm3, %v3263_v43, %v3274_v21  ;;  %v8738_v21 = vld [vmem:[#allocation2 + $0x68] sm:$0xff] }
 0x1bf   : > { %v3258_v23 = vor.u32 %v3256_v46, %v3255_v24  ;;  %v3191_v46 = vmul.bf16 %v8707_v0, %v9017_v37 }
 0x1c0   : > { %6733 = vmatmul.mubr.bf16.gmra.mrb[52].mxu0 %v8507_v44  ;;  %6929 = vmatmul.mubr.bf16.gmra.mrb[24].mxu1 %v4709_v55  ;;  %v4725_v44 = vsel %vm1757_vm3, %v4713_v52, %v4724_v56  ;;  %v3187_v52 = vmul.bf16 %v8670_v25, %v7747_v63  ;;  %v8689_v63 = vld [vmem:[#allocation2 + $0x40] sm:$0xff] }
 0x1c1   : > { %6736 = vmatprep.mubr.bf16.mxu0 %v8517_v10  ;;  %6932 = vmatprep.mubr.bf16.mxu1 %v4717_v34  ;;  %v3249_v10 = vshrl.u32 %v3182_v62, 16  ;;  %v3188_v34 = vmul.bf16 %v8687_v58, %v7751_v3  ;;  %v3189_v40 = vmul.bf16 %v8689_v63, %v9014_v11  ;;  %v7375_v3 = vld [vmem:[%s8923_s6 + $0x220] sm:$0xff]  }
 0x1c2   : > { %v3285_v55 = vshrl.u32 %v3187_v52, 16  ;;  %v3288_v56 = vshll.u32 %v3187_v52, 16 }
 0x1c3   : > { %v3251_v14 = vrot.slane %v3249_v10, 7  ;;  %v3293_v62 = vshrl.u32 %v3188_v34, 16  ;;  %v3304_v19 = vshll.u32 %v3189_v40, 16 }
 0x1c4   : > { %v3287_v41 = vrot.slane %v3285_v55, 7 }
 0x1c5   : > { %v3259_v35 = vsel %vm1757_vm3, %v3251_v14, %v3258_v23  ;;  %v3295_v10 = vrot.slane %v3293_v62, 7  ;;  %v7377_v23 = vld [vmem:[%s8923_s6 + $0x230] sm:$0xff]  }
 0x1c6   : > { %v3290_v26 = vor.u32 %v3288_v56, %v3287_v41 }
 0x1c8   : > { %6737 = vmatmul.mubr.bf16.gmra.mrb[56].mxu0 %v8532_v50  ;;  %6933 = vmatmul.mubr.bf16.gmra.mrb[28].mxu1 %v4725_v44  ;;  %v8668_v50 = vld [vmem:[#allocation2 + $0x28] sm:$0xff]  ;;  %v3301_v44 = vshrl.u32 %v3189_v40, 16 }
 0x1c9   : > { %6740 = vmatprep.mubr.bf16.mxu0 %v8541_v53  ;;  %6952 = vmatprep.mubr.bf16.mxu1 %v8652_v49  ;;  %v2875_v53 = vsel %vm1547_vm2, %v2870_v17, %v2874_v48  ;;  %v3186_v42 = vmul.bf16 %v8668_v50, %v7730_v36  ;;  %v7373_v36 = vld [vmem:[%s8923_s6 + $0x210] sm:$0xff]   ;;  %v3296_v17 = vshll.u32 %v3188_v34, 16  ;;  %v8723_v48 = vld [vmem:[#allocation2 + $0x58] sm:$0xff] }
 0x1ca   : > { %v3303_v6 = vrot.slane %v3301_v44, 7 }
 0x1cb   : > { %v3277_v45 = vshrl.u32 %v3186_v42, 16  ;;  %v3280_v28 = vshll.u32 %v3186_v42, 16  ;;  %v3192_v42 = vmul.bf16 %v8723_v48, %v9018_v5 }
 0x1cc   : > { %v3306_v32 = vor.u32 %v3304_v19, %v3303_v6 }
 0x1cd   : > { %v3279_v59 = vrot.slane %v3277_v45, 7  ;;  %v3328_v40 = vshll.u32 %v3192_v42, 16 }
 0x1cf   : > { %v3282_v12 = vor.u32 %v3280_v28, %v3279_v59  ;;  %v3291_v33 = vsel %vm1757_vm3, %v3279_v59, %v3290_v26  ;;  %v8752_v26 = vld [vmem:[#allocation2 + $0x80] sm:$0xff] }
 0x1d0   : > { %6741 = vmatmul.mubr.bf16.gmra.mrb[60].mxu0 %v2875_v53  ;;  %6953 = vmatmul.mubr.bf16.vlgmr.msra.gmra.mrb[0].mxu1 %v8656_v29  ;;  %v8725_v53 = vld [vmem:[#allocation2 + $0x60] sm:$0xff] }
 0x1d1   : > { %6985 = vmatpush3.bf16.msra.mxu1 %v8624_v31  ;;  %6760 = vmatprep.mubr.bf16.mxu0 %v3259_v35  ;;  %v3267_v31 = vsel %vm1757_vm3, %v3255_v24, %v3266_v16  ;;  %v3283_v11 = vsel %vm1757_vm3, %v3271_v1, %v3282_v12  ;;  %v3190_v24 = vmul.bf16 %v8705_v27, %v9015_v15  ;;  %v7378_v35 = vld [vmem:[%s8923_s6 + $0x238] sm:$0xff]   ;;  %v3325_v16 = vshrl.u32 %v3192_v42, 16 }
 0x1d2   : > { %6956 = vmatprep.mubr.bf16.mxu1 %v8668_v50  ;;  %6986 = vmatprep.subr.bf16.mxu1 %v7372_v18  ;;  %v3298_v15 = vor.u32 %v3296_v17, %v3295_v10  ;;  %v3307_v1 = vsel %vm1757_vm3, %v3295_v10, %v3306_v32  ;;  %v3193_v61 = vmul.bf16 %v8725_v53, %v9020_v13 }
 0x1d3   : > { %v3309_v14 = vshrl.u32 %v3190_v24, 16  ;;  %v3312_v7 = vshll.u32 %v3190_v24, 16  ;;  %v3194_v13 = vmul.bf16 %v8738_v21, %v9022_v39 }
 0x1d4   : > { %v3299_v37 = vsel %vm1757_vm3, %v3287_v41, %v3298_v15  ;;  %v3333_v55 = vshrl.u32 %v3193_v61, 16  ;;  %v3336_v28 = vshll.u32 %v3193_v61, 16  ;;  %v8764_v15 = vld [vmem:[#allocation2 + $0x88] sm:$0xff] }
 0x1d5   : > { %6987 = vmatpush3.bf16.msra.mxu1 %v7372_v18  ;;  %v3317_v18 = vshrl.u32 %v3191_v46, 16  ;;  %v3311_v43 = vrot.slane %v3309_v14, 7  ;;  %v3341_v12 = vshrl.u32 %v3194_v13, 16 }
 0x1d6   : > { %6988 = vmatprep.subr.bf16.mxu1 %v7373_v36 }
 0x1d7   : > { %v3319_v52 = vrot.slane %v3317_v18, 7  ;;  %v3314_v5 = vor.u32 %v3312_v7, %v3311_v43 }
 0x1d8   : > { %6761 = vmatmul.mubr.bf16.vlgmr.msra.gmra.mrb[32].mxu0 %v3267_v31  ;;  %6957 = vmatmul.mubr.bf16.gmra.mrb[4].mxu1 %v8670_v25  ;;  %v8740_v31 = vld [vmem:[#allocation2 + $0x70] sm:$0xff] }
 0x1d9   : > { %6764 = vmatprep.mubr.bf16.mxu0 %v3275_v9  ;;  %6960 = vmatprep.mubr.bf16.mxu1 %v8687_v58  ;;  %v3315_v59 = vsel %vm1757_vm3, %v3303_v6, %v3314_v5  ;;  %v3335_v9 = vrot.slane %v3333_v55, 7  ;;  %v3195_v41 = vmul.bf16 %v8740_v31, %v9023_v38 }
 0x1da   : > { %6989 = vmatpush3.bf16.msra.mxu1 %v7373_v36  ;;  %v3320_v36 = vshll.u32 %v3191_v46, 16  ;;  %v5370_v46 = vmul.bf16 %v8652_v49, %v7763_v22 }
 0x1db   : > { %6990 = vmatprep.subr.bf16.mxu1 %v7374_v57  ;;  %v3338_v62 = vor.u32 %v3336_v28, %v3335_v9  ;;  %v3349_v39 = vshrl.u32 %v3195_v41, 16  ;;  %v3352_v6 = vshll.u32 %v3195_v41, 16  ;;  %v9031_v41 = vld [vmem:[#allocation14_spill] sm:$0xff] }
 0x1dc   : > { %v3322_v45 = vor.u32 %v3320_v36, %v3319_v52  ;;  %v5439_v32 = vshll.u32 %v5370_v46, 16  ;;  %v9030_v36 = vld [vmem:[#allocation11_spill] sm:$0xff] }
 0x1dd   : > { %v3351_v24 = vrot.slane %v3349_v39, 7  ;;  %v5373_v5 = vmul.bf16 %v8670_v25, %v9030_v36  ;;  %v9032_v39 = vld [vmem:[#allocation17_spill] sm:$0xff] }
 0x1de   : > { %6991 = vmatpush3.bf16.msra.mxu1 %v7374_v57  ;;  %v3327_v57 = vrot.slane %v3325_v16, 7  ;;  %v3323_v34 = vsel %vm1757_vm3, %v3311_v43, %v3322_v45 }
 0x1df   : > { %6992 = vmatprep.subr.bf16.mxu1 %v7375_v3 }
 0x1e0   : > { %6765 = vmatmul.mubr.bf16.gmra.mrb[36].mxu0 %v3283_v11  ;;  %6961 = vmatmul.mubr.bf16.gmra.mrb[8].mxu1 %v8689_v63  ;;  %v3330_v56 = vor.u32 %v3328_v40, %v3327_v57  ;;  %v3343_v11 = vrot.slane %v3341_v12, 7  ;;  %v3339_v38 = vsel %vm1757_vm3, %v3327_v57, %v3338_v62  ;;  %v8779_v57 = vld [vmem:[#allocation2] sm:$0xff]  ;;  %v5374_v40 = vmul.bf16 %v8687_v58, %v9031_v41 }
 0x1e1   : > { %6768 = vmatprep.mubr.bf16.mxu0 %v3291_v33  ;;  %6964 = vmatprep.mubr.bf16.mxu1 %v8705_v27  ;;  %v3344_v33 = vshll.u32 %v3194_v13, 16  ;;  %v5460_v13 = vshll.u32 %v5373_v5, 16  ;;  %v5464_v58 = vshrl.u32 %v5373_v5, 16 }
 0x1e2   : > { %6993 = vmatpush3.bf16.msra.mxu1 %v7375_v3  ;;  %v8750_v3 = vld [vmem:[#allocation2 + $0x78] sm:$0xff]  ;;  %v3331_v44 = vsel %vm1757_vm3, %v3319_v52, %v3330_v56 }
 0x1e3   : > { %6994 = vmatprep.subr.bf16.mxu1 %v7376_v30  ;;  %v3196_v10 = vmul.bf16 %v8750_v3, %v9024_v20  ;;  %v3346_v17 = vor.u32 %v3344_v33, %v3343_v11  ;;  %v3354_v20 = vor.u32 %v3352_v6, %v3351_v24  ;;  %v5462_v62 = vrot.slane %v5460_v13, 1 }
 0x1e5   : > { %v3357_v19 = vshrl.u32 %v3196_v10, 16  ;;  %v3355_v22 = vsel %vm1757_vm3, %v3343_v11, %v3354_v20  ;;  %v3360_v42 = vshll.u32 %v3196_v10, 16  ;;  %v5468_v10 = vshll.u32 %v5374_v40, 16 }
 0x1e6   : > { %6995 = vmatpush3.bf16.msra.mxu1 %v7376_v30  ;;  %v3197_v30 = vmul.bf16 %v8752_v26, %v9025_v54  ;;  %v3347_v54 = vsel %vm1757_vm3, %v3335_v9, %v3346_v17  ;;  %v5472_v20 = vshrl.u32 %v5374_v40, 16 }
 0x1e7   : > { %6996 = vmatprep.subr.bf16.mxu1 %v7377_v23  ;;  %v3359_v18 = vrot.slane %v3357_v19, 7  ;;  %v5470_v6 = vrot.slane %v5468_v10, 1  ;;  %v5466_v19 = vor.u32 %v5464_v58, %v5462_v62 }
 0x1e8   : > { %6769 = vmatmul.mubr.bf16.gmra.mrb[40].mxu0 %v3299_v37  ;;  %6965 = vmatmul.mubr.bf16.gmra.mrb[12].mxu1 %v8707_v0  ;;  %v3365_v14 = vshrl.u32 %v3197_v30, 16  ;;  %v3198_v37 = vmul.bf16 %v8764_v15, %v9026_v8  ;;  %v5437_v8 = vshrl.u32 %v5370_v46, 16  ;;  %v9033_v46 = vld [vmem:[#allocation18_spill] sm:$0xff] }
 0x1e9   : > { %6772 = vmatprep.mubr.bf16.mxu0 %v3307_v1  ;;  %6968 = vmatprep.mubr.bf16.mxu1 %v8723_v48  ;;  %v3362_v1 = vor.u32 %v3360_v42, %v3359_v18  ;;  %v5376_v17 = vmul.bf16 %v8705_v27, %v9033_v46  ;;  %v9035_v42 = vld [vmem:[#allocation21_spill] sm:$0xff] }
 0x1ea   : > { %6997 = vmatpush3.bf16.msra.mxu1 %v7377_v23  ;;  %v5371_v23 = vmul.bf16 %v8656_v29, %v7790_v4  ;;  %v3367_v49 = vrot.slane %v3365_v14, 7  ;;  %v5441_v4 = vrot.slane %v5439_v32, 1  ;;  %v5372_v29 = vmul.bf16 %v8668_v50, %v7829_v51  ;;  %v9034_v14 = vld [vmem:[#allocation20_spill] sm:$0xff] }
 0x1eb   : > { %6998 = vmatprep.subr.bf16.mxu1 %v7378_v35  ;;  %v3373_v52 = vshrl.u32 %v3198_v37, 16  ;;  %v3363_v55 = vsel %vm1757_vm3, %v3351_v24, %v3362_v1  ;;  %v3376_v9 = vshll.u32 %v3198_v37, 16  ;;  %v5474_v32 = vor.u32 %v5472_v20, %v5470_v6  ;;  %v9036_v1 = vld [vmem:[#allocation22_spill] sm:$0xff] }
 0x1ec   : > { %v5444_v43 = vshll.u32 %v5371_v23, 16  ;;  %v5442_v16 = vor.u32 %v5441_v4, %v5437_v8  ;;  %v5452_v45 = vshll.u32 %v5372_v29, 16  ;;  %v5456_v12 = vshrl.u32 %v5372_v29, 16 }
 0x1ed   : > { %v5378_v27 = vmul.bf16 %v8723_v48, %v9035_v42  ;;  %v5488_v4 = vshrl.u32 %v5376_v17, 16 }
 0x1ee   : > { %6999 = vmatpush3.bf16.msra.mxu1 %v7378_v35  ;;  %v3368_v35 = vshll.u32 %v3197_v30, 16  ;;  %v5446_v7 = vrot.slane %v5444_v43, 1  ;;  %v5454_v25 = vrot.slane %v5452_v45, 1  ;;  %v9037_v45 = vld [vmem:[#allocation23_spill] sm:$0xff] }
 0x1ef   : > { %v5380_v48 = vmul.bf16 %v8738_v21, %v9037_v45 }
 0x1f0   : > { %6773 = vmatmul.mubr.bf16.gmra.mrb[44].mxu0 %v3315_v59  ;;  %6969 = vmatmul.mubr.bf16.gmra.mrb[16].mxu1 %v8725_v53  ;;  %v3370_v61 = vor.u32 %v3368_v35, %v3367_v49  ;;  %v3375_v59 = vrot.slane %v3373_v52, 7  ;;  %v5447_v50 = vsel %vm1547_vm2, %v5442_v16, %v5446_v7  ;;  %v5458_v11 = vor.u32 %v5456_v12, %v5454_v25 }
 0x1f1   : > { %6776 = vmatprep.mubr.bf16.mxu0 %v3323_v34  ;;  %6972 = vmatprep.mubr.bf16.mxu1 %v8738_v21  ;;  %v5448_v34 = vshrl.u32 %v5371_v23, 16  ;;  %v5377_v23 = vmul.bf16 %v8707_v0, %v9034_v14  ;;  %v5379_v0 = vmul.bf16 %v8725_v53, %v9036_v1 }
 0x1f2   : > { %v3371_v51 = vsel %vm1757_vm3, %v3359_v18, %v3370_v61  ;;  %v3378_v56 = vor.u32 %v3376_v9, %v3375_v59  ;;  %v5463_v30 = vsel %vm1547_vm2, %v5458_v11, %v5462_v62  ;;  %v5471_v18 = vsel %vm1547_vm2, %v5466_v19, %v5470_v6 }
 0x1f3   : > { %v5450_v28 = vor.u32 %v5448_v34, %v5446_v7  ;;  %v5500_v61 = vshll.u32 %v5378_v27, 16  ;;  %v5508_v36 = vshll.u32 %v5379_v0, 16  ;;  %v5496_v5 = vshrl.u32 %v5377_v23, 16 }
 0x1f4   : > { %v5504_v59 = vshrl.u32 %v5378_v27, 16  ;;  %v5516_v34 = vshll.u32 %v5380_v48, 16  ;;  %v5512_v40 = vshrl.u32 %v5379_v0, 16  ;;  %v5520_v62 = vshrl.u32 %v5380_v48, 16 }
 0x1f5   : > { %v5455_v24 = vsel %vm1547_vm2, %v5450_v28, %v5454_v25  ;;  %v5502_v16 = vrot.slane %v5500_v61, 1 }
 0x1f6   : > { %v5518_v28 = vrot.slane %v5516_v34, 1 }
 0x1f7   : > { %v5506_v13 = vor.u32 %v5504_v59, %v5502_v16 }
 0x1f8   : > { %6777 = vmatmul.mubr.bf16.gmra.mrb[48].mxu0 %v3331_v44  ;;  %6973 = vmatmul.mubr.bf16.gmra.mrb[20].mxu1 %v8740_v31  ;;  %v5375_v44 = vmul.bf16 %v8689_v63, %v9032_v39  ;;  %v5522_v11 = vor.u32 %v5520_v62, %v5518_v28 }
 0x1f9   : > { %6780 = vmatprep.mubr.bf16.mxu0 %v3339_v38  ;;  %6976 = vmatprep.mubr.bf16.mxu1 %v8750_v3  ;;  %v3379_v38 = vsel %vm1757_vm3, %v3367_v49, %v3378_v56  ;;  %v9039_v56 = vld [vmem:[#allocation25_spill] sm:$0xff] }
 0x1fa   : > { %v5476_v33 = vshll.u32 %v5375_v44, 16  ;;  %v5480_v49 = vshrl.u32 %v5375_v44, 16  ;;  %v5382_v21 = vmul.bf16 %v8750_v3, %v9039_v56  ;;  %v9040_v44 = vld [vmem:[#allocation29_spill] sm:$0xff] }
 0x1fc   : > { %v5478_v63 = vrot.slane %v5476_v33, 1  ;;  %v5532_v10 = vshll.u32 %v5382_v21, 16  ;;  %v5384_v33 = vmul.bf16 %v8764_v15, %v8437_v47  ;;  %v5536_v46 = vshrl.u32 %v5382_v21, 16 }
 0x1fe   : > { %v5479_v37 = vsel %vm1547_vm2, %v5474_v32, %v5478_v63  ;;  %v5482_v35 = vor.u32 %v5480_v49, %v5478_v63  ;;  %v5534_v3 = vrot.slane %v5532_v10, 1  ;;  %v5548_v19 = vshll.u32 %v5384_v33, 16  ;;  %v5369_v63 = vld [vmem:[#allocation2 + $0x98] sm:$0x1] }
 0x200   : > { %6781 = vmatmul.mubr.bf16.gmra.mrb[52].mxu0 %v3347_v54  ;;  %6977 = vmatmul.mubr.bf16.gmra.mrb[24].mxu1 %v8752_v26  ;;  %v5484_v54 = vshll.u32 %v5376_v17, 16  ;;  %v5538_v20 = vor.u32 %v5536_v46, %v5534_v3  ;;  %v5550_v32 = vrot.slane %v5548_v19, 1 }
 0x201   : > { %6784 = vmatprep.mubr.bf16.mxu0 %v3355_v22  ;;  %6980 = vmatprep.mubr.bf16.mxu1 %v8764_v15  ;;  %v5492_v22 = vshll.u32 %v5377_v23, 16  ;;  %v5386_v15 = vmul.bf16 %v5369_v63, %v9029_v60 }
 0x202   : > { %v5486_v43 = vrot.slane %v5484_v54, 1 }
 0x203   : > { %v5494_v29 = vrot.slane %v5492_v22, 1  ;;  %v5564_v42 = vshll.u32 %v5386_v15, 16 }
 0x204   : > { %v5490_v52 = vor.u32 %v5488_v4, %v5486_v43  ;;  %v5487_v8 = vsel %vm1547_vm2, %v5482_v35, %v5486_v43 }
 0x205   : > { %v5566_v35 = vrot.slane %v5564_v42, 1 }
 0x206   : > { %v5495_v7 = vsel %vm1547_vm2, %v5490_v52, %v5494_v29 }
 0x208   : > { %6785 = vmatmul.mubr.bf16.gmra.mrb[56].mxu0 %v3363_v55  ;;  %6981 = vmatmul.mubr.bf16.gmra.mrb[28].mxu1 %v8779_v57  ;;  %v5498_v55 = vor.u32 %v5496_v5, %v5494_v29 }
 0x209   : > { %6788 = vmatprep.mubr.bf16.mxu0 %v3371_v51  ;;  %7000 = vmatprep.mubr.bf16.mxu1 %v5447_v50  ;;  %v5510_v51 = vrot.slane %v5508_v36, 1  ;;  %v9038_v50 = vld [vmem:[#allocation24_spill] sm:$0xff] }
 0x20a   : > { %v5381_v53 = vmul.bf16 %v8740_v31, %v9038_v50  ;;  %v5503_v9 = vsel %vm1547_vm2, %v5498_v55, %v5502_v16  ;;  %v5383_v31 = vmul.bf16 %v8752_v26, %v9040_v44  ;;  %v5385_v26 = vmul.bf16 %v8779_v57, %v8445_v2 }
 0x20b   : > { %v5511_v25 = vsel %vm1547_vm2, %v5506_v13, %v5510_v51  ;;  %v5514_v12 = vor.u32 %v5512_v40, %v5510_v51 }
 0x20c   : > { %v5524_v41 = vshll.u32 %v5381_v53, 16  ;;  %v5528_v58 = vshrl.u32 %v5381_v53, 16  ;;  %v5556_v54 = vshll.u32 %v5385_v26, 16  ;;  %v5544_v47 = vshrl.u32 %v5383_v31, 16 }
 0x20d   : > { %v5560_v43 = vshrl.u32 %v5385_v26, 16 }
 0x20e   : > { %v5526_v39 = vrot.slane %v5524_v41, 1  ;;  %v5558_v49 = vrot.slane %v5556_v54, 1 }
 0x210   : > { %6789 = vmatmul.mubr.bf16.gmra.mrb[60].mxu0 %v3379_v38  ;;  %7001 = vmatmul.mubr.bf16.vlgmr.msra.gmra.mrb[0].mxu1 %v5455_v24  ;;  %v5519_v38 = vsel %vm1547_vm2, %v5514_v12, %v5518_v28  ;;  %v5527_v24 = vsel %vm1547_vm2, %v5522_v11, %v5526_v39  ;;  %v5530_v6 = vor.u32 %v5528_v58, %v5526_v39 }
 0x211   : > { %7004 = vmatprep.mubr.bf16.mxu1 %v5463_v30  ;;  %v5540_v30 = vshll.u32 %v5383_v31, 16  ;;  %v5562_v27 = vor.u32 %v5560_v43, %v5558_v49 }
 0x212   : > { %v5535_v14 = vsel %vm1547_vm2, %v5530_v6, %v5534_v3 }
 0x213   : > { %v5542_v17 = vrot.slane %v5540_v30, 1  ;;  %v5567_v4 = vsel %vm1547_vm2, %v5562_v27, %v5566_v35 }
 0x215   : > { %v5543_v23 = vsel %vm1547_vm2, %v5538_v20, %v5542_v17 }
 0x218   : > { %7005 = vmatmul.mubr.bf16.gmra.mrb[4].mxu1 %v5471_v18  ;;  %v5552_v18 = vshrl.u32 %v5384_v33, 16 }
 0x219   : > { %7008 = vmatprep.mubr.bf16.mxu1 %v5479_v37  ;;  %v5546_v37 = vor.u32 %v5544_v47, %v5542_v17 }
 0x21a   : > { %v5554_v22 = vor.u32 %v5552_v18, %v5550_v32 }
 0x21b   : > { %v5551_v2 = vsel %vm1547_vm2, %v5546_v37, %v5550_v32 }
 0x21c   : > { %v5559_v57 = vsel %vm1547_vm2, %v5554_v22, %v5558_v49 }
 0x220   : > { %7009 = vmatmul.mubr.bf16.gmra.mrb[8].mxu1 %v5487_v8 }
 0x221   : > { %7012 = vmatprep.mubr.bf16.mxu1 %v5495_v7 }
 0x228   : > { %7013 = vmatmul.mubr.bf16.gmra.mrb[12].mxu1 %v5503_v9 }
 0x229   : > { %7016 = vmatprep.mubr.bf16.mxu1 %v5511_v25 }
 0x230   : > { %7017 = vmatmul.mubr.bf16.gmra.mrb[16].mxu1 %v5519_v38 }
 0x231   : > { %7020 = vmatprep.mubr.bf16.mxu1 %v5527_v24 }
 0x238   : > { %7021 = vmatmul.mubr.bf16.gmra.mrb[20].mxu1 %v5535_v14 }
 0x239   : > { %7024 = vmatprep.mubr.bf16.mxu1 %v5543_v23 }
 0x240   : > { %7025 = vmatmul.mubr.bf16.gmra.mrb[24].mxu1 %v5551_v2 }
 0x241   : > { %7028 = vmatprep.mubr.bf16.mxu1 %v5559_v57 }
 0x248   : > { %7029 = vmatmul.mubr.bf16.gmra.mrb[28].mxu1 %v5567_v4 }
 0x2ab   : > { %v6762_v29 = vpop.f32.mrb[32].mxu0 }
 0x2ac   : > { %v3478_v1 = vpop.f32.mrb[33].mxu0 }
 0x2ad   : > { %v6763_v60 = vpop.f32.mrb[34].mxu0 }
 0x2ae   : > { %v3481_v0 = vpop.f32.mrb[35].mxu0 }
 0x2b3   : > { %v6766_v52 = vpop.f32.mrb[36].mxu0 }
 0x2b4   : > { %v3494_v61 = vpop.f32.mrb[37].mxu0 }
 0x2b5   : > { %v6767_v8 = vpop.f32.mrb[38].mxu0 }
 0x2b6   : > { %v3497_v7 = vpop.f32.mrb[39].mxu0 }
 0x2bb   : > { %v6770_v36 = vpop.f32.mrb[40].mxu0 }
 0x2bc   : > { %v3510_v5 = vpop.f32.mrb[41].mxu0 }
 0x2bd   : > { %v6771_v16 = vpop.f32.mrb[42].mxu0 }
 0x2be   : > { %v3513_v45 = vpop.f32.mrb[43].mxu0 }
 0x2c3   : > { %v6774_v48 = vpop.f32.mrb[44].mxu0 }
 0x2c4   : > { %v3526_v55 = vpop.f32.mrb[45].mxu0 }
 0x2c5   : > { %v6775_v59 = vpop.f32.mrb[46].mxu0 }
 0x2c6   : > { %v8825_v51 = vpop.f32.mrb[47].mxu0 }
 0x2cb   : > { %v8827_v50 = vpop.f32.mrb[48].mxu0 }
 0x2cc   : > { %v8829_v53 = vpop.f32.mrb[49].mxu0 }
 0x2cd   : > { %v8831_v13 = vpop.f32.mrb[50].mxu0 }
 0x2ce   : > { %v8833_v34 = vpop.f32.mrb[51].mxu0 }
 0x2d3   : > { %v8835_v9 = vpop.f32.mrb[52].mxu0 }
 0x2d4   : > { %v8837_v25 = vpop.f32.mrb[53].mxu0 }
 0x2d5   : > { %v8839_v41 = vpop.f32.mrb[54].mxu0 }
 0x2d6   : > { %v8841_v40 = vpop.f32.mrb[55].mxu0 }
 0x2db   : > { %v8843_v28 = vpop.f32.mrb[56].mxu0 }
 0x2dc   : > { %v8845_v56 = vpop.f32.mrb[57].mxu0 }
 0x2dd   : > { %v8847_v21 = vpop.f32.mrb[58].mxu0 }
 0x2de   : > { %v8849_v12 = vpop.f32.mrb[59].mxu0 }
 0x2e3   : > { %v8857_v62 = vpop.f32.mrb[60].mxu0  ;;  %v7002_v39 = vpop.f32.mrb[0].mxu1 }
 0x2e4   : > { %v7032_v44 = vadd.f32 %v7002_v39, %v6762_v29  ;;  %v8859_v31 = vpop.f32.mrb[61].mxu0  ;;  %v5666_v11 = vpop.f32.mrb[1].mxu1 }
 0x2e5   : > { %v7033_v10 = vadd.f32 %v5666_v11, %v3478_v1  ;;  %v8861_v38 = vpop.f32.mrb[62].mxu0  ;;  %v7003_v24 = vpop.f32.mrb[2].mxu1 }
 0x2e6   : > { %5891 = vst [vmem:[%s8855_s10 + $0x10] sm:$0xff] %v7032_v44  ;;  %v7034_v30 = vadd.f32 %v7003_v24, %v6763_v60  ;;  %v8864_v33 = vpop.f32.mrb[63].mxu0  ;;  %v5669_v58 = vpop.f32.mrb[3].mxu1 }
 0x2e7   : > { %5889 = vst [vmem:[%s8855_s10] sm:$0xff] %v7033_v10  ;;  %v7035_v3 = vadd.f32 %v5669_v58, %v3481_v0 }
 0x2e8   : > { %5892 = vst [vmem:[%s8855_s10 + $0x18] sm:$0xff] %v7034_v30 }
 0x2e9   : > { %5890 = vst [vmem:[%s8855_s10 + $0x8] sm:$0xff] %v7035_v3 }
 0x2eb   : > { %v7006_v6 = vpop.f32.mrb[4].mxu1 }
 0x2ec   : > { %v7036_v46 = vadd.f32 %v7006_v6, %v6766_v52  ;;  %v5682_v17 = vpop.f32.mrb[5].mxu1 }
 0x2ed   : > { %v7037_v19 = vadd.f32 %v5682_v17, %v3494_v61  ;;  %v7007_v26 = vpop.f32.mrb[6].mxu1 }
 0x2ee   : > { %5895 = vst [vmem:[%s8855_s10 + $0x30] sm:$0xff] %v7036_v46  ;;  %v7038_v20 = vadd.f32 %v7007_v26, %v6767_v8  ;;  %v5685_v63 = vpop.f32.mrb[7].mxu1 }
 0x2ef   : > { %5893 = vst [vmem:[%s8855_s10 + $0x20] sm:$0xff] %v7037_v19  ;;  %v7039_v14 = vadd.f32 %v5685_v63, %v3497_v7 }
 0x2f0   : > { %5896 = vst [vmem:[%s8855_s10 + $0x38] sm:$0xff] %v7038_v20 }
 0x2f1   : > { %5894 = vst [vmem:[%s8855_s10 + $0x28] sm:$0xff] %v7039_v14 }
 0x2f3   : > { %v7010_v23 = vpop.f32.mrb[8].mxu1 }
 0x2f4   : > { %v7040_v32 = vadd.f32 %v7010_v23, %v6770_v36  ;;  %v5698_v54 = vpop.f32.mrb[9].mxu1 }
 0x2f5   : > { %v7041_v47 = vadd.f32 %v5698_v54, %v3510_v5  ;;  %v7011_v15 = vpop.f32.mrb[10].mxu1 }
 0x2f6   : > { %5899 = vst [vmem:[%s8855_s10 + $0x50] sm:$0xff] %v7040_v32  ;;  %v7042_v18 = vadd.f32 %v7011_v15, %v6771_v16  ;;  %v5701_v37 = vpop.f32.mrb[11].mxu1 }
 0x2f7   : > { %5897 = vst [vmem:[%s8855_s10 + $0x40] sm:$0xff] %v7041_v47  ;;  %v7043_v22 = vadd.f32 %v5701_v37, %v3513_v45 }
 0x2f8   : > { %5900 = vst [vmem:[%s8855_s10 + $0x58] sm:$0xff] %v7042_v18 }
 0x2f9   : > { %5898 = vst [vmem:[%s8855_s10 + $0x48] sm:$0xff] %v7043_v22 }
 0x2fb   : > { %v7014_v49 = vpop.f32.mrb[12].mxu1 }
 0x2fc   : > { %v7044_v43 = vadd.f32 %v7014_v49, %v6774_v48  ;;  %v5714_v42 = vpop.f32.mrb[13].mxu1 }
 0x2fd   : > { %v7045_v2 = vadd.f32 %v5714_v42, %v3526_v55  ;;  %v7015_v57 = vpop.f32.mrb[14].mxu1 }
 0x2fe   : > { %5903 = vst [vmem:[%s8855_s10 + $0x70] sm:$0xff] %v7044_v43  ;;  %v7046_v27 = vadd.f32 %v7015_v57, %v6775_v59  ;;  %v5717_v35 = vpop.f32.mrb[15].mxu1 }
 0x2ff   : > { %5901 = vst [vmem:[%s8855_s10 + $0x60] sm:$0xff] %v7045_v2  ;;  %v7047_v4 = vadd.f32 %v5717_v35, %v8825_v51 }
 0x300   : > { %5904 = vst [vmem:[%s8855_s10 + $0x78] sm:$0xff] %v7046_v27 }
 0x301   : > { %5902 = vst [vmem:[%s8855_s10 + $0x68] sm:$0xff] %v7047_v4 }
 0x303   : > { %v7018_v29 = vpop.f32.mrb[16].mxu1 }
 0x304   : > { %v7048_v1 = vadd.f32 %v7018_v29, %v8827_v50  ;;  %v5730_v60 = vpop.f32.mrb[17].mxu1 }
 0x305   : > { %v7049_v0 = vadd.f32 %v5730_v60, %v8829_v53  ;;  %v7019_v52 = vpop.f32.mrb[18].mxu1 }
 0x306   : > { %5907 = vst [vmem:[%s8855_s10 + $0x90] sm:$0xff] %v7048_v1  ;;  %v7050_v61 = vadd.f32 %v7019_v52, %v8831_v13  ;;  %v5733_v8 = vpop.f32.mrb[19].mxu1 }
 0x307   : > { %5905 = vst [vmem:[%s8855_s10 + $0x80] sm:$0xff] %v7049_v0  ;;  %v7051_v7 = vadd.f32 %v5733_v8, %v8833_v34 }
 0x308   : > { %5908 = vst [vmem:[%s8855_s10 + $0x98] sm:$0xff] %v7050_v61 }
 0x309   : > { %5906 = vst [vmem:[%s8855_s10 + $0x88] sm:$0xff] %v7051_v7 }
 0x30b   : > { %v7022_v36 = vpop.f32.mrb[20].mxu1 }
 0x30c   : > { %v7052_v5 = vadd.f32 %v7022_v36, %v8835_v9  ;;  %v5746_v16 = vpop.f32.mrb[21].mxu1 }
 0x30d   : > { %v7053_v45 = vadd.f32 %v5746_v16, %v8837_v25  ;;  %v7023_v48 = vpop.f32.mrb[22].mxu1 }
 0x30e   : > { %5911 = vst [vmem:[%s8855_s10 + $0xb0] sm:$0xff] %v7052_v5  ;;  %v7054_v55 = vadd.f32 %v7023_v48, %v8839_v41  ;;  %v5749_v59 = vpop.f32.mrb[23].mxu1 }
 0x30f   : > { %5909 = vst [vmem:[%s8855_s10 + $0xa0] sm:$0xff] %v7053_v45  ;;  %v7055_v51 = vadd.f32 %v5749_v59, %v8841_v40 }
 0x310   : > { %5912 = vst [vmem:[%s8855_s10 + $0xb8] sm:$0xff] %v7054_v55 }
 0x311   : > { %5910 = vst [vmem:[%s8855_s10 + $0xa8] sm:$0xff] %v7055_v51 }
 0x313   : > { %v7026_v50 = vpop.f32.mrb[24].mxu1 }
 0x314   : > { %v7056_v53 = vadd.f32 %v7026_v50, %v8843_v28  ;;  %v5762_v13 = vpop.f32.mrb[25].mxu1 }
 0x315   : > { %v7057_v34 = vadd.f32 %v5762_v13, %v8845_v56  ;;  %v7027_v9 = vpop.f32.mrb[26].mxu1 }
 0x316   : > { %5915 = vst [vmem:[%s8855_s10 + $0xd0] sm:$0xff] %v7056_v53  ;;  %v7058_v25 = vadd.f32 %v7027_v9, %v8847_v21  ;;  %v5765_v41 = vpop.f32.mrb[27].mxu1 }
 0x317   : > { %5913 = vst [vmem:[%s8855_s10 + $0xc0] sm:$0xff] %v7057_v34  ;;  %v7059_v40 = vadd.f32 %v5765_v41, %v8849_v12 }
 0x318   : > { %5916 = vst [vmem:[%s8855_s10 + $0xd8] sm:$0xff] %v7058_v25 }
 0x319   : > { %5914 = vst [vmem:[%s8855_s10 + $0xc8] sm:$0xff] %v7059_v40 }
 0x31b   : > { %v7030_v39 = vpop.f32.mrb[28].mxu1 }
 0x31c   : > { %v7060_v28 = vadd.f32 %v7030_v39, %v8857_v62  ;;  %v5778_v44 = vpop.f32.mrb[29].mxu1 }
 0x31d   : > { %v7061_v11 = vadd.f32 %v5778_v44, %v8859_v31  ;;  %v7031_v56 = vpop.f32.mrb[30].mxu1 }
 0x31e   : > { %5919 = vst [vmem:[%s8855_s10 + $0xf0] sm:$0xff] %v7060_v28  ;;  %v7062_v10 = vadd.f32 %v7031_v56, %v8861_v38  ;;  %v5781_v24 = vpop.f32.mrb[31].mxu1 }
 0x31f   : > { %5917 = vst [vmem:[%s8855_s10 + $0xe0] sm:$0xff] %v7061_v11  ;;  %v7063_v21 = vadd.f32 %v5781_v24, %v8864_v33 }
 0x320   : > { %5920 = vst [vmem:[%s8855_s10 + $0xf8] sm:$0xff] %v7062_v10 }
 0x321   : > { %5918 = vst [vmem:[%s8855_s10 + $0xe8] sm:$0xff] %v7063_v21 }
 0x322 PF: > { %s17_s24 = sadd.s32 1, %s7387_s24  }
 0x323   : > { %p14_p4 = scmp.ge.s32.totalorder %s17_s24, 4  }
 0x325   :  { %16 = sbr.rel (!%p14_p4) target bundleno = 1 (0x1), region = 86 }

</bundles_post_ra>
